<compile_context>
chip_gen: v7x
topology: tpu7x:2x2x1
jax: 0.10.0
libtpu: 0.0.40
codegen_flags: <defaults>
</compile_context>

<pallas_src>
import functools
import numpy as np
import jax
import jax.numpy as jnp
from jax.experimental import pallas as pl
from jax.experimental.pallas import tpu as pltpu


# ----------------------------- in-kernel helpers -----------------------------

def _ln(v, g, b, eps=1e-5):
    mu = jnp.mean(v, axis=-1, keepdims=True)
    var = jnp.mean((v - mu) ** 2, axis=-1, keepdims=True)
    return (v - mu) * jax.lax.rsqrt(var + eps) * g + b


# ------------------------------- Pallas kernels -------------------------------

def _stconvert_fused_kernel(*refs, depth, heads, head_dim, uses_hx):
    """PatchEmbed + all STB blocks + LSTM gate, fused. Whole batch in one tile."""
    it = iter(refs)
    xi_ref = next(it)
    pe_w = next(it); pe_b = next(it); pe_g = next(it); pe_nb = next(it)
    blocks = []
    for i in range(depth):
        d = {'n1g': next(it), 'n1b': next(it)}
        if uses_hx[i]:
            d['red_wx'] = next(it); d['red_wh'] = next(it); d['red_b'] = next(it)
        for kname in ('wq', 'wk', 'wv', 'bq', 'bk', 'bv', 'attn_bias',
                      'proj_w', 'proj_b', 'n2g', 'n2b',
                      'fc1_w', 'fc1_b', 'fc2_w', 'fc2_b'):
            d[kname] = next(it)
        blocks.append(d)
    ht_ref = next(it)
    ct_ref = next(it)

    bf16 = jnp.bfloat16
    scale = head_dim ** -0.5

    # ---- PatchEmbed: conv(stride == kernel) as matmul, fused with LayerNorm ----
    xt = jnp.dot(xi_ref[...].astype(bf16), pe_w[...],
                 preferred_element_type=jnp.float32) + pe_b[...]
    xt = _ln(xt, pe_g[...], pe_nb[...])                         # (B*L, C) f32

    # hidden_states = None  ->  hx = cx = 0  (SwinLSTMCell default path)
    hx = jnp.zeros_like(xt)
    cx = jnp.zeros_like(xt)

    cur = xt
    for i in range(depth):
        blk = blocks[i]
        x = cur
        xn = _ln(x, blk['n1g'][...], blk['n1b'][...])
        if uses_hx[i]:
            hin = hx if i == 0 else xt
            hxn = _ln(hin, blk['n1g'][...], blk['n1b'][...])
            # red(cat(x, hx)) == x @ red_w[:C] + hx @ red_w[C:]  (no concat)
            xn = (jnp.dot(xn.astype(bf16), blk['red_wx'][...],
                          preferred_element_type=jnp.float32)
                  + jnp.dot(hxn.astype(bf16), blk['red_wh'][...],
                            preferred_element_type=jnp.float32)
                  + blk['red_b'][...])
        xn_b = xn.astype(bf16)

        # ---- window attention: masked full attention over the B*L tokens.
        # attn_bias[h] pre-bakes relative-position bias + shifted-window mask
        # + "not in same window" / "different batch element" masking (-1e9).
        # Per-head weights are pre-split -> no lane slicing of activations.
        o_heads = []
        for h in range(heads):
            q = (jnp.dot(xn_b, blk['wq'][h], preferred_element_type=jnp.float32)
                 + blk['bq'][h]) * scale
            k = (jnp.dot(xn_b, blk['wk'][h], preferred_element_type=jnp.float32)
                 + blk['bk'][h])
            v = (jnp.dot(xn_b, blk['wv'][h], preferred_element_type=jnp.float32)
                 + blk['bv'][h])
            s = jax.lax.dot_general(q.astype(bf16), k.astype(bf16),
                                    (((1,), (1,)), ((), ())),
                                    preferred_element_type=jnp.float32)
            s = s + blk['attn_bias'][h]
            m = jnp.max(s, axis=-1, keepdims=True)
            p = jnp.exp(s - m)
            p = p / jnp.sum(p, axis=-1, keepdims=True)          # exact divide
            o_heads.append(jnp.dot(p.astype(bf16), v.astype(bf16),
                                   preferred_element_type=jnp.float32))
        attn = jnp.concatenate(o_heads, axis=-1)                # (B*L, C)
        attn = jnp.dot(attn.astype(bf16), blk['proj_w'][...],   # ONE K=C proj matmul
                       preferred_element_type=jnp.float32) + blk['proj_b'][...]

        x = x + attn                                            # residual 1
        yn = _ln(x, blk['n2g'][...], blk['n2b'][...])
        y = jnp.dot(yn.astype(bf16), blk['fc1_w'][...],
                    preferred_element_type=jnp.float32) + blk['fc1_b'][...]
        # TODO(synk): tanh-GELU approximation of torch's erf GELU (per perf review).
        y = jax.nn.gelu(y, approximate=True)
        y = jnp.dot(y.astype(bf16), blk['fc2_w'][...],
                    preferred_element_type=jnp.float32) + blk['fc2_b'][...]
        cur = x + y                                             # residual 2

    # ---- SwinLSTMCell gate epilogue ----
    o_t = cur
    ft = jax.nn.sigmoid(o_t)
    ct = ft * (cx + jnp.tanh(o_t))
    ht = ft * jnp.tanh(ct)
    ht_ref[...] = ht.astype(ht_ref.dtype)
    ct_ref[...] = ct.astype(ct_ref.dtype)


def _patch_inflate_kernel(h_ref, w_ref, b_ref, o_ref):
    # ConvTranspose2d folded into one dense matmul; output columns already
    # ordered (co, oh, ow) -> lane-dense NCHW flattened output, + sigmoid.
    y = jnp.dot(h_ref[...].astype(jnp.bfloat16), w_ref[...],
                preferred_element_type=jnp.float32) + b_ref[...]
    o_ref[...] = jax.nn.sigmoid(y).astype(o_ref.dtype)


# ------------------------------- wrappers -------------------------------------

def _full_spec(a):
    nd = a.ndim
    return pl.BlockSpec(a.shape, lambda i, _nd=nd: (0,) * _nd)


def pallas_stconvert_core(xi, prep, cfg, B, L):
    C = cfg['embed_dim']
    heads = cfg['num_heads']
    depth = cfg['depth']
    hd = C // heads
    BL = B * L

    inputs = [xi, prep['pe_w'], prep['pe_b'], prep['pe_ng'], prep['pe_nb']]
    uses_hx = []
    for i in range(depth):
        blk = prep['blocks'][i]
        use = (i % 2 == 0)            # block 0: hx (zeros); even>0: xt; odd: None
        uses_hx.append(use)
        inputs += [blk['n1g'], blk['n1b']]
        if use:
            inputs += [blk['red_wx'], blk['red_wh'], blk['red_b']]
        inputs += [blk['wq'], blk['wk'], blk['wv'], blk['bq'], blk['bk'], blk['bv'],
                   blk['attn_bias'], blk['proj_w'], blk['proj_b'],
                   blk['n2g'], blk['n2b'],
                   blk['fc1_w'], blk['fc1_b'], blk['fc2_w'], blk['fc2_b']]

    kern = functools.partial(_stconvert_fused_kernel, depth=depth, heads=heads,
                             head_dim=hd, uses_hx=tuple(uses_hx))
    out_shape = (jax.ShapeDtypeStruct((BL, C), jnp.float32),
                 jax.ShapeDtypeStruct((BL, C), jnp.float32))
    out_specs = (pl.BlockSpec((BL, C), lambda i: (0, 0)),
                 pl.BlockSpec((BL, C), lambda i: (0, 0)))

    return pl.pallas_call(
        kern,
        out_shape=out_shape,
        grid=(1,),
        in_specs=[_full_spec(a) for a in inputs],
        out_specs=out_specs,
        compiler_params=pltpu.CompilerParams(
            dimension_semantics=("arbitrary",),
            vmem_limit_bytes=32 << 20),
    )(*inputs)


def pallas_patch_inflate(h2, prep):
    B, K = h2.shape
    Nout = prep['pi_wbig'].shape[1]
    return pl.pallas_call(
        _patch_inflate_kernel,
        out_shape=jax.ShapeDtypeStruct((B, Nout), jnp.float32),
        grid=(1,),
        in_specs=[pl.BlockSpec((B, K), lambda i: (0, 0)),
                  pl.BlockSpec((K, Nout), lambda i: (0, 0)),
                  pl.BlockSpec((1, Nout), lambda i: (0, 0))],
        out_specs=pl.BlockSpec((B, Nout), lambda i: (0, 0)),
        compiler_params=pltpu.CompilerParams(
            dimension_semantics=("arbitrary",),
            vmem_limit_bytes=32 << 20),
    )(h2, prep['pi_wbig'], prep['pi_bbig'])


# ----------------------- static precompute (config / params) ------------------

def _window_maps(H, W, ws, shift):
    """Per-token window id / in-window position / shift-region mask (numpy, static)."""
    L = H * W
    N = ws * ws
    hh, www = np.meshgrid(np.arange(H), np.arange(W), indexing='ij')
    rh = (hh - shift) % H
    rw = (www - shift) % W
    win = (rh // ws) * (W // ws) + (rw // ws)
    pos = (rh % ws) * ws + (rw % ws)
    win = win.reshape(L)
    pos = pos.reshape(L)
    same = win[:, None] == win[None, :]
    pair_idx = pos[:, None] * N + pos[None, :]
    if shift > 0:
        img_mask = np.zeros((H, W), np.float32)
        cnt = 0
        for hs in (slice(0, -ws), slice(-ws, -shift), slice(-shift, None)):
            for wsl in (slice(0, -ws), slice(-ws, -shift), slice(-shift, None)):
                img_mask[hs, wsl] = cnt
                cnt += 1
        region = img_mask[rh.reshape(L), rw.reshape(L)]
        smask = np.where(region[:, None] != region[None, :], -100.0, 0.0).astype(np.float32)
    else:
        smask = np.zeros((L, L), np.float32)
    return same, pair_idx, smask


def prepare_params(params, cfg, B):
    """Bake torch-layout parameters into kernel-ready tensors (done once, host-side).
    The returned dict contains ONLY jnp arrays (safe as a jit argument pytree)."""
    Hp, Wp = cfg['patches_resolution']
    ws = cfg['window_size']
    C = cfg['embed_dim']
    heads = cfg['num_heads']
    hd = C // heads
    Cin = cfg['in_chans']
    L = Hp * Wp
    N = ws * ws
    BL = B * L
    f32, bf16 = jnp.float32, jnp.bfloat16

    prep = {
        'pe_w': jnp.asarray(params['pe_w'], bf16),
        'pe_b': jnp.asarray(params['pe_b'], f32).reshape(1, C),
        'pe_ng': jnp.asarray(params['pe_norm_g'], f32).reshape(1, C),
        'pe_nb': jnp.asarray(params['pe_norm_b'], f32).reshape(1, C),
    }

    maps = {0: _window_maps(Hp, Wp, ws, 0),
            ws // 2: _window_maps(Hp, Wp, ws, ws // 2)}

    blocks = []
    for i, blk in enumerate(params['blocks']):
        shift = 0 if i % 2 == 0 else ws // 2
        same, pair_idx, smask = maps[shift]
        relf = np.asarray(blk['rel_bias'], np.float32).reshape(heads, N * N)
        gathered = relf[:, pair_idx.reshape(-1)].reshape(heads, L, L)
        base = np.where(same[None], gathered + smask[None],
                        np.float32(-1e9)).astype(np.float32)
        # TODO(synk): dense (heads, B*L, B*L) bias is O((B*L)^2); fine at this toy
        # resolution, but rebuild as per-window (heads, N, N) for realistic sizes
        # (v7x VMEM).
        full = np.full((heads, BL, BL), -1e9, np.float32)
        for b in range(B):
            full[:, b * L:(b + 1) * L, b * L:(b + 1) * L] = base

        qkv_w = np.asarray(blk['qkv_w'], np.float32)       # (C, 3C), cols = (which, head, dim)
        qkv_b = np.asarray(blk['qkv_b'], np.float32)       # (3C,)

        def split_heads(mat):                              # (C, C) -> (heads, C, hd)
            return np.stack([mat[:, h * hd:(h + 1) * hd] for h in range(heads)], 0)

        d = dict(
            n1g=jnp.asarray(blk['norm1_g'], f32).reshape(1, C),
            n1b=jnp.asarray(blk['norm1_b'], f32).reshape(1, C),
            wq=jnp.asarray(split_heads(qkv_w[:, :C]), bf16),
            wk=jnp.asarray(split_heads(qkv_w[:, C:2 * C]), bf16),
            wv=jnp.asarray(split_heads(qkv_w[:, 2 * C:]), bf16),
            bq=jnp.asarray(qkv_b[:C].reshape(heads, 1, hd), f32),
            bk=jnp.asarray(qkv_b[C:2 * C].reshape(heads, 1, hd), f32),
            bv=jnp.asarray(qkv_b[2 * C:].reshape(heads, 1, hd), f32),
            attn_bias=jnp.asarray(full, f32),
            proj_w=jnp.asarray(blk['proj_w'], bf16),
            proj_b=jnp.asarray(blk['proj_b'], f32).reshape(1, C),
            n2g=jnp.asarray(blk['norm2_g'], f32).reshape(1, C),
            n2b=jnp.asarray(blk['norm2_b'], f32).reshape(1, C),
            fc1_w=jnp.asarray(blk['fc1_w'], bf16),
            fc1_b=jnp.asarray(blk['fc1_b'], f32).reshape(1, -1),
            fc2_w=jnp.asarray(blk['fc2_w'], bf16),
            fc2_b=jnp.asarray(blk['fc2_b'], f32).reshape(1, C))
        if i % 2 == 0:                                     # this block applies `red`
            rw = np.asarray(blk['red_w'], np.float32)      # (2C, C)
            d['red_wx'] = jnp.asarray(rw[:C], bf16)
            d['red_wh'] = jnp.asarray(rw[C:], bf16)
            d['red_b'] = jnp.asarray(blk['red_b'], f32).reshape(1, C)
        blocks.append(d)
    prep['blocks'] = blocks

    # ---- ConvTranspose2d(3x3, stride=2, pad=1, out_pad=1) as one dense matrix ----
    # TODO(synk): dense fold is ~96% zeros; at realistic resolutions implement as
    # per-(kh,kw) small (C,Cin) matmuls with strided output tiles instead.
    k_sz, stride, pad, opad = 3, 2, 1, 1
    Ho = (Hp - 1) * stride - 2 * pad + k_sz + opad
    Wo = (Wp - 1) * stride - 2 * pad + k_sz + opad
    Wt = np.asarray(params['pi_w'], dtype=np.float32)      # torch layout (C, Cin, 3, 3)
    Wbig = np.zeros((L * C, Cin * Ho * Wo), np.float32)
    for ih in range(Hp):
        for iw in range(Wp):
            r0 = (ih * Wp + iw) * C
            for kh in range(k_sz):
                oh = ih * stride - pad + kh
                if oh < 0 or oh >= Ho:
                    continue
                for kw in range(k_sz):
                    ow = iw * stride - pad + kw
                    if ow < 0 or ow >= Wo:
                        continue
                    cols = np.arange(Cin) * Ho * Wo + oh * Wo + ow
                    Wbig[r0:r0 + C, cols] += Wt[:, :, kh, kw]
    prep['pi_wbig'] = jnp.asarray(Wbig, bf16)
    prep['pi_bbig'] = jnp.asarray(
        np.repeat(np.asarray(params['pi_b'], np.float32), Ho * Wo), f32
    ).reshape(1, Cin * Ho * Wo)
    return prep


# --------------------------------- forward ------------------------------------

def stconvert_forward(prep, x, cfg):
    B = x.shape[0]
    Hp, Wp = cfg['patches_resolution']
    C = cfg['embed_dim']
    Cin = cfg['in_chans']
    p = cfg['patch_size']
    L = Hp * Wp
    # ConvTranspose2d(3x3, s=2, p=1, op=1) output size -- static Python ints.
    Ho, Wo = 2 * Hp, 2 * Wp

    # im2col is a pure reshape/transpose since stride == kernel for PatchEmbed.
    xi = x.reshape(B, Cin, Hp, p, Wp, p).transpose(0, 2, 4, 1, 3, 5).reshape(B * L, Cin * p * p)

    # One fused kernel: patch embed + all STB blocks + LSTM gate.
    ht_flat, ct_flat = pallas_stconvert_core(xi, prep, cfg, B, L)   # (B*L, C) each

    # PatchInflated + sigmoid (output already in NCHW flattened column order).
    h2 = ht_flat.reshape(B, L * C)
    img = pallas_patch_inflate(h2, prep)                            # (B, Cin*Ho*Wo)
    img = img.reshape(B, Cin, Ho, Wo)

    Ht = ht_flat.reshape(B, L, C)
    Ct = ct_flat.reshape(B, L, C)
    return img, (Ht, Ct)


# ------------------------------ parameters ----------------------------------

def build_params(key, cfg):
    def nrm(k, shape, scale=0.02):
        return scale * jax.random.normal(k, shape, dtype=jnp.float32)

    keys = list(jax.random.split(key, 64))
    ki = iter(keys)
    C, Cin, p = cfg['embed_dim'], cfg['in_chans'], cfg['patch_size']
    heads, ws = cfg['num_heads'], cfg['window_size']
    hidden = int(cfg['mlp_ratio'] * C)
    N = ws * ws

    params = {}
    pe_conv_w = nrm(next(ki), (C, Cin, p, p))                  # torch Conv2d weight layout
    params['pe_w'] = pe_conv_w.reshape(C, Cin * p * p).T
    params['pe_b'] = nrm(next(ki), (C,))
    params['pe_norm_g'] = jnp.ones((C,), jnp.float32) + nrm(next(ki), (C,))
    params['pe_norm_b'] = nrm(next(ki), (C,))

    # relative position index (as in Swin WindowAttention)
    coords = np.stack(np.meshgrid(np.arange(ws), np.arange(ws), indexing='ij'))
    cf = coords.reshape(2, -1)
    rel = (cf[:, :, None] - cf[:, None, :]).transpose(1, 2, 0).astype(np.int64)
    rel[:, :, 0] += ws - 1
    rel[:, :, 1] += ws - 1
    rel[:, :, 0] *= 2 * ws - 1
    rel_index = rel.sum(-1)                                    # (N, N)

    blocks = []
    for _ in range(cfg['depth']):
        blk = {}
        blk['norm1_g'] = jnp.ones((C,), jnp.float32) + nrm(next(ki), (C,))
        blk['norm1_b'] = nrm(next(ki), (C,))
        blk['red_w'] = nrm(next(ki), (2 * C, C))
        blk['red_b'] = nrm(next(ki), (C,))
        blk['qkv_w'] = nrm(next(ki), (C, 3 * C))
        blk['qkv_b'] = nrm(next(ki), (3 * C,))
        table = nrm(next(ki), ((2 * ws - 1) ** 2, heads))
        blk['rel_bias'] = table[jnp.asarray(rel_index.reshape(-1))].reshape(N, N, heads).transpose(2, 0, 1)
        blk['proj_w'] = nrm(next(ki), (C, C))
        blk['proj_b'] = nrm(next(ki), (C,))
        blk['norm2_g'] = jnp.ones((C,), jnp.float32) + nrm(next(ki), (C,))
        blk['norm2_b'] = nrm(next(ki), (C,))
        blk['fc1_w'] = nrm(next(ki), (C, hidden))
        blk['fc1_b'] = nrm(next(ki), (hidden,))
        blk['fc2_w'] = nrm(next(ki), (hidden, C))
        blk['fc2_b'] = nrm(next(ki), (C,))
        blocks.append(blk)
    params['blocks'] = blocks

    params['pi_w'] = nrm(next(ki), (C, Cin, 3, 3))             # torch ConvTranspose2d weight layout
    params['pi_b'] = nrm(next(ki), (Cin,))
    return params


# --------------------------------- main --------------------------------------

if __name__ == "__main__":
    cfg = dict(img_size=16, patch_size=4, in_chans=4, embed_dim=32, depth=2,
               num_heads=4, window_size=2, mlp_ratio=4.0)
    cfg['patches_resolution'] = (cfg['img_size'] // cfg['patch_size'],
                                 cfg['img_size'] // cfg['patch_size'])

    key = jax.random.PRNGKey(0)
    kp, kx = jax.random.split(key)
    params = build_params(kp, cfg)

    B = 2
    prep = prepare_params(params, cfg, B)   # arrays only -> safe jit-arg pytree

    x = jax.random.normal(kx, (B, cfg['in_chans'], cfg['img_size'], cfg['img_size']),
                          dtype=jnp.float32)

    fwd = jax.jit(lambda p, xx: stconvert_forward(p, xx, cfg))
    out_img, (Ht, Ct) = fwd(prep, x)
    jax.block_until_ready(out_img)
    jax.block_until_ready(Ht)
    jax.block_until_ready(Ct)

    Hp, Wp = cfg['patches_resolution']
    assert out_img.shape == (B, cfg['in_chans'], 2 * Hp, 2 * Wp)
    assert Ht.shape == (B, Hp * Wp, cfg['embed_dim'])
    assert Ct.shape == (B, Hp * Wp, cfg['embed_dim'])
    assert bool(jnp.isfinite(out_img).all()) and bool(jnp.isfinite(Ht).all())
    print("KERNEL_OK")
</pallas_src>

<mosaic_0001>
module attributes {stable_mosaic.version = 11 : i64} {
  func.func @_patch_inflate_kernel(%arg0: i32, %arg1: memref<2x512xf32, #tpu.memory_space<vmem>>, %arg2: memref<512x256xbf16, #tpu.memory_space<vmem>>, %arg3: memref<1x256xf32, #tpu.memory_space<vmem>>, %arg4: memref<2x256xf32, #tpu.memory_space<vmem>>) attributes {dimension_semantics = [#tpu.dimension_semantics<arbitrary>], iteration_bounds = array<i64: 1>, scalar_prefetch = 0 : i64, scratch_operands = 0 : i64, tpu.core_type = #tpu.core_type<tc>, window_params = [{pipeline_mode = #tpu.pipeline_mode<synchronous>, transform_indices = @transform_0, window_bounds = array<i64: 2, 512>}, {pipeline_mode = #tpu.pipeline_mode<synchronous>, transform_indices = @transform_1, window_bounds = array<i64: 512, 256>}, {pipeline_mode = #tpu.pipeline_mode<synchronous>, transform_indices = @transform_2, window_bounds = array<i64: 1, 256>}, {pipeline_mode = #tpu.pipeline_mode<synchronous>, transform_indices = @transform_3, window_bounds = array<i64: 2, 256>}]} {
    %c0 = arith.constant 0 : index
    %c0_0 = arith.constant 0 : index
    %0 = vector.load %arg1[%c0, %c0_0] : memref<2x512xf32, #tpu.memory_space<vmem>>, vector<2x512xf32>
    %1 = arith.truncf %0 : vector<2x512xf32> to vector<2x512xbf16>
    %c0_1 = arith.constant 0 : index
    %c0_2 = arith.constant 0 : index
    %2 = vector.load %arg2[%c0_1, %c0_2] : memref<512x256xbf16, #tpu.memory_space<vmem>>, vector<512x256xbf16>
    %cst = arith.constant dense<0.000000e+00> : vector<2x256xf32>
    %3 = tpu.matmul %1, %2, %cst {dimension_numbers = #tpu.dot_dimension_numbers<[1], [0], [0], [1], [0, 0, 1, 1], [], []>} : vector<2x512xbf16>, vector<512x256xbf16>, vector<2x256xf32> -> vector<2x256xf32>
    %c0_3 = arith.constant 0 : index
    %c0_4 = arith.constant 0 : index
    %4 = vector.load %arg3[%c0_3, %c0_4] : memref<1x256xf32, #tpu.memory_space<vmem>>, vector<1x256xf32>
    %5 = vector.broadcast %4 : vector<1x256xf32> to vector<2x256xf32>
    %6 = arith.addf %3, %5 : vector<2x256xf32>
    %7 = arith.negf %6 : vector<2x256xf32>
    %8 = math.exp %7 : vector<2x256xf32>
    %cst_5 = arith.constant 1.000000e+00 : f32
    %9 = vector.broadcast %cst_5 : f32 to vector<2x256xf32>
    %10 = arith.addf %9, %8 : vector<2x256xf32>
    %11 = arith.divf %9, %10 : vector<2x256xf32>
    %c0_6 = arith.constant 0 : index
    %c0_7 = arith.constant 0 : index
    %12 = vector.load %arg4[%c0_6, %c0_7] : memref<2x256xf32, #tpu.memory_space<vmem>>, vector<2x256xf32>
    tpu.vector_store %arg4[%c0_6, %c0_7], %11 {strides = array<i32>} : memref<2x256xf32, #tpu.memory_space<vmem>>, vector<2x256xf32>,
    return
  }
  func.func @transform_0(%arg0: i32) -> (i32, i32) {
    %c0_i32 = arith.constant 0 : i32
    %c0_i32_0 = arith.constant 0 : i32
    %c0_i32_1 = arith.constant 0 : i32
    return %c0_i32, %c0_i32_0 : i32, i32
  }
  func.func @transform_1(%arg0: i32) -> (i32, i32) {
    %c0_i32 = arith.constant 0 : i32
    %c0_i32_0 = arith.constant 0 : i32
    %c0_i32_1 = arith.constant 0 : i32
    return %c0_i32, %c0_i32_0 : i32, i32
  }
  func.func @transform_2(%arg0: i32) -> (i32, i32) {
    %c0_i32 = arith.constant 0 : i32
    %c0_i32_0 = arith.constant 0 : i32
    %c0_i32_1 = arith.constant 0 : i32
    return %c0_i32, %c0_i32_0 : i32, i32
  }
  func.func @transform_3(%arg0: i32) -> (i32, i32) {
    %c0_i32 = arith.constant 0 : i32
    %c0_i32_0 = arith.constant 0 : i32
    %c0_i32_1 = arith.constant 0 : i32
    return %c0_i32, %c0_i32_0 : i32, i32
  }
}

module attributes {stable_mosaic.version = 11 : i64} {
  func.func @_stconvert_fused_kernel(%arg0: i32, %arg1: memref<32x64xf32, #tpu.memory_space<vmem>>, %arg2: memref<64x32xbf16, #tpu.memory_space<vmem>>, %arg3: memref<1x32xf32, #tpu.memory_space<vmem>>, %arg4: memref<1x32xf32, #tpu.memory_space<vmem>>, %arg5: memref<1x32xf32, #tpu.memory_space<vmem>>, %arg6: memref<1x32xf32, #tpu.memory_space<vmem>>, %arg7: memref<1x32xf32, #tpu.memory_space<vmem>>, %arg8: memref<32x32xbf16, #tpu.memory_space<vmem>>, %arg9: memref<32x32xbf16, #tpu.memory_space<vmem>>, %arg10: memref<1x32xf32, #tpu.memory_space<vmem>>, %arg11: memref<4x32x8xbf16, #tpu.memory_space<vmem>>, %arg12: memref<4x32x8xbf16, #tpu.memory_space<vmem>>, %arg13: memref<4x32x8xbf16, #tpu.memory_space<vmem>>, %arg14: memref<4x1x8xf32, #tpu.memory_space<vmem>>, %arg15: memref<4x1x8xf32, #tpu.memory_space<vmem>>, %arg16: memref<4x1x8xf32, #tpu.memory_space<vmem>>, %arg17: memref<4x32x32xf32, #tpu.memory_space<vmem>>, %arg18: memref<32x32xbf16, #tpu.memory_space<vmem>>, %arg19: memref<1x32xf32, #tpu.memory_space<vmem>>, %arg20: memref<1x32xf32, #tpu.memory_space<vmem>>, %arg21: memref<1x32xf32, #tpu.memory_space<vmem>>, %arg22: memref<32x128xbf16, #tpu.memory_space<vmem>>, %arg23: memref<1x128xf32, #tpu.memory_space<vmem>>, %arg24: memref<128x32xbf16, #tpu.memory_space<vmem>>, %arg25: memref<1x32xf32, #tpu.memory_space<vmem>>, %arg26: memref<1x32xf32, #tpu.memory_space<vmem>>, %arg27: memref<1x32xf32, #tpu.memory_space<vmem>>, %arg28: memref<4x32x8xbf16, #tpu.memory_space<vmem>>, %arg29: memref<4x32x8xbf16, #tpu.memory_space<vmem>>, %arg30: memref<4x32x8xbf16, #tpu.memory_space<vmem>>, %arg31: memref<4x1x8xf32, #tpu.memory_space<vmem>>, %arg32: memref<4x1x8xf32, #tpu.memory_space<vmem>>, %arg33: memref<4x1x8xf32, #tpu.memory_space<vmem>>, %arg34: memref<4x32x32xf32, #tpu.memory_space<vmem>>, %arg35: memref<32x32xbf16, #tpu.memory_space<vmem>>, %arg36: memref<1x32xf32, #tpu.memory_space<vmem>>, %arg37: memref<1x32xf32, #tpu.memory_space<vmem>>, %arg38: memref<1x32xf32, #tpu.memory_space<vmem>>, %arg39: memref<32x128xbf16, #tpu.memory_space<vmem>>, %arg40: memref<1x128xf32, #tpu.memory_space<vmem>>, %arg41: memref<128x32xbf16, #tpu.memory_space<vmem>>, %arg42: memref<1x32xf32, #tpu.memory_space<vmem>>, %arg43: memref<32x32xf32, #tpu.memory_space<vmem>>, %arg44: memref<32x32xf32, #tpu.memory_space<vmem>>) attributes {dimension_semantics = [#tpu.dimension_semantics<arbitrary>], iteration_bounds = array<i64: 1>, scalar_prefetch = 0 : i64, scratch_operands = 0 : i64, tpu.core_type = #tpu.core_type<tc>, window_params = [{pipeline_mode = #tpu.pipeline_mode<synchronous>, transform_indices = @transform_0, window_bounds = array<i64: 32, 64>}, {pipeline_mode = #tpu.pipeline_mode<synchronous>, transform_indices = @transform_1, window_bounds = array<i64: 64, 32>}, {pipeline_mode = #tpu.pipeline_mode<synchronous>, transform_indices = @transform_2, window_bounds = array<i64: 1, 32>}, {pipeline_mode = #tpu.pipeline_mode<synchronous>, transform_indices = @transform_3, window_bounds = array<i64: 1, 32>}, {pipeline_mode = #tpu.pipeline_mode<synchronous>, transform_indices = @transform_4, window_bounds = array<i64: 1, 32>}, {pipeline_mode = #tpu.pipeline_mode<synchronous>, transform_indices = @transform_5, window_bounds = array<i64: 1, 32>}, {pipeline_mode = #tpu.pipeline_mode<synchronous>, transform_indices = @transform_6, window_bounds = array<i64: 1, 32>}, {pipeline_mode = #tpu.pipeline_mode<synchronous>, transform_indices = @transform_7, window_bounds = array<i64: 32, 32>}, {pipeline_mode = #tpu.pipeline_mode<synchronous>, transform_indices = @transform_8, window_bounds = array<i64: 32, 32>}, {pipeline_mode = #tpu.pipeline_mode<synchronous>, transform_indices = @transform_9, window_bounds = array<i64: 1, 32>}, {pipeline_mode = #tpu.pipeline_mode<synchronous>, transform_indices = @transform_10, window_bounds = array<i64: 4, 32, 8>}, {pipeline_mode = #tpu.pipeline_mode<synchronous>, transform_indices = @transform_11, window_bounds = array<i64: 4, 32, 8>}, {pipeline_mode = #tpu.pipeline_mode<synchronous>, transform_indices = @transform_12, window_bounds = array<i64: 4, 32, 8>}, {pipeline_mode = #tpu.pipeline_mode<synchronous>, transform_indices = @transform_13, window_bounds = array<i64: 4, 1, 8>}, {pipeline_mode = #tpu.pipeline_mode<synchronous>, transform_indices = @transform_14, window_bounds = array<i64: 4, 1, 8>}, {pipeline_mode = #tpu.pipeline_mode<synchronous>, transform_indices = @transform_15, window_bounds = array<i64: 4, 1, 8>}, {pipeline_mode = #tpu.pipeline_mode<synchronous>, transform_indices = @transform_16, window_bounds = array<i64: 4, 32, 32>}, {pipeline_mode = #tpu.pipeline_mode<synchronous>, transform_indices = @transform_17, window_bounds = array<i64: 32, 32>}, {pipeline_mode = #tpu.pipeline_mode<synchronous>, transform_indices = @transform_18, window_bounds = array<i64: 1, 32>}, {pipeline_mode = #tpu.pipeline_mode<synchronous>, transform_indices = @transform_19, window_bounds = array<i64: 1, 32>}, {pipeline_mode = #tpu.pipeline_mode<synchronous>, transform_indices = @transform_20, window_bounds = array<i64: 1, 32>}, {pipeline_mode = #tpu.pipeline_mode<synchronous>, transform_indices = @transform_21, window_bounds = array<i64: 32, 128>}, {pipeline_mode = #tpu.pipeline_mode<synchronous>, transform_indices = @transform_22, window_bounds = array<i64: 1, 128>}, {pipeline_mode = #tpu.pipeline_mode<synchronous>, transform_indices = @transform_23, window_bounds = array<i64: 128, 32>}, {pipeline_mode = #tpu.pipeline_mode<synchronous>, transform_indices = @transform_24, window_bounds = array<i64: 1, 32>}, {pipeline_mode = #tpu.pipeline_mode<synchronous>, transform_indices = @transform_25, window_bounds = array<i64: 1, 32>}, {pipeline_mode = #tpu.pipeline_mode<synchronous>, transform_indices = @transform_26, window_bounds = array<i64: 1, 32>}, {pipeline_mode = #tpu.pipeline_mode<synchronous>, transform_indices = @transform_27, window_bounds = array<i64: 4, 32, 8>}, {pipeline_mode = #tpu.pipeline_mode<synchronous>, transform_indices = @transform_28, window_bounds = array<i64: 4, 32, 8>}, {pipeline_mode = #tpu.pipeline_mode<synchronous>, transform_indices = @transform_29, window_bounds = array<i64: 4, 32, 8>}, {pipeline_mode = #tpu.pipeline_mode<synchronous>, transform_indices = @transform_30, window_bounds = array<i64: 4, 1, 8>}, {pipeline_mode = #tpu.pipeline_mode<synchronous>, transform_indices = @transform_31, window_bounds = array<i64: 4, 1, 8>}, {pipeline_mode = #tpu.pipeline_mode<synchronous>, transform_indices = @transform_32, window_bounds = array<i64: 4, 1, 8>}, {pipeline_mode = #tpu.pipeline_mode<synchronous>, transform_indices = @transform_33, window_bounds = array<i64: 4, 32, 32>}, {pipeline_mode = #tpu.pipeline_mode<synchronous>, transform_indices = @transform_34, window_bounds = array<i64: 32, 32>}, {pipeline_mode = #tpu.pipeline_mode<synchronous>, transform_indices = @transform_35, window_bounds = array<i64: 1, 32>}, {pipeline_mode = #tpu.pipeline_mode<synchronous>, transform_indices = @transform_36, window_bounds = array<i64: 1, 32>}, {pipeline_mode = #tpu.pipeline_mode<synchronous>, transform_indices = @transform_37, window_bounds = array<i64: 1, 32>}, {pipeline_mode = #tpu.pipeline_mode<synchronous>, transform_indices = @transform_38, window_bounds = array<i64: 32, 128>}, {pipeline_mode = #tpu.pipeline_mode<synchronous>, transform_indices = @transform_39, window_bounds = array<i64: 1, 128>}, {pipeline_mode = #tpu.pipeline_mode<synchronous>, transform_indices = @transform_40, window_bounds = array<i64: 128, 32>}, {pipeline_mode = #tpu.pipeline_mode<synchronous>, transform_indices = @transform_41, window_bounds = array<i64: 1, 32>}, {pipeline_mode = #tpu.pipeline_mode<synchronous>, transform_indices = @transform_42, window_bounds = array<i64: 32, 32>}, {pipeline_mode = #tpu.pipeline_mode<synchronous>, transform_indices = @transform_43, window_bounds = array<i64: 32, 32>}]} {
    %c0 = arith.constant 0 : index
    %c0_0 = arith.constant 0 : index
    %0 = vector.load %arg1[%c0, %c0_0] : memref<32x64xf32, #tpu.memory_space<vmem>>, vector<32x64xf32>
    %1 = arith.truncf %0 : vector<32x64xf32> to vector<32x64xbf16>
    %c0_1 = arith.constant 0 : index
    %c0_2 = arith.constant 0 : index
    %2 = vector.load %arg2[%c0_1, %c0_2] : memref<64x32xbf16, #tpu.memory_space<vmem>>, vector<64x32xbf16>
    %cst = arith.constant dense<0.000000e+00> : vector<32x32xf32>
    %3 = tpu.matmul %1, %2, %cst {dimension_numbers = #tpu.dot_dimension_numbers<[1], [0], [0], [1], [0, 0, 1, 1], [], []>} : vector<32x64xbf16>, vector<64x32xbf16>, vector<32x32xf32> -> vector<32x32xf32>
    %c0_3 = arith.constant 0 : index
    %c0_4 = arith.constant 0 : index
    %4 = vector.load %arg3[%c0_3, %c0_4] : memref<1x32xf32, #tpu.memory_space<vmem>>, vector<1x32xf32>
    %5 = vector.broadcast %4 : vector<1x32xf32> to vector<32x32xf32>
    %6 = arith.addf %3, %5 : vector<32x32xf32>
    %c0_5 = arith.constant 0 : index
    %c0_6 = arith.constant 0 : index
    %7 = vector.load %arg4[%c0_5, %c0_6] : memref<1x32xf32, #tpu.memory_space<vmem>>, vector<1x32xf32>
    %c0_7 = arith.constant 0 : index
    %c0_8 = arith.constant 0 : index
    %8 = vector.load %arg5[%c0_7, %c0_8] : memref<1x32xf32, #tpu.memory_space<vmem>>, vector<1x32xf32>
    %cst_9 = arith.constant dense<0.000000e+00> : vector<32xf32>
    %9 = vector.multi_reduction <add>, %6, %cst_9 [1] : vector<32x32xf32> to vector<32xf32>
    %10 = vector.shape_cast %9 : vector<32xf32> to vector<32x1xf32>
    %cst_10 = arith.constant 3.200000e+01 : f32
    %11 = vector.broadcast %cst_10 : f32 to vector<32x1xf32>
    %12 = arith.divf %10, %11 : vector<32x1xf32>
    %13 = vector.broadcast %12 : vector<32x1xf32> to vector<32x32xf32>
    %14 = arith.subf %6, %13 : vector<32x32xf32>
    %15 = arith.mulf %14, %14 : vector<32x32xf32>
    %cst_11 = arith.constant dense<0.000000e+00> : vector<32xf32>
    %16 = vector.multi_reduction <add>, %15, %cst_11 [1] : vector<32x32xf32> to vector<32xf32>
    %17 = vector.shape_cast %16 : vector<32xf32> to vector<32x1xf32>
    %cst_12 = arith.constant 3.200000e+01 : f32
    %18 = vector.broadcast %cst_12 : f32 to vector<32x1xf32>
    %19 = arith.divf %17, %18 : vector<32x1xf32>
    %20 = vector.broadcast %12 : vector<32x1xf32> to vector<32x32xf32>
    %21 = arith.subf %6, %20 : vector<32x32xf32>
    %cst_13 = arith.constant 9.99999974E-6 : f32
    %22 = vector.broadcast %cst_13 : f32 to vector<32x1xf32>
    %23 = arith.addf %19, %22 : vector<32x1xf32>
    %24 = math.rsqrt %23 : vector<32x1xf32>
    %25 = vector.broadcast %24 : vector<32x1xf32> to vector<32x32xf32>
    %26 = arith.mulf %21, %25 : vector<32x32xf32>
    %27 = vector.broadcast %7 : vector<1x32xf32> to vector<32x32xf32>
    %28 = arith.mulf %26, %27 : vector<32x32xf32>
    %29 = vector.broadcast %8 : vector<1x32xf32> to vector<32x32xf32>
    %30 = arith.addf %28, %29 : vector<32x32xf32>
    %cst_14 = arith.constant 0.000000e+00 : f32
    %31 = vector.broadcast %cst_14 : f32 to vector<32x32xf32>
    %cst_15 = arith.constant 0.000000e+00 : f32
    %32 = vector.broadcast %cst_15 : f32 to vector<32x32xf32>
    %c0_16 = arith.constant 0 : index
    %c0_17 = arith.constant 0 : index
    %33 = vector.load %arg6[%c0_16, %c0_17] : memref<1x32xf32, #tpu.memory_space<vmem>>, vector<1x32xf32>
    %c0_18 = arith.constant 0 : index
    %c0_19 = arith.constant 0 : index
    %34 = vector.load %arg7[%c0_18, %c0_19] : memref<1x32xf32, #tpu.memory_space<vmem>>, vector<1x32xf32>
    %cst_20 = arith.constant dense<0.000000e+00> : vector<32xf32>
    %35 = vector.multi_reduction <add>, %30, %cst_20 [1] : vector<32x32xf32> to vector<32xf32>
    %36 = vector.shape_cast %35 : vector<32xf32> to vector<32x1xf32>
    %cst_21 = arith.constant 3.200000e+01 : f32
    %37 = vector.broadcast %cst_21 : f32 to vector<32x1xf32>
    %38 = arith.divf %36, %37 : vector<32x1xf32>
    %39 = vector.broadcast %38 : vector<32x1xf32> to vector<32x32xf32>
    %40 = arith.subf %30, %39 : vector<32x32xf32>
    %41 = arith.mulf %40, %40 : vector<32x32xf32>
    %cst_22 = arith.constant dense<0.000000e+00> : vector<32xf32>
    %42 = vector.multi_reduction <add>, %41, %cst_22 [1] : vector<32x32xf32> to vector<32xf32>
    %43 = vector.shape_cast %42 : vector<32xf32> to vector<32x1xf32>
    %cst_23 = arith.constant 3.200000e+01 : f32
    %44 = vector.broadcast %cst_23 : f32 to vector<32x1xf32>
    %45 = arith.divf %43, %44 : vector<32x1xf32>
    %46 = vector.broadcast %38 : vector<32x1xf32> to vector<32x32xf32>
    %47 = arith.subf %30, %46 : vector<32x32xf32>
    %cst_24 = arith.constant 9.99999974E-6 : f32
    %48 = vector.broadcast %cst_24 : f32 to vector<32x1xf32>
    %49 = arith.addf %45, %48 : vector<32x1xf32>
    %50 = math.rsqrt %49 : vector<32x1xf32>
    %51 = vector.broadcast %50 : vector<32x1xf32> to vector<32x32xf32>
    %52 = arith.mulf %47, %51 : vector<32x32xf32>
    %53 = vector.broadcast %33 : vector<1x32xf32> to vector<32x32xf32>
    %54 = arith.mulf %52, %53 : vector<32x32xf32>
    %55 = vector.broadcast %34 : vector<1x32xf32> to vector<32x32xf32>
    %56 = arith.addf %54, %55 : vector<32x32xf32>
    %c0_25 = arith.constant 0 : index
    %c0_26 = arith.constant 0 : index
    %57 = vector.load %arg6[%c0_25, %c0_26] : memref<1x32xf32, #tpu.memory_space<vmem>>, vector<1x32xf32>
    %c0_27 = arith.constant 0 : index
    %c0_28 = arith.constant 0 : index
    %58 = vector.load %arg7[%c0_27, %c0_28] : memref<1x32xf32, #tpu.memory_space<vmem>>, vector<1x32xf32>
    %cst_29 = arith.constant dense<0.000000e+00> : vector<32xf32>
    %59 = vector.multi_reduction <add>, %31, %cst_29 [1] : vector<32x32xf32> to vector<32xf32>
    %60 = vector.shape_cast %59 : vector<32xf32> to vector<32x1xf32>
    %cst_30 = arith.constant 3.200000e+01 : f32
    %61 = vector.broadcast %cst_30 : f32 to vector<32x1xf32>
    %62 = arith.divf %60, %61 : vector<32x1xf32>
    %63 = vector.broadcast %62 : vector<32x1xf32> to vector<32x32xf32>
    %64 = arith.subf %31, %63 : vector<32x32xf32>
    %65 = arith.mulf %64, %64 : vector<32x32xf32>
    %cst_31 = arith.constant dense<0.000000e+00> : vector<32xf32>
    %66 = vector.multi_reduction <add>, %65, %cst_31 [1] : vector<32x32xf32> to vector<32xf32>
    %67 = vector.shape_cast %66 : vector<32xf32> to vector<32x1xf32>
    %cst_32 = arith.constant 3.200000e+01 : f32
    %68 = vector.broadcast %cst_32 : f32 to vector<32x1xf32>
    %69 = arith.divf %67, %68 : vector<32x1xf32>
    %70 = vector.broadcast %62 : vector<32x1xf32> to vector<32x32xf32>
    %71 = arith.subf %31, %70 : vector<32x32xf32>
    %cst_33 = arith.constant 9.99999974E-6 : f32
    %72 = vector.broadcast %cst_33 : f32 to vector<32x1xf32>
    %73 = arith.addf %69, %72 : vector<32x1xf32>
    %74 = math.rsqrt %73 : vector<32x1xf32>
    %75 = vector.broadcast %74 : vector<32x1xf32> to vector<32x32xf32>
    %76 = arith.mulf %71, %75 : vector<32x32xf32>
    %77 = vector.broadcast %57 : vector<1x32xf32> to vector<32x32xf32>
    %78 = arith.mulf %76, %77 : vector<32x32xf32>
    %79 = vector.broadcast %58 : vector<1x32xf32> to vector<32x32xf32>
    %80 = arith.addf %78, %79 : vector<32x32xf32>
    %81 = arith.truncf %56 : vector<32x32xf32> to vector<32x32xbf16>
    %c0_34 = arith.constant 0 : index
    %c0_35 = arith.constant 0 : index
    %82 = vector.load %arg8[%c0_34, %c0_35] : memref<32x32xbf16, #tpu.memory_space<vmem>>, vector<32x32xbf16>
    %cst_36 = arith.constant dense<0.000000e+00> : vector<32x32xf32>
    %83 = tpu.matmul %81, %82, %cst_36 {dimension_numbers = #tpu.dot_dimension_numbers<[1], [0], [0], [1], [0, 0, 1, 1], [], []>} : vector<32x32xbf16>, vector<32x32xbf16>, vector<32x32xf32> -> vector<32x32xf32>
    %84 = arith.truncf %80 : vector<32x32xf32> to vector<32x32xbf16>
    %c0_37 = arith.constant 0 : index
    %c0_38 = arith.constant 0 : index
    %85 = vector.load %arg9[%c0_37, %c0_38] : memref<32x32xbf16, #tpu.memory_space<vmem>>, vector<32x32xbf16>
    %cst_39 = arith.constant dense<0.000000e+00> : vector<32x32xf32>
    %86 = tpu.matmul %84, %85, %cst_39 {dimension_numbers = #tpu.dot_dimension_numbers<[1], [0], [0], [1], [0, 0, 1, 1], [], []>} : vector<32x32xbf16>, vector<32x32xbf16>, vector<32x32xf32> -> vector<32x32xf32>
    %87 = arith.addf %83, %86 : vector<32x32xf32>
    %c0_40 = arith.constant 0 : index
    %c0_41 = arith.constant 0 : index
    %88 = vector.load %arg10[%c0_40, %c0_41] : memref<1x32xf32, #tpu.memory_space<vmem>>, vector<1x32xf32>
    %89 = vector.broadcast %88 : vector<1x32xf32> to vector<32x32xf32>
    %90 = arith.addf %87, %89 : vector<32x32xf32>
    %91 = arith.truncf %90 : vector<32x32xf32> to vector<32x32xbf16>
    %c0_42 = arith.constant 0 : index
    %c0_43 = arith.constant 0 : index
    %c0_44 = arith.constant 0 : index
    %92 = vector.load %arg11[%c0_42, %c0_43, %c0_44] : memref<4x32x8xbf16, #tpu.memory_space<vmem>>, vector<1x32x8xbf16>
    %93 = vector.shape_cast %92 : vector<1x32x8xbf16> to vector<32x8xbf16>
    %cst_45 = arith.constant dense<0.000000e+00> : vector<32x8xf32>
    %94 = tpu.matmul %91, %93, %cst_45 {dimension_numbers = #tpu.dot_dimension_numbers<[1], [0], [0], [1], [0, 0, 1, 1], [], []>} : vector<32x32xbf16>, vector<32x8xbf16>, vector<32x8xf32> -> vector<32x8xf32>
    %c0_46 = arith.constant 0 : index
    %c0_47 = arith.constant 0 : index
    %c0_48 = arith.constant 0 : index
    %95 = vector.load %arg14[%c0_46, %c0_47, %c0_48] : memref<4x1x8xf32, #tpu.memory_space<vmem>>, vector<1x1x8xf32>
    %96 = vector.shape_cast %95 : vector<1x1x8xf32> to vector<1x8xf32>
    %97 = vector.broadcast %96 : vector<1x8xf32> to vector<32x8xf32>
    %98 = arith.addf %94, %97 : vector<32x8xf32>
    %cst_49 = arith.constant 0.353553385 : f32
    %99 = vector.broadcast %cst_49 : f32 to vector<32x8xf32>
    %100 = arith.mulf %98, %99 : vector<32x8xf32>
    %c0_50 = arith.constant 0 : index
    %c0_51 = arith.constant 0 : index
    %c0_52 = arith.constant 0 : index
    %101 = vector.load %arg12[%c0_50, %c0_51, %c0_52] : memref<4x32x8xbf16, #tpu.memory_space<vmem>>, vector<1x32x8xbf16>
    %102 = vector.shape_cast %101 : vector<1x32x8xbf16> to vector<32x8xbf16>
    %cst_53 = arith.constant dense<0.000000e+00> : vector<32x8xf32>
    %103 = tpu.matmul %91, %102, %cst_53 {dimension_numbers = #tpu.dot_dimension_numbers<[1], [0], [0], [1], [0, 0, 1, 1], [], []>} : vector<32x32xbf16>, vector<32x8xbf16>, vector<32x8xf32> -> vector<32x8xf32>
    %c0_54 = arith.constant 0 : index
    %c0_55 = arith.constant 0 : index
    %c0_56 = arith.constant 0 : index
    %104 = vector.load %arg15[%c0_54, %c0_55, %c0_56] : memref<4x1x8xf32, #tpu.memory_space<vmem>>, vector<1x1x8xf32>
    %105 = vector.shape_cast %104 : vector<1x1x8xf32> to vector<1x8xf32>
    %106 = vector.broadcast %105 : vector<1x8xf32> to vector<32x8xf32>
    %107 = arith.addf %103, %106 : vector<32x8xf32>
    %c0_57 = arith.constant 0 : index
    %c0_58 = arith.constant 0 : index
    %c0_59 = arith.constant 0 : index
    %108 = vector.load %arg13[%c0_57, %c0_58, %c0_59] : memref<4x32x8xbf16, #tpu.memory_space<vmem>>, vector<1x32x8xbf16>
    %109 = vector.shape_cast %108 : vector<1x32x8xbf16> to vector<32x8xbf16>
    %cst_60 = arith.constant dense<0.000000e+00> : vector<32x8xf32>
    %110 = tpu.matmul %91, %109, %cst_60 {dimension_numbers = #tpu.dot_dimension_numbers<[1], [0], [0], [1], [0, 0, 1, 1], [], []>} : vector<32x32xbf16>, vector<32x8xbf16>, vector<32x8xf32> -> vector<32x8xf32>
    %c0_61 = arith.constant 0 : index
    %c0_62 = arith.constant 0 : index
    %c0_63 = arith.constant 0 : index
    %111 = vector.load %arg16[%c0_61, %c0_62, %c0_63] : memref<4x1x8xf32, #tpu.memory_space<vmem>>, vector<1x1x8xf32>
    %112 = vector.shape_cast %111 : vector<1x1x8xf32> to vector<1x8xf32>
    %113 = vector.broadcast %112 : vector<1x8xf32> to vector<32x8xf32>
    %114 = arith.addf %110, %113 : vector<32x8xf32>
    %115 = arith.truncf %100 : vector<32x8xf32> to vector<32x8xbf16>
    %116 = arith.truncf %107 : vector<32x8xf32> to vector<32x8xbf16>
    %cst_64 = arith.constant dense<0.000000e+00> : vector<32x32xf32>
    %117 = tpu.matmul %115, %116, %cst_64 {dimension_numbers = #tpu.dot_dimension_numbers<[1], [1], [0], [0], [0, 0, 1, 0], [], []>} : vector<32x8xbf16>, vector<32x8xbf16>, vector<32x32xf32> -> vector<32x32xf32>
    %c0_65 = arith.constant 0 : index
    %c0_66 = arith.constant 0 : index
    %c0_67 = arith.constant 0 : index
    %118 = vector.load %arg17[%c0_65, %c0_66, %c0_67] : memref<4x32x32xf32, #tpu.memory_space<vmem>>, vector<1x32x32xf32>
    %119 = vector.shape_cast %118 : vector<1x32x32xf32> to vector<32x32xf32>
    %120 = arith.addf %117, %119 : vector<32x32xf32>
    %cst_68 = arith.constant dense<0xFF800000> : vector<32xf32>
    %121 = vector.multi_reduction <maximumf>, %120, %cst_68 [1] : vector<32x32xf32> to vector<32xf32>
    %122 = vector.shape_cast %121 : vector<32xf32> to vector<32x1xf32>
    %123 = vector.broadcast %122 : vector<32x1xf32> to vector<32x32xf32>
    %124 = arith.subf %120, %123 : vector<32x32xf32>
    %125 = math.exp %124 : vector<32x32xf32>
    %cst_69 = arith.constant dense<0.000000e+00> : vector<32xf32>
    %126 = vector.multi_reduction <add>, %125, %cst_69 [1] : vector<32x32xf32> to vector<32xf32>
    %127 = vector.shape_cast %126 : vector<32xf32> to vector<32x1xf32>
    %128 = vector.broadcast %127 : vector<32x1xf32> to vector<32x32xf32>
    %129 = arith.divf %125, %128 : vector<32x32xf32>
    %130 = arith.truncf %129 : vector<32x32xf32> to vector<32x32xbf16>
    %131 = arith.truncf %114 : vector<32x8xf32> to vector<32x8xbf16>
    %cst_70 = arith.constant dense<0.000000e+00> : vector<32x8xf32>
    %132 = tpu.matmul %130, %131, %cst_70 {dimension_numbers = #tpu.dot_dimension_numbers<[1], [0], [0], [1], [0, 0, 1, 1], [], []>} : vector<32x32xbf16>, vector<32x8xbf16>, vector<32x8xf32> -> vector<32x8xf32>
    %c1 = arith.constant 1 : index
    %c0_71 = arith.constant 0 : index
    %c0_72 = arith.constant 0 : index
    %133 = vector.load %arg11[%c1, %c0_71, %c0_72] : memref<4x32x8xbf16, #tpu.memory_space<vmem>>, vector<1x32x8xbf16>
    %134 = vector.shape_cast %133 : vector<1x32x8xbf16> to vector<32x8xbf16>
    %cst_73 = arith.constant dense<0.000000e+00> : vector<32x8xf32>
    %135 = tpu.matmul %91, %134, %cst_73 {dimension_numbers = #tpu.dot_dimension_numbers<[1], [0], [0], [1], [0, 0, 1, 1], [], []>} : vector<32x32xbf16>, vector<32x8xbf16>, vector<32x8xf32> -> vector<32x8xf32>
    %c1_74 = arith.constant 1 : index
    %c0_75 = arith.constant 0 : index
    %c0_76 = arith.constant 0 : index
    %136 = vector.load %arg14[%c1_74, %c0_75, %c0_76] : memref<4x1x8xf32, #tpu.memory_space<vmem>>, vector<1x1x8xf32>
    %137 = vector.shape_cast %136 : vector<1x1x8xf32> to vector<1x8xf32>
    %138 = vector.broadcast %137 : vector<1x8xf32> to vector<32x8xf32>
    %139 = arith.addf %135, %138 : vector<32x8xf32>
    %cst_77 = arith.constant 0.353553385 : f32
    %140 = vector.broadcast %cst_77 : f32 to vector<32x8xf32>
    %141 = arith.mulf %139, %140 : vector<32x8xf32>
    %c1_78 = arith.constant 1 : index
    %c0_79 = arith.constant 0 : index
    %c0_80 = arith.constant 0 : index
    %142 = vector.load %arg12[%c1_78, %c0_79, %c0_80] : memref<4x32x8xbf16, #tpu.memory_space<vmem>>, vector<1x32x8xbf16>
    %143 = vector.shape_cast %142 : vector<1x32x8xbf16> to vector<32x8xbf16>
    %cst_81 = arith.constant dense<0.000000e+00> : vector<32x8xf32>
    %144 = tpu.matmul %91, %143, %cst_81 {dimension_numbers = #tpu.dot_dimension_numbers<[1], [0], [0], [1], [0, 0, 1, 1], [], []>} : vector<32x32xbf16>, vector<32x8xbf16>, vector<32x8xf32> -> vector<32x8xf32>
    %c1_82 = arith.constant 1 : index
    %c0_83 = arith.constant 0 : index
    %c0_84 = arith.constant 0 : index
    %145 = vector.load %arg15[%c1_82, %c0_83, %c0_84] : memref<4x1x8xf32, #tpu.memory_space<vmem>>, vector<1x1x8xf32>
    %146 = vector.shape_cast %145 : vector<1x1x8xf32> to vector<1x8xf32>
    %147 = vector.broadcast %146 : vector<1x8xf32> to vector<32x8xf32>
    %148 = arith.addf %144, %147 : vector<32x8xf32>
    %c1_85 = arith.constant 1 : index
    %c0_86 = arith.constant 0 : index
    %c0_87 = arith.constant 0 : index
    %149 = vector.load %arg13[%c1_85, %c0_86, %c0_87] : memref<4x32x8xbf16, #tpu.memory_space<vmem>>, vector<1x32x8xbf16>
    %150 = vector.shape_cast %149 : vector<1x32x8xbf16> to vector<32x8xbf16>
    %cst_88 = arith.constant dense<0.000000e+00> : vector<32x8xf32>
    %151 = tpu.matmul %91, %150, %cst_88 {dimension_numbers = #tpu.dot_dimension_numbers<[1], [0], [0], [1], [0, 0, 1, 1], [], []>} : vector<32x32xbf16>, vector<32x8xbf16>, vector<32x8xf32> -> vector<32x8xf32>
    %c1_89 = arith.constant 1 : index
    %c0_90 = arith.constant 0 : index
    %c0_91 = arith.constant 0 : index
    %152 = vector.load %arg16[%c1_89, %c0_90, %c0_91] : memref<4x1x8xf32, #tpu.memory_space<vmem>>, vector<1x1x8xf32>
    %153 = vector.shape_cast %152 : vector<1x1x8xf32> to vector<1x8xf32>
    %154 = vector.broadcast %153 : vector<1x8xf32> to vector<32x8xf32>
    %155 = arith.addf %151, %154 : vector<32x8xf32>
    %156 = arith.truncf %141 : vector<32x8xf32> to vector<32x8xbf16>
    %157 = arith.truncf %148 : vector<32x8xf32> to vector<32x8xbf16>
    %cst_92 = arith.constant dense<0.000000e+00> : vector<32x32xf32>
    %158 = tpu.matmul %156, %157, %cst_92 {dimension_numbers = #tpu.dot_dimension_numbers<[1], [1], [0], [0], [0, 0, 1, 0], [], []>} : vector<32x8xbf16>, vector<32x8xbf16>, vector<32x32xf32> -> vector<32x32xf32>
    %c1_93 = arith.constant 1 : index
    %c0_94 = arith.constant 0 : index
    %c0_95 = arith.constant 0 : index
    %159 = vector.load %arg17[%c1_93, %c0_94, %c0_95] : memref<4x32x32xf32, #tpu.memory_space<vmem>>, vector<1x32x32xf32>
    %160 = vector.shape_cast %159 : vector<1x32x32xf32> to vector<32x32xf32>
    %161 = arith.addf %158, %160 : vector<32x32xf32>
    %cst_96 = arith.constant dense<0xFF800000> : vector<32xf32>
    %162 = vector.multi_reduction <maximumf>, %161, %cst_96 [1] : vector<32x32xf32> to vector<32xf32>
    %163 = vector.shape_cast %162 : vector<32xf32> to vector<32x1xf32>
    %164 = vector.broadcast %163 : vector<32x1xf32> to vector<32x32xf32>
    %165 = arith.subf %161, %164 : vector<32x32xf32>
    %166 = math.exp %165 : vector<32x32xf32>
    %cst_97 = arith.constant dense<0.000000e+00> : vector<32xf32>
    %167 = vector.multi_reduction <add>, %166, %cst_97 [1] : vector<32x32xf32> to vector<32xf32>
    %168 = vector.shape_cast %167 : vector<32xf32> to vector<32x1xf32>
    %169 = vector.broadcast %168 : vector<32x1xf32> to vector<32x32xf32>
    %170 = arith.divf %166, %169 : vector<32x32xf32>
    %171 = arith.truncf %170 : vector<32x32xf32> to vector<32x32xbf16>
    %172 = arith.truncf %155 : vector<32x8xf32> to vector<32x8xbf16>
    %cst_98 = arith.constant dense<0.000000e+00> : vector<32x8xf32>
    %173 = tpu.matmul %171, %172, %cst_98 {dimension_numbers = #tpu.dot_dimension_numbers<[1], [0], [0], [1], [0, 0, 1, 1], [], []>} : vector<32x32xbf16>, vector<32x8xbf16>, vector<32x8xf32> -> vector<32x8xf32>
    %c2 = arith.constant 2 : index
    %c0_99 = arith.constant 0 : index
    %c0_100 = arith.constant 0 : index
    %174 = vector.load %arg11[%c2, %c0_99, %c0_100] : memref<4x32x8xbf16, #tpu.memory_space<vmem>>, vector<1x32x8xbf16>
    %175 = vector.shape_cast %174 : vector<1x32x8xbf16> to vector<32x8xbf16>
    %cst_101 = arith.constant dense<0.000000e+00> : vector<32x8xf32>
    %176 = tpu.matmul %91, %175, %cst_101 {dimension_numbers = #tpu.dot_dimension_numbers<[1], [0], [0], [1], [0, 0, 1, 1], [], []>} : vector<32x32xbf16>, vector<32x8xbf16>, vector<32x8xf32> -> vector<32x8xf32>
    %c2_102 = arith.constant 2 : index
    %c0_103 = arith.constant 0 : index
    %c0_104 = arith.constant 0 : index
    %177 = vector.load %arg14[%c2_102, %c0_103, %c0_104] : memref<4x1x8xf32, #tpu.memory_space<vmem>>, vector<1x1x8xf32>
    %178 = vector.shape_cast %177 : vector<1x1x8xf32> to vector<1x8xf32>
    %179 = vector.broadcast %178 : vector<1x8xf32> to vector<32x8xf32>
    %180 = arith.addf %176, %179 : vector<32x8xf32>
    %cst_105 = arith.constant 0.353553385 : f32
    %181 = vector.broadcast %cst_105 : f32 to vector<32x8xf32>
    %182 = arith.mulf %180, %181 : vector<32x8xf32>
    %c2_106 = arith.constant 2 : index
    %c0_107 = arith.constant 0 : index
    %c0_108 = arith.constant 0 : index
    %183 = vector.load %arg12[%c2_106, %c0_107, %c0_108] : memref<4x32x8xbf16, #tpu.memory_space<vmem>>, vector<1x32x8xbf16>
    %184 = vector.shape_cast %183 : vector<1x32x8xbf16> to vector<32x8xbf16>
    %cst_109 = arith.constant dense<0.000000e+00> : vector<32x8xf32>
    %185 = tpu.matmul %91, %184, %cst_109 {dimension_numbers = #tpu.dot_dimension_numbers<[1], [0], [0], [1], [0, 0, 1, 1], [], []>} : vector<32x32xbf16>, vector<32x8xbf16>, vector<32x8xf32> -> vector<32x8xf32>
    %c2_110 = arith.constant 2 : index
    %c0_111 = arith.constant 0 : index
    %c0_112 = arith.constant 0 : index
    %186 = vector.load %arg15[%c2_110, %c0_111, %c0_112] : memref<4x1x8xf32, #tpu.memory_space<vmem>>, vector<1x1x8xf32>
    %187 = vector.shape_cast %186 : vector<1x1x8xf32> to vector<1x8xf32>
    %188 = vector.broadcast %187 : vector<1x8xf32> to vector<32x8xf32>
    %189 = arith.addf %185, %188 : vector<32x8xf32>
    %c2_113 = arith.constant 2 : index
    %c0_114 = arith.constant 0 : index
    %c0_115 = arith.constant 0 : index
    %190 = vector.load %arg13[%c2_113, %c0_114, %c0_115] : memref<4x32x8xbf16, #tpu.memory_space<vmem>>, vector<1x32x8xbf16>
    %191 = vector.shape_cast %190 : vector<1x32x8xbf16> to vector<32x8xbf16>
    %cst_116 = arith.constant dense<0.000000e+00> : vector<32x8xf32>
    %192 = tpu.matmul %91, %191, %cst_116 {dimension_numbers = #tpu.dot_dimension_numbers<[1], [0], [0], [1], [0, 0, 1, 1], [], []>} : vector<32x32xbf16>, vector<32x8xbf16>, vector<32x8xf32> -> vector<32x8xf32>
    %c2_117 = arith.constant 2 : index
    %c0_118 = arith.constant 0 : index
    %c0_119 = arith.constant 0 : index
    %193 = vector.load %arg16[%c2_117, %c0_118, %c0_119] : memref<4x1x8xf32, #tpu.memory_space<vmem>>, vector<1x1x8xf32>
    %194 = vector.shape_cast %193 : vector<1x1x8xf32> to vector<1x8xf32>
    %195 = vector.broadcast %194 : vector<1x8xf32> to vector<32x8xf32>
    %196 = arith.addf %192, %195 : vector<32x8xf32>
    %197 = arith.truncf %182 : vector<32x8xf32> to vector<32x8xbf16>
    %198 = arith.truncf %189 : vector<32x8xf32> to vector<32x8xbf16>
    %cst_120 = arith.constant dense<0.000000e+00> : vector<32x32xf32>
    %199 = tpu.matmul %197, %198, %cst_120 {dimension_numbers = #tpu.dot_dimension_numbers<[1], [1], [0], [0], [0, 0, 1, 0], [], []>} : vector<32x8xbf16>, vector<32x8xbf16>, vector<32x32xf32> -> vector<32x32xf32>
    %c2_121 = arith.constant 2 : index
    %c0_122 = arith.constant 0 : index
    %c0_123 = arith.constant 0 : index
    %200 = vector.load %arg17[%c2_121, %c0_122, %c0_123] : memref<4x32x32xf32, #tpu.memory_space<vmem>>, vector<1x32x32xf32>
    %201 = vector.shape_cast %200 : vector<1x32x32xf32> to vector<32x32xf32>
    %202 = arith.addf %199, %201 : vector<32x32xf32>
    %cst_124 = arith.constant dense<0xFF800000> : vector<32xf32>
    %203 = vector.multi_reduction <maximumf>, %202, %cst_124 [1] : vector<32x32xf32> to vector<32xf32>
    %204 = vector.shape_cast %203 : vector<32xf32> to vector<32x1xf32>
    %205 = vector.broadcast %204 : vector<32x1xf32> to vector<32x32xf32>
    %206 = arith.subf %202, %205 : vector<32x32xf32>
    %207 = math.exp %206 : vector<32x32xf32>
    %cst_125 = arith.constant dense<0.000000e+00> : vector<32xf32>
    %208 = vector.multi_reduction <add>, %207, %cst_125 [1] : vector<32x32xf32> to vector<32xf32>
    %209 = vector.shape_cast %208 : vector<32xf32> to vector<32x1xf32>
    %210 = vector.broadcast %209 : vector<32x1xf32> to vector<32x32xf32>
    %211 = arith.divf %207, %210 : vector<32x32xf32>
    %212 = arith.truncf %211 : vector<32x32xf32> to vector<32x32xbf16>
    %213 = arith.truncf %196 : vector<32x8xf32> to vector<32x8xbf16>
    %cst_126 = arith.constant dense<0.000000e+00> : vector<32x8xf32>
    %214 = tpu.matmul %212, %213, %cst_126 {dimension_numbers = #tpu.dot_dimension_numbers<[1], [0], [0], [1], [0, 0, 1, 1], [], []>} : vector<32x32xbf16>, vector<32x8xbf16>, vector<32x8xf32> -> vector<32x8xf32>
    %c3 = arith.constant 3 : index
    %c0_127 = arith.constant 0 : index
    %c0_128 = arith.constant 0 : index
    %215 = vector.load %arg11[%c3, %c0_127, %c0_128] : memref<4x32x8xbf16, #tpu.memory_space<vmem>>, vector<1x32x8xbf16>
    %216 = vector.shape_cast %215 : vector<1x32x8xbf16> to vector<32x8xbf16>
    %cst_129 = arith.constant dense<0.000000e+00> : vector<32x8xf32>
    %217 = tpu.matmul %91, %216, %cst_129 {dimension_numbers = #tpu.dot_dimension_numbers<[1], [0], [0], [1], [0, 0, 1, 1], [], []>} : vector<32x32xbf16>, vector<32x8xbf16>, vector<32x8xf32> -> vector<32x8xf32>
    %c3_130 = arith.constant 3 : index
    %c0_131 = arith.constant 0 : index
    %c0_132 = arith.constant 0 : index
    %218 = vector.load %arg14[%c3_130, %c0_131, %c0_132] : memref<4x1x8xf32, #tpu.memory_space<vmem>>, vector<1x1x8xf32>
    %219 = vector.shape_cast %218 : vector<1x1x8xf32> to vector<1x8xf32>
    %220 = vector.broadcast %219 : vector<1x8xf32> to vector<32x8xf32>
    %221 = arith.addf %217, %220 : vector<32x8xf32>
    %cst_133 = arith.constant 0.353553385 : f32
    %222 = vector.broadcast %cst_133 : f32 to vector<32x8xf32>
    %223 = arith.mulf %221, %222 : vector<32x8xf32>
    %c3_134 = arith.constant 3 : index
    %c0_135 = arith.constant 0 : index
    %c0_136 = arith.constant 0 : index
    %224 = vector.load %arg12[%c3_134, %c0_135, %c0_136] : memref<4x32x8xbf16, #tpu.memory_space<vmem>>, vector<1x32x8xbf16>
    %225 = vector.shape_cast %224 : vector<1x32x8xbf16> to vector<32x8xbf16>
    %cst_137 = arith.constant dense<0.000000e+00> : vector<32x8xf32>
    %226 = tpu.matmul %91, %225, %cst_137 {dimension_numbers = #tpu.dot_dimension_numbers<[1], [0], [0], [1], [0, 0, 1, 1], [], []>} : vector<32x32xbf16>, vector<32x8xbf16>, vector<32x8xf32> -> vector<32x8xf32>
    %c3_138 = arith.constant 3 : index
    %c0_139 = arith.constant 0 : index
    %c0_140 = arith.constant 0 : index
    %227 = vector.load %arg15[%c3_138, %c0_139, %c0_140] : memref<4x1x8xf32, #tpu.memory_space<vmem>>, vector<1x1x8xf32>
    %228 = vector.shape_cast %227 : vector<1x1x8xf32> to vector<1x8xf32>
    %229 = vector.broadcast %228 : vector<1x8xf32> to vector<32x8xf32>
    %230 = arith.addf %226, %229 : vector<32x8xf32>
    %c3_141 = arith.constant 3 : index
    %c0_142 = arith.constant 0 : index
    %c0_143 = arith.constant 0 : index
    %231 = vector.load %arg13[%c3_141, %c0_142, %c0_143] : memref<4x32x8xbf16, #tpu.memory_space<vmem>>, vector<1x32x8xbf16>
    %232 = vector.shape_cast %231 : vector<1x32x8xbf16> to vector<32x8xbf16>
    %cst_144 = arith.constant dense<0.000000e+00> : vector<32x8xf32>
    %233 = tpu.matmul %91, %232, %cst_144 {dimension_numbers = #tpu.dot_dimension_numbers<[1], [0], [0], [1], [0, 0, 1, 1], [], []>} : vector<32x32xbf16>, vector<32x8xbf16>, vector<32x8xf32> -> vector<32x8xf32>
    %c3_145 = arith.constant 3 : index
    %c0_146 = arith.constant 0 : index
    %c0_147 = arith.constant 0 : index
    %234 = vector.load %arg16[%c3_145, %c0_146, %c0_147] : memref<4x1x8xf32, #tpu.memory_space<vmem>>, vector<1x1x8xf32>
    %235 = vector.shape_cast %234 : vector<1x1x8xf32> to vector<1x8xf32>
    %236 = vector.broadcast %235 : vector<1x8xf32> to vector<32x8xf32>
    %237 = arith.addf %233, %236 : vector<32x8xf32>
    %238 = arith.truncf %223 : vector<32x8xf32> to vector<32x8xbf16>
    %239 = arith.truncf %230 : vector<32x8xf32> to vector<32x8xbf16>
    %cst_148 = arith.constant dense<0.000000e+00> : vector<32x32xf32>
    %240 = tpu.matmul %238, %239, %cst_148 {dimension_numbers = #tpu.dot_dimension_numbers<[1], [1], [0], [0], [0, 0, 1, 0], [], []>} : vector<32x8xbf16>, vector<32x8xbf16>, vector<32x32xf32> -> vector<32x32xf32>
    %c3_149 = arith.constant 3 : index
    %c0_150 = arith.constant 0 : index
    %c0_151 = arith.constant 0 : index
    %241 = vector.load %arg17[%c3_149, %c0_150, %c0_151] : memref<4x32x32xf32, #tpu.memory_space<vmem>>, vector<1x32x32xf32>
    %242 = vector.shape_cast %241 : vector<1x32x32xf32> to vector<32x32xf32>
    %243 = arith.addf %240, %242 : vector<32x32xf32>
    %cst_152 = arith.constant dense<0xFF800000> : vector<32xf32>
    %244 = vector.multi_reduction <maximumf>, %243, %cst_152 [1] : vector<32x32xf32> to vector<32xf32>
    %245 = vector.shape_cast %244 : vector<32xf32> to vector<32x1xf32>
    %246 = vector.broadcast %245 : vector<32x1xf32> to vector<32x32xf32>
    %247 = arith.subf %243, %246 : vector<32x32xf32>
    %248 = math.exp %247 : vector<32x32xf32>
    %cst_153 = arith.constant dense<0.000000e+00> : vector<32xf32>
    %249 = vector.multi_reduction <add>, %248, %cst_153 [1] : vector<32x32xf32> to vector<32xf32>
    %250 = vector.shape_cast %249 : vector<32xf32> to vector<32x1xf32>
    %251 = vector.broadcast %250 : vector<32x1xf32> to vector<32x32xf32>
    %252 = arith.divf %248, %251 : vector<32x32xf32>
    %253 = arith.truncf %252 : vector<32x32xf32> to vector<32x32xbf16>
    %254 = arith.truncf %237 : vector<32x8xf32> to vector<32x8xbf16>
    %cst_154 = arith.constant dense<0.000000e+00> : vector<32x8xf32>
    %255 = tpu.matmul %253, %254, %cst_154 {dimension_numbers = #tpu.dot_dimension_numbers<[1], [0], [0], [1], [0, 0, 1, 1], [], []>} : vector<32x32xbf16>, vector<32x8xbf16>, vector<32x8xf32> -> vector<32x8xf32>
    %256 = tpu.concatenate %132, %173, %214, %255 in 1 : vector<32x8xf32>, vector<32x8xf32>, vector<32x8xf32>, vector<32x8xf32> -> vector<32x32xf32>
    %257 = arith.truncf %256 : vector<32x32xf32> to vector<32x32xbf16>
    %c0_155 = arith.constant 0 : index
    %c0_156 = arith.constant 0 : index
    %258 = vector.load %arg18[%c0_155, %c0_156] : memref<32x32xbf16, #tpu.memory_space<vmem>>, vector<32x32xbf16>
    %cst_157 = arith.constant dense<0.000000e+00> : vector<32x32xf32>
    %259 = tpu.matmul %257, %258, %cst_157 {dimension_numbers = #tpu.dot_dimension_numbers<[1], [0], [0], [1], [0, 0, 1, 1], [], []>} : vector<32x32xbf16>, vector<32x32xbf16>, vector<32x32xf32> -> vector<32x32xf32>
    %c0_158 = arith.constant 0 : index
    %c0_159 = arith.constant 0 : index
    %260 = vector.load %arg19[%c0_158, %c0_159] : memref<1x32xf32, #tpu.memory_space<vmem>>, vector<1x32xf32>
    %261 = vector.broadcast %260 : vector<1x32xf32> to vector<32x32xf32>
    %262 = arith.addf %259, %261 : vector<32x32xf32>
    %263 = arith.addf %30, %262 : vector<32x32xf32>
    %c0_160 = arith.constant 0 : index
    %c0_161 = arith.constant 0 : index
    %264 = vector.load %arg20[%c0_160, %c0_161] : memref<1x32xf32, #tpu.memory_space<vmem>>, vector<1x32xf32>
    %c0_162 = arith.constant 0 : index
    %c0_163 = arith.constant 0 : index
    %265 = vector.load %arg21[%c0_162, %c0_163] : memref<1x32xf32, #tpu.memory_space<vmem>>, vector<1x32xf32>
    %cst_164 = arith.constant dense<0.000000e+00> : vector<32xf32>
    %266 = vector.multi_reduction <add>, %263, %cst_164 [1] : vector<32x32xf32> to vector<32xf32>
    %267 = vector.shape_cast %266 : vector<32xf32> to vector<32x1xf32>
    %cst_165 = arith.constant 3.200000e+01 : f32
    %268 = vector.broadcast %cst_165 : f32 to vector<32x1xf32>
    %269 = arith.divf %267, %268 : vector<32x1xf32>
    %270 = vector.broadcast %269 : vector<32x1xf32> to vector<32x32xf32>
    %271 = arith.subf %263, %270 : vector<32x32xf32>
    %272 = arith.mulf %271, %271 : vector<32x32xf32>
    %cst_166 = arith.constant dense<0.000000e+00> : vector<32xf32>
    %273 = vector.multi_reduction <add>, %272, %cst_166 [1] : vector<32x32xf32> to vector<32xf32>
    %274 = vector.shape_cast %273 : vector<32xf32> to vector<32x1xf32>
    %cst_167 = arith.constant 3.200000e+01 : f32
    %275 = vector.broadcast %cst_167 : f32 to vector<32x1xf32>
    %276 = arith.divf %274, %275 : vector<32x1xf32>
    %277 = vector.broadcast %269 : vector<32x1xf32> to vector<32x32xf32>
    %278 = arith.subf %263, %277 : vector<32x32xf32>
    %cst_168 = arith.constant 9.99999974E-6 : f32
    %279 = vector.broadcast %cst_168 : f32 to vector<32x1xf32>
    %280 = arith.addf %276, %279 : vector<32x1xf32>
    %281 = math.rsqrt %280 : vector<32x1xf32>
    %282 = vector.broadcast %281 : vector<32x1xf32> to vector<32x32xf32>
    %283 = arith.mulf %278, %282 : vector<32x32xf32>
    %284 = vector.broadcast %264 : vector<1x32xf32> to vector<32x32xf32>
    %285 = arith.mulf %283, %284 : vector<32x32xf32>
    %286 = vector.broadcast %265 : vector<1x32xf32> to vector<32x32xf32>
    %287 = arith.addf %285, %286 : vector<32x32xf32>
    %288 = arith.truncf %287 : vector<32x32xf32> to vector<32x32xbf16>
    %c0_169 = arith.constant 0 : index
    %c0_170 = arith.constant 0 : index
    %289 = vector.load %arg22[%c0_169, %c0_170] : memref<32x128xbf16, #tpu.memory_space<vmem>>, vector<32x128xbf16>
    %cst_171 = arith.constant dense<0.000000e+00> : vector<32x128xf32>
    %290 = tpu.matmul %288, %289, %cst_171 {dimension_numbers = #tpu.dot_dimension_numbers<[1], [0], [0], [1], [0, 0, 1, 1], [], []>} : vector<32x32xbf16>, vector<32x128xbf16>, vector<32x128xf32> -> vector<32x128xf32>
    %c0_172 = arith.constant 0 : index
    %c0_173 = arith.constant 0 : index
    %291 = vector.load %arg23[%c0_172, %c0_173] : memref<1x128xf32, #tpu.memory_space<vmem>>, vector<1x128xf32>
    %292 = vector.broadcast %291 : vector<1x128xf32> to vector<32x128xf32>
    %293 = arith.addf %290, %292 : vector<32x128xf32>
    %294 = arith.mulf %293, %293 : vector<32x128xf32>
    %295 = arith.mulf %293, %294 : vector<32x128xf32>
    %cst_174 = arith.constant 4.471500e-02 : f32
    %296 = vector.broadcast %cst_174 : f32 to vector<32x128xf32>
    %297 = arith.mulf %296, %295 : vector<32x128xf32>
    %298 = arith.addf %293, %297 : vector<32x128xf32>
    %cst_175 = arith.constant 0.797884583 : f32
    %299 = vector.broadcast %cst_175 : f32 to vector<32x128xf32>
    %300 = arith.mulf %299, %298 : vector<32x128xf32>
    %301 = math.tanh %300 : vector<32x128xf32>
    %cst_176 = arith.constant 1.000000e+00 : f32
    %302 = vector.broadcast %cst_176 : f32 to vector<32x128xf32>
    %303 = arith.addf %302, %301 : vector<32x128xf32>
    %cst_177 = arith.constant 5.000000e-01 : f32
    %304 = vector.broadcast %cst_177 : f32 to vector<32x128xf32>
    %305 = arith.mulf %304, %303 : vector<32x128xf32>
    %306 = arith.mulf %293, %305 : vector<32x128xf32>
    %307 = arith.truncf %306 : vector<32x128xf32> to vector<32x128xbf16>
    %c0_178 = arith.constant 0 : index
    %c0_179 = arith.constant 0 : index
    %308 = vector.load %arg24[%c0_178, %c0_179] : memref<128x32xbf16, #tpu.memory_space<vmem>>, vector<128x32xbf16>
    %cst_180 = arith.constant dense<0.000000e+00> : vector<32x32xf32>
    %309 = tpu.matmul %307, %308, %cst_180 {dimension_numbers = #tpu.dot_dimension_numbers<[1], [0], [0], [1], [0, 0, 1, 1], [], []>} : vector<32x128xbf16>, vector<128x32xbf16>, vector<32x32xf32> -> vector<32x32xf32>
    %c0_181 = arith.constant 0 : index
    %c0_182 = arith.constant 0 : index
    %310 = vector.load %arg25[%c0_181, %c0_182] : memref<1x32xf32, #tpu.memory_space<vmem>>, vector<1x32xf32>
    %311 = vector.broadcast %310 : vector<1x32xf32> to vector<32x32xf32>
    %312 = arith.addf %309, %311 : vector<32x32xf32>
    %313 = arith.addf %263, %312 : vector<32x32xf32>
    %c0_183 = arith.constant 0 : index
    %c0_184 = arith.constant 0 : index
    %314 = vector.load %arg26[%c0_183, %c0_184] : memref<1x32xf32, #tpu.memory_space<vmem>>, vector<1x32xf32>
    %c0_185 = arith.constant 0 : index
    %c0_186 = arith.constant 0 : index
    %315 = vector.load %arg27[%c0_185, %c0_186] : memref<1x32xf32, #tpu.memory_space<vmem>>, vector<1x32xf32>
    %cst_187 = arith.constant dense<0.000000e+00> : vector<32xf32>
    %316 = vector.multi_reduction <add>, %313, %cst_187 [1] : vector<32x32xf32> to vector<32xf32>
    %317 = vector.shape_cast %316 : vector<32xf32> to vector<32x1xf32>
    %cst_188 = arith.constant 3.200000e+01 : f32
    %318 = vector.broadcast %cst_188 : f32 to vector<32x1xf32>
    %319 = arith.divf %317, %318 : vector<32x1xf32>
    %320 = vector.broadcast %319 : vector<32x1xf32> to vector<32x32xf32>
    %321 = arith.subf %313, %320 : vector<32x32xf32>
    %322 = arith.mulf %321, %321 : vector<32x32xf32>
    %cst_189 = arith.constant dense<0.000000e+00> : vector<32xf32>
    %323 = vector.multi_reduction <add>, %322, %cst_189 [1] : vector<32x32xf32> to vector<32xf32>
    %324 = vector.shape_cast %323 : vector<32xf32> to vector<32x1xf32>
    %cst_190 = arith.constant 3.200000e+01 : f32
    %325 = vector.broadcast %cst_190 : f32 to vector<32x1xf32>
    %326 = arith.divf %324, %325 : vector<32x1xf32>
    %327 = vector.broadcast %319 : vector<32x1xf32> to vector<32x32xf32>
    %328 = arith.subf %313, %327 : vector<32x32xf32>
    %cst_191 = arith.constant 9.99999974E-6 : f32
    %329 = vector.broadcast %cst_191 : f32 to vector<32x1xf32>
    %330 = arith.addf %326, %329 : vector<32x1xf32>
    %331 = math.rsqrt %330 : vector<32x1xf32>
    %332 = vector.broadcast %331 : vector<32x1xf32> to vector<32x32xf32>
    %333 = arith.mulf %328, %332 : vector<32x32xf32>
    %334 = vector.broadcast %314 : vector<1x32xf32> to vector<32x32xf32>
    %335 = arith.mulf %333, %334 : vector<32x32xf32>
    %336 = vector.broadcast %315 : vector<1x32xf32> to vector<32x32xf32>
    %337 = arith.addf %335, %336 : vector<32x32xf32>
    %338 = arith.truncf %337 : vector<32x32xf32> to vector<32x32xbf16>
    %c0_192 = arith.constant 0 : index
    %c0_193 = arith.constant 0 : index
    %c0_194 = arith.constant 0 : index
    %339 = vector.load %arg28[%c0_192, %c0_193, %c0_194] : memref<4x32x8xbf16, #tpu.memory_space<vmem>>, vector<1x32x8xbf16>
    %340 = vector.shape_cast %339 : vector<1x32x8xbf16> to vector<32x8xbf16>
    %cst_195 = arith.constant dense<0.000000e+00> : vector<32x8xf32>
    %341 = tpu.matmul %338, %340, %cst_195 {dimension_numbers = #tpu.dot_dimension_numbers<[1], [0], [0], [1], [0, 0, 1, 1], [], []>} : vector<32x32xbf16>, vector<32x8xbf16>, vector<32x8xf32> -> vector<32x8xf32>
    %c0_196 = arith.constant 0 : index
    %c0_197 = arith.constant 0 : index
    %c0_198 = arith.constant 0 : index
    %342 = vector.load %arg31[%c0_196, %c0_197, %c0_198] : memref<4x1x8xf32, #tpu.memory_space<vmem>>, vector<1x1x8xf32>
    %343 = vector.shape_cast %342 : vector<1x1x8xf32> to vector<1x8xf32>
    %344 = vector.broadcast %343 : vector<1x8xf32> to vector<32x8xf32>
    %345 = arith.addf %341, %344 : vector<32x8xf32>
    %cst_199 = arith.constant 0.353553385 : f32
    %346 = vector.broadcast %cst_199 : f32 to vector<32x8xf32>
    %347 = arith.mulf %345, %346 : vector<32x8xf32>
    %c0_200 = arith.constant 0 : index
    %c0_201 = arith.constant 0 : index
    %c0_202 = arith.constant 0 : index
    %348 = vector.load %arg29[%c0_200, %c0_201, %c0_202] : memref<4x32x8xbf16, #tpu.memory_space<vmem>>, vector<1x32x8xbf16>
    %349 = vector.shape_cast %348 : vector<1x32x8xbf16> to vector<32x8xbf16>
    %cst_203 = arith.constant dense<0.000000e+00> : vector<32x8xf32>
    %350 = tpu.matmul %338, %349, %cst_203 {dimension_numbers = #tpu.dot_dimension_numbers<[1], [0], [0], [1], [0, 0, 1, 1], [], []>} : vector<32x32xbf16>, vector<32x8xbf16>, vector<32x8xf32> -> vector<32x8xf32>
    %c0_204 = arith.constant 0 : index
    %c0_205 = arith.constant 0 : index
    %c0_206 = arith.constant 0 : index
    %351 = vector.load %arg32[%c0_204, %c0_205, %c0_206] : memref<4x1x8xf32, #tpu.memory_space<vmem>>, vector<1x1x8xf32>
    %352 = vector.shape_cast %351 : vector<1x1x8xf32> to vector<1x8xf32>
    %353 = vector.broadcast %352 : vector<1x8xf32> to vector<32x8xf32>
    %354 = arith.addf %350, %353 : vector<32x8xf32>
    %c0_207 = arith.constant 0 : index
    %c0_208 = arith.constant 0 : index
    %c0_209 = arith.constant 0 : index
    %355 = vector.load %arg30[%c0_207, %c0_208, %c0_209] : memref<4x32x8xbf16, #tpu.memory_space<vmem>>, vector<1x32x8xbf16>
    %356 = vector.shape_cast %355 : vector<1x32x8xbf16> to vector<32x8xbf16>
    %cst_210 = arith.constant dense<0.000000e+00> : vector<32x8xf32>
    %357 = tpu.matmul %338, %356, %cst_210 {dimension_numbers = #tpu.dot_dimension_numbers<[1], [0], [0], [1], [0, 0, 1, 1], [], []>} : vector<32x32xbf16>, vector<32x8xbf16>, vector<32x8xf32> -> vector<32x8xf32>
    %c0_211 = arith.constant 0 : index
    %c0_212 = arith.constant 0 : index
    %c0_213 = arith.constant 0 : index
    %358 = vector.load %arg33[%c0_211, %c0_212, %c0_213] : memref<4x1x8xf32, #tpu.memory_space<vmem>>, vector<1x1x8xf32>
    %359 = vector.shape_cast %358 : vector<1x1x8xf32> to vector<1x8xf32>
    %360 = vector.broadcast %359 : vector<1x8xf32> to vector<32x8xf32>
    %361 = arith.addf %357, %360 : vector<32x8xf32>
    %362 = arith.truncf %347 : vector<32x8xf32> to vector<32x8xbf16>
    %363 = arith.truncf %354 : vector<32x8xf32> to vector<32x8xbf16>
    %cst_214 = arith.constant dense<0.000000e+00> : vector<32x32xf32>
    %364 = tpu.matmul %362, %363, %cst_214 {dimension_numbers = #tpu.dot_dimension_numbers<[1], [1], [0], [0], [0, 0, 1, 0], [], []>} : vector<32x8xbf16>, vector<32x8xbf16>, vector<32x32xf32> -> vector<32x32xf32>
    %c0_215 = arith.constant 0 : index
    %c0_216 = arith.constant 0 : index
    %c0_217 = arith.constant 0 : index
    %365 = vector.load %arg34[%c0_215, %c0_216, %c0_217] : memref<4x32x32xf32, #tpu.memory_space<vmem>>, vector<1x32x32xf32>
    %366 = vector.shape_cast %365 : vector<1x32x32xf32> to vector<32x32xf32>
    %367 = arith.addf %364, %366 : vector<32x32xf32>
    %cst_218 = arith.constant dense<0xFF800000> : vector<32xf32>
    %368 = vector.multi_reduction <maximumf>, %367, %cst_218 [1] : vector<32x32xf32> to vector<32xf32>
    %369 = vector.shape_cast %368 : vector<32xf32> to vector<32x1xf32>
    %370 = vector.broadcast %369 : vector<32x1xf32> to vector<32x32xf32>
    %371 = arith.subf %367, %370 : vector<32x32xf32>
    %372 = math.exp %371 : vector<32x32xf32>
    %cst_219 = arith.constant dense<0.000000e+00> : vector<32xf32>
    %373 = vector.multi_reduction <add>, %372, %cst_219 [1] : vector<32x32xf32> to vector<32xf32>
    %374 = vector.shape_cast %373 : vector<32xf32> to vector<32x1xf32>
    %375 = vector.broadcast %374 : vector<32x1xf32> to vector<32x32xf32>
    %376 = arith.divf %372, %375 : vector<32x32xf32>
    %377 = arith.truncf %376 : vector<32x32xf32> to vector<32x32xbf16>
    %378 = arith.truncf %361 : vector<32x8xf32> to vector<32x8xbf16>
    %cst_220 = arith.constant dense<0.000000e+00> : vector<32x8xf32>
    %379 = tpu.matmul %377, %378, %cst_220 {dimension_numbers = #tpu.dot_dimension_numbers<[1], [0], [0], [1], [0, 0, 1, 1], [], []>} : vector<32x32xbf16>, vector<32x8xbf16>, vector<32x8xf32> -> vector<32x8xf32>
    %c1_221 = arith.constant 1 : index
    %c0_222 = arith.constant 0 : index
    %c0_223 = arith.constant 0 : index
    %380 = vector.load %arg28[%c1_221, %c0_222, %c0_223] : memref<4x32x8xbf16, #tpu.memory_space<vmem>>, vector<1x32x8xbf16>
    %381 = vector.shape_cast %380 : vector<1x32x8xbf16> to vector<32x8xbf16>
    %cst_224 = arith.constant dense<0.000000e+00> : vector<32x8xf32>
    %382 = tpu.matmul %338, %381, %cst_224 {dimension_numbers = #tpu.dot_dimension_numbers<[1], [0], [0], [1], [0, 0, 1, 1], [], []>} : vector<32x32xbf16>, vector<32x8xbf16>, vector<32x8xf32> -> vector<32x8xf32>
    %c1_225 = arith.constant 1 : index
    %c0_226 = arith.constant 0 : index
    %c0_227 = arith.constant 0 : index
    %383 = vector.load %arg31[%c1_225, %c0_226, %c0_227] : memref<4x1x8xf32, #tpu.memory_space<vmem>>, vector<1x1x8xf32>
    %384 = vector.shape_cast %383 : vector<1x1x8xf32> to vector<1x8xf32>
    %385 = vector.broadcast %384 : vector<1x8xf32> to vector<32x8xf32>
    %386 = arith.addf %382, %385 : vector<32x8xf32>
    %cst_228 = arith.constant 0.353553385 : f32
    %387 = vector.broadcast %cst_228 : f32 to vector<32x8xf32>
    %388 = arith.mulf %386, %387 : vector<32x8xf32>
    %c1_229 = arith.constant 1 : index
    %c0_230 = arith.constant 0 : index
    %c0_231 = arith.constant 0 : index
    %389 = vector.load %arg29[%c1_229, %c0_230, %c0_231] : memref<4x32x8xbf16, #tpu.memory_space<vmem>>, vector<1x32x8xbf16>
    %390 = vector.shape_cast %389 : vector<1x32x8xbf16> to vector<32x8xbf16>
    %cst_232 = arith.constant dense<0.000000e+00> : vector<32x8xf32>
    %391 = tpu.matmul %338, %390, %cst_232 {dimension_numbers = #tpu.dot_dimension_numbers<[1], [0], [0], [1], [0, 0, 1, 1], [], []>} : vector<32x32xbf16>, vector<32x8xbf16>, vector<32x8xf32> -> vector<32x8xf32>
    %c1_233 = arith.constant 1 : index
    %c0_234 = arith.constant 0 : index
    %c0_235 = arith.constant 0 : index
    %392 = vector.load %arg32[%c1_233, %c0_234, %c0_235] : memref<4x1x8xf32, #tpu.memory_space<vmem>>, vector<1x1x8xf32>
    %393 = vector.shape_cast %392 : vector<1x1x8xf32> to vector<1x8xf32>
    %394 = vector.broadcast %393 : vector<1x8xf32> to vector<32x8xf32>
    %395 = arith.addf %391, %394 : vector<32x8xf32>
    %c1_236 = arith.constant 1 : index
    %c0_237 = arith.constant 0 : index
    %c0_238 = arith.constant 0 : index
    %396 = vector.load %arg30[%c1_236, %c0_237, %c0_238] : memref<4x32x8xbf16, #tpu.memory_space<vmem>>, vector<1x32x8xbf16>
    %397 = vector.shape_cast %396 : vector<1x32x8xbf16> to vector<32x8xbf16>
    %cst_239 = arith.constant dense<0.000000e+00> : vector<32x8xf32>
    %398 = tpu.matmul %338, %397, %cst_239 {dimension_numbers = #tpu.dot_dimension_numbers<[1], [0], [0], [1], [0, 0, 1, 1], [], []>} : vector<32x32xbf16>, vector<32x8xbf16>, vector<32x8xf32> -> vector<32x8xf32>
    %c1_240 = arith.constant 1 : index
    %c0_241 = arith.constant 0 : index
    %c0_242 = arith.constant 0 : index
    %399 = vector.load %arg33[%c1_240, %c0_241, %c0_242] : memref<4x1x8xf32, #tpu.memory_space<vmem>>, vector<1x1x8xf32>
    %400 = vector.shape_cast %399 : vector<1x1x8xf32> to vector<1x8xf32>
    %401 = vector.broadcast %400 : vector<1x8xf32> to vector<32x8xf32>
    %402 = arith.addf %398, %401 : vector<32x8xf32>
    %403 = arith.truncf %388 : vector<32x8xf32> to vector<32x8xbf16>
    %404 = arith.truncf %395 : vector<32x8xf32> to vector<32x8xbf16>
    %cst_243 = arith.constant dense<0.000000e+00> : vector<32x32xf32>
    %405 = tpu.matmul %403, %404, %cst_243 {dimension_numbers = #tpu.dot_dimension_numbers<[1], [1], [0], [0], [0, 0, 1, 0], [], []>} : vector<32x8xbf16>, vector<32x8xbf16>, vector<32x32xf32> -> vector<32x32xf32>
    %c1_244 = arith.constant 1 : index
    %c0_245 = arith.constant 0 : index
    %c0_246 = arith.constant 0 : index
    %406 = vector.load %arg34[%c1_244, %c0_245, %c0_246] : memref<4x32x32xf32, #tpu.memory_space<vmem>>, vector<1x32x32xf32>
    %407 = vector.shape_cast %406 : vector<1x32x32xf32> to vector<32x32xf32>
    %408 = arith.addf %405, %407 : vector<32x32xf32>
    %cst_247 = arith.constant dense<0xFF800000> : vector<32xf32>
    %409 = vector.multi_reduction <maximumf>, %408, %cst_247 [1] : vector<32x32xf32> to vector<32xf32>
    %410 = vector.shape_cast %409 : vector<32xf32> to vector<32x1xf32>
    %411 = vector.broadcast %410 : vector<32x1xf32> to vector<32x32xf32>
    %412 = arith.subf %408, %411 : vector<32x32xf32>
    %413 = math.exp %412 : vector<32x32xf32>
    %cst_248 = arith.constant dense<0.000000e+00> : vector<32xf32>
    %414 = vector.multi_reduction <add>, %413, %cst_248 [1] : vector<32x32xf32> to vector<32xf32>
    %415 = vector.shape_cast %414 : vector<32xf32> to vector<32x1xf32>
    %416 = vector.broadcast %415 : vector<32x1xf32> to vector<32x32xf32>
    %417 = arith.divf %413, %416 : vector<32x32xf32>
    %418 = arith.truncf %417 : vector<32x32xf32> to vector<32x32xbf16>
    %419 = arith.truncf %402 : vector<32x8xf32> to vector<32x8xbf16>
    %cst_249 = arith.constant dense<0.000000e+00> : vector<32x8xf32>
    %420 = tpu.matmul %418, %419, %cst_249 {dimension_numbers = #tpu.dot_dimension_numbers<[1], [0], [0], [1], [0, 0, 1, 1], [], []>} : vector<32x32xbf16>, vector<32x8xbf16>, vector<32x8xf32> -> vector<32x8xf32>
    %c2_250 = arith.constant 2 : index
    %c0_251 = arith.constant 0 : index
    %c0_252 = arith.constant 0 : index
    %421 = vector.load %arg28[%c2_250, %c0_251, %c0_252] : memref<4x32x8xbf16, #tpu.memory_space<vmem>>, vector<1x32x8xbf16>
    %422 = vector.shape_cast %421 : vector<1x32x8xbf16> to vector<32x8xbf16>
    %cst_253 = arith.constant dense<0.000000e+00> : vector<32x8xf32>
    %423 = tpu.matmul %338, %422, %cst_253 {dimension_numbers = #tpu.dot_dimension_numbers<[1], [0], [0], [1], [0, 0, 1, 1], [], []>} : vector<32x32xbf16>, vector<32x8xbf16>, vector<32x8xf32> -> vector<32x8xf32>
    %c2_254 = arith.constant 2 : index
    %c0_255 = arith.constant 0 : index
    %c0_256 = arith.constant 0 : index
    %424 = vector.load %arg31[%c2_254, %c0_255, %c0_256] : memref<4x1x8xf32, #tpu.memory_space<vmem>>, vector<1x1x8xf32>
    %425 = vector.shape_cast %424 : vector<1x1x8xf32> to vector<1x8xf32>
    %426 = vector.broadcast %425 : vector<1x8xf32> to vector<32x8xf32>
    %427 = arith.addf %423, %426 : vector<32x8xf32>
    %cst_257 = arith.constant 0.353553385 : f32
    %428 = vector.broadcast %cst_257 : f32 to vector<32x8xf32>
    %429 = arith.mulf %427, %428 : vector<32x8xf32>
    %c2_258 = arith.constant 2 : index
    %c0_259 = arith.constant 0 : index
    %c0_260 = arith.constant 0 : index
    %430 = vector.load %arg29[%c2_258, %c0_259, %c0_260] : memref<4x32x8xbf16, #tpu.memory_space<vmem>>, vector<1x32x8xbf16>
    %431 = vector.shape_cast %430 : vector<1x32x8xbf16> to vector<32x8xbf16>
    %cst_261 = arith.constant dense<0.000000e+00> : vector<32x8xf32>
    %432 = tpu.matmul %338, %431, %cst_261 {dimension_numbers = #tpu.dot_dimension_numbers<[1], [0], [0], [1], [0, 0, 1, 1], [], []>} : vector<32x32xbf16>, vector<32x8xbf16>, vector<32x8xf32> -> vector<32x8xf32>
    %c2_262 = arith.constant 2 : index
    %c0_263 = arith.constant 0 : index
    %c0_264 = arith.constant 0 : index
    %433 = vector.load %arg32[%c2_262, %c0_263, %c0_264] : memref<4x1x8xf32, #tpu.memory_space<vmem>>, vector<1x1x8xf32>
    %434 = vector.shape_cast %433 : vector<1x1x8xf32> to vector<1x8xf32>
    %435 = vector.broadcast %434 : vector<1x8xf32> to vector<32x8xf32>
    %436 = arith.addf %432, %435 : vector<32x8xf32>
    %c2_265 = arith.constant 2 : index
    %c0_266 = arith.constant 0 : index
    %c0_267 = arith.constant 0 : index
    %437 = vector.load %arg30[%c2_265, %c0_266, %c0_267] : memref<4x32x8xbf16, #tpu.memory_space<vmem>>, vector<1x32x8xbf16>
    %438 = vector.shape_cast %437 : vector<1x32x8xbf16> to vector<32x8xbf16>
    %cst_268 = arith.constant dense<0.000000e+00> : vector<32x8xf32>
    %439 = tpu.matmul %338, %438, %cst_268 {dimension_numbers = #tpu.dot_dimension_numbers<[1], [0], [0], [1], [0, 0, 1, 1], [], []>} : vector<32x32xbf16>, vector<32x8xbf16>, vector<32x8xf32> -> vector<32x8xf32>
    %c2_269 = arith.constant 2 : index
    %c0_270 = arith.constant 0 : index
    %c0_271 = arith.constant 0 : index
    %440 = vector.load %arg33[%c2_269, %c0_270, %c0_271] : memref<4x1x8xf32, #tpu.memory_space<vmem>>, vector<1x1x8xf32>
    %441 = vector.shape_cast %440 : vector<1x1x8xf32> to vector<1x8xf32>
    %442 = vector.broadcast %441 : vector<1x8xf32> to vector<32x8xf32>
    %443 = arith.addf %439, %442 : vector<32x8xf32>
    %444 = arith.truncf %429 : vector<32x8xf32> to vector<32x8xbf16>
    %445 = arith.truncf %436 : vector<32x8xf32> to vector<32x8xbf16>
    %cst_272 = arith.constant dense<0.000000e+00> : vector<32x32xf32>
    %446 = tpu.matmul %444, %445, %cst_272 {dimension_numbers = #tpu.dot_dimension_numbers<[1], [1], [0], [0], [0, 0, 1, 0], [], []>} : vector<32x8xbf16>, vector<32x8xbf16>, vector<32x32xf32> -> vector<32x32xf32>
    %c2_273 = arith.constant 2 : index
    %c0_274 = arith.constant 0 : index
    %c0_275 = arith.constant 0 : index
    %447 = vector.load %arg34[%c2_273, %c0_274, %c0_275] : memref<4x32x32xf32, #tpu.memory_space<vmem>>, vector<1x32x32xf32>
    %448 = vector.shape_cast %447 : vector<1x32x32xf32> to vector<32x32xf32>
    %449 = arith.addf %446, %448 : vector<32x32xf32>
    %cst_276 = arith.constant dense<0xFF800000> : vector<32xf32>
    %450 = vector.multi_reduction <maximumf>, %449, %cst_276 [1] : vector<32x32xf32> to vector<32xf32>
    %451 = vector.shape_cast %450 : vector<32xf32> to vector<32x1xf32>
    %452 = vector.broadcast %451 : vector<32x1xf32> to vector<32x32xf32>
    %453 = arith.subf %449, %452 : vector<32x32xf32>
    %454 = math.exp %453 : vector<32x32xf32>
    %cst_277 = arith.constant dense<0.000000e+00> : vector<32xf32>
    %455 = vector.multi_reduction <add>, %454, %cst_277 [1] : vector<32x32xf32> to vector<32xf32>
    %456 = vector.shape_cast %455 : vector<32xf32> to vector<32x1xf32>
    %457 = vector.broadcast %456 : vector<32x1xf32> to vector<32x32xf32>
    %458 = arith.divf %454, %457 : vector<32x32xf32>
    %459 = arith.truncf %458 : vector<32x32xf32> to vector<32x32xbf16>
    %460 = arith.truncf %443 : vector<32x8xf32> to vector<32x8xbf16>
    %cst_278 = arith.constant dense<0.000000e+00> : vector<32x8xf32>
    %461 = tpu.matmul %459, %460, %cst_278 {dimension_numbers = #tpu.dot_dimension_numbers<[1], [0], [0], [1], [0, 0, 1, 1], [], []>} : vector<32x32xbf16>, vector<32x8xbf16>, vector<32x8xf32> -> vector<32x8xf32>
    %c3_279 = arith.constant 3 : index
    %c0_280 = arith.constant 0 : index
    %c0_281 = arith.constant 0 : index
    %462 = vector.load %arg28[%c3_279, %c0_280, %c0_281] : memref<4x32x8xbf16, #tpu.memory_space<vmem>>, vector<1x32x8xbf16>
    %463 = vector.shape_cast %462 : vector<1x32x8xbf16> to vector<32x8xbf16>
    %cst_282 = arith.constant dense<0.000000e+00> : vector<32x8xf32>
    %464 = tpu.matmul %338, %463, %cst_282 {dimension_numbers = #tpu.dot_dimension_numbers<[1], [0], [0], [1], [0, 0, 1, 1], [], []>} : vector<32x32xbf16>, vector<32x8xbf16>, vector<32x8xf32> -> vector<32x8xf32>
    %c3_283 = arith.constant 3 : index
    %c0_284 = arith.constant 0 : index
    %c0_285 = arith.constant 0 : index
    %465 = vector.load %arg31[%c3_283, %c0_284, %c0_285] : memref<4x1x8xf32, #tpu.memory_space<vmem>>, vector<1x1x8xf32>
    %466 = vector.shape_cast %465 : vector<1x1x8xf32> to vector<1x8xf32>
    %467 = vector.broadcast %466 : vector<1x8xf32> to vector<32x8xf32>
    %468 = arith.addf %464, %467 : vector<32x8xf32>
    %cst_286 = arith.constant 0.353553385 : f32
    %469 = vector.broadcast %cst_286 : f32 to vector<32x8xf32>
    %470 = arith.mulf %468, %469 : vector<32x8xf32>
    %c3_287 = arith.constant 3 : index
    %c0_288 = arith.constant 0 : index
    %c0_289 = arith.constant 0 : index
    %471 = vector.load %arg29[%c3_287, %c0_288, %c0_289] : memref<4x32x8xbf16, #tpu.memory_space<vmem>>, vector<1x32x8xbf16>
    %472 = vector.shape_cast %471 : vector<1x32x8xbf16> to vector<32x8xbf16>
    %cst_290 = arith.constant dense<0.000000e+00> : vector<32x8xf32>
    %473 = tpu.matmul %338, %472, %cst_290 {dimension_numbers = #tpu.dot_dimension_numbers<[1], [0], [0], [1], [0, 0, 1, 1], [], []>} : vector<32x32xbf16>, vector<32x8xbf16>, vector<32x8xf32> -> vector<32x8xf32>
    %c3_291 = arith.constant 3 : index
    %c0_292 = arith.constant 0 : index
    %c0_293 = arith.constant 0 : index
    %474 = vector.load %arg32[%c3_291, %c0_292, %c0_293] : memref<4x1x8xf32, #tpu.memory_space<vmem>>, vector<1x1x8xf32>
    %475 = vector.shape_cast %474 : vector<1x1x8xf32> to vector<1x8xf32>
    %476 = vector.broadcast %475 : vector<1x8xf32> to vector<32x8xf32>
    %477 = arith.addf %473, %476 : vector<32x8xf32>
    %c3_294 = arith.constant 3 : index
    %c0_295 = arith.constant 0 : index
    %c0_296 = arith.constant 0 : index
    %478 = vector.load %arg30[%c3_294, %c0_295, %c0_296] : memref<4x32x8xbf16, #tpu.memory_space<vmem>>, vector<1x32x8xbf16>
    %479 = vector.shape_cast %478 : vector<1x32x8xbf16> to vector<32x8xbf16>
    %cst_297 = arith.constant dense<0.000000e+00> : vector<32x8xf32>
    %480 = tpu.matmul %338, %479, %cst_297 {dimension_numbers = #tpu.dot_dimension_numbers<[1], [0], [0], [1], [0, 0, 1, 1], [], []>} : vector<32x32xbf16>, vector<32x8xbf16>, vector<32x8xf32> -> vector<32x8xf32>
    %c3_298 = arith.constant 3 : index
    %c0_299 = arith.constant 0 : index
    %c0_300 = arith.constant 0 : index
    %481 = vector.load %arg33[%c3_298, %c0_299, %c0_300] : memref<4x1x8xf32, #tpu.memory_space<vmem>>, vector<1x1x8xf32>
    %482 = vector.shape_cast %481 : vector<1x1x8xf32> to vector<1x8xf32>
    %483 = vector.broadcast %482 : vector<1x8xf32> to vector<32x8xf32>
    %484 = arith.addf %480, %483 : vector<32x8xf32>
    %485 = arith.truncf %470 : vector<32x8xf32> to vector<32x8xbf16>
    %486 = arith.truncf %477 : vector<32x8xf32> to vector<32x8xbf16>
    %cst_301 = arith.constant dense<0.000000e+00> : vector<32x32xf32>
    %487 = tpu.matmul %485, %486, %cst_301 {dimension_numbers = #tpu.dot_dimension_numbers<[1], [1], [0], [0], [0, 0, 1, 0], [], []>} : vector<32x8xbf16>, vector<32x8xbf16>, vector<32x32xf32> -> vector<32x32xf32>
    %c3_302 = arith.constant 3 : index
    %c0_303 = arith.constant 0 : index
    %c0_304 = arith.constant 0 : index
    %488 = vector.load %arg34[%c3_302, %c0_303, %c0_304] : memref<4x32x32xf32, #tpu.memory_space<vmem>>, vector<1x32x32xf32>
    %489 = vector.shape_cast %488 : vector<1x32x32xf32> to vector<32x32xf32>
    %490 = arith.addf %487, %489 : vector<32x32xf32>
    %cst_305 = arith.constant dense<0xFF800000> : vector<32xf32>
    %491 = vector.multi_reduction <maximumf>, %490, %cst_305 [1] : vector<32x32xf32> to vector<32xf32>
    %492 = vector.shape_cast %491 : vector<32xf32> to vector<32x1xf32>
    %493 = vector.broadcast %492 : vector<32x1xf32> to vector<32x32xf32>
    %494 = arith.subf %490, %493 : vector<32x32xf32>
    %495 = math.exp %494 : vector<32x32xf32>
    %cst_306 = arith.constant dense<0.000000e+00> : vector<32xf32>
    %496 = vector.multi_reduction <add>, %495, %cst_306 [1] : vector<32x32xf32> to vector<32xf32>
    %497 = vector.shape_cast %496 : vector<32xf32> to vector<32x1xf32>
    %498 = vector.broadcast %497 : vector<32x1xf32> to vector<32x32xf32>
    %499 = arith.divf %495, %498 : vector<32x32xf32>
    %500 = arith.truncf %499 : vector<32x32xf32> to vector<32x32xbf16>
    %501 = arith.truncf %484 : vector<32x8xf32> to vector<32x8xbf16>
    %cst_307 = arith.constant dense<0.000000e+00> : vector<32x8xf32>
    %502 = tpu.matmul %500, %501, %cst_307 {dimension_numbers = #tpu.dot_dimension_numbers<[1], [0], [0], [1], [0, 0, 1, 1], [], []>} : vector<32x32xbf16>, vector<32x8xbf16>, vector<32x8xf32> -> vector<32x8xf32>
    %503 = tpu.concatenate %379, %420, %461, %502 in 1 : vector<32x8xf32>, vector<32x8xf32>, vector<32x8xf32>, vector<32x8xf32> -> vector<32x32xf32>
    %504 = arith.truncf %503 : vector<32x32xf32> to vector<32x32xbf16>
    %c0_308 = arith.constant 0 : index
    %c0_309 = arith.constant 0 : index
    %505 = vector.load %arg35[%c0_308, %c0_309] : memref<32x32xbf16, #tpu.memory_space<vmem>>, vector<32x32xbf16>
    %cst_310 = arith.constant dense<0.000000e+00> : vector<32x32xf32>
    %506 = tpu.matmul %504, %505, %cst_310 {dimension_numbers = #tpu.dot_dimension_numbers<[1], [0], [0], [1], [0, 0, 1, 1], [], []>} : vector<32x32xbf16>, vector<32x32xbf16>, vector<32x32xf32> -> vector<32x32xf32>
    %c0_311 = arith.constant 0 : index
    %c0_312 = arith.constant 0 : index
    %507 = vector.load %arg36[%c0_311, %c0_312] : memref<1x32xf32, #tpu.memory_space<vmem>>, vector<1x32xf32>
    %508 = vector.broadcast %507 : vector<1x32xf32> to vector<32x32xf32>
    %509 = arith.addf %506, %508 : vector<32x32xf32>
    %510 = arith.addf %313, %509 : vector<32x32xf32>
    %c0_313 = arith.constant 0 : index
    %c0_314 = arith.constant 0 : index
    %511 = vector.load %arg37[%c0_313, %c0_314] : memref<1x32xf32, #tpu.memory_space<vmem>>, vector<1x32xf32>
    %c0_315 = arith.constant 0 : index
    %c0_316 = arith.constant 0 : index
    %512 = vector.load %arg38[%c0_315, %c0_316] : memref<1x32xf32, #tpu.memory_space<vmem>>, vector<1x32xf32>
    %cst_317 = arith.constant dense<0.000000e+00> : vector<32xf32>
    %513 = vector.multi_reduction <add>, %510, %cst_317 [1] : vector<32x32xf32> to vector<32xf32>
    %514 = vector.shape_cast %513 : vector<32xf32> to vector<32x1xf32>
    %cst_318 = arith.constant 3.200000e+01 : f32
    %515 = vector.broadcast %cst_318 : f32 to vector<32x1xf32>
    %516 = arith.divf %514, %515 : vector<32x1xf32>
    %517 = vector.broadcast %516 : vector<32x1xf32> to vector<32x32xf32>
    %518 = arith.subf %510, %517 : vector<32x32xf32>
    %519 = arith.mulf %518, %518 : vector<32x32xf32>
    %cst_319 = arith.constant dense<0.000000e+00> : vector<32xf32>
    %520 = vector.multi_reduction <add>, %519, %cst_319 [1] : vector<32x32xf32> to vector<32xf32>
    %521 = vector.shape_cast %520 : vector<32xf32> to vector<32x1xf32>
    %cst_320 = arith.constant 3.200000e+01 : f32
    %522 = vector.broadcast %cst_320 : f32 to vector<32x1xf32>
    %523 = arith.divf %521, %522 : vector<32x1xf32>
    %524 = vector.broadcast %516 : vector<32x1xf32> to vector<32x32xf32>
    %525 = arith.subf %510, %524 : vector<32x32xf32>
    %cst_321 = arith.constant 9.99999974E-6 : f32
    %526 = vector.broadcast %cst_321 : f32 to vector<32x1xf32>
    %527 = arith.addf %523, %526 : vector<32x1xf32>
    %528 = math.rsqrt %527 : vector<32x1xf32>
    %529 = vector.broadcast %528 : vector<32x1xf32> to vector<32x32xf32>
    %530 = arith.mulf %525, %529 : vector<32x32xf32>
    %531 = vector.broadcast %511 : vector<1x32xf32> to vector<32x32xf32>
    %532 = arith.mulf %530, %531 : vector<32x32xf32>
    %533 = vector.broadcast %512 : vector<1x32xf32> to vector<32x32xf32>
    %534 = arith.addf %532, %533 : vector<32x32xf32>
    %535 = arith.truncf %534 : vector<32x32xf32> to vector<32x32xbf16>
    %c0_322 = arith.constant 0 : index
    %c0_323 = arith.constant 0 : index
    %536 = vector.load %arg39[%c0_322, %c0_323] : memref<32x128xbf16, #tpu.memory_space<vmem>>, vector<32x128xbf16>
    %cst_324 = arith.constant dense<0.000000e+00> : vector<32x128xf32>
    %537 = tpu.matmul %535, %536, %cst_324 {dimension_numbers = #tpu.dot_dimension_numbers<[1], [0], [0], [1], [0, 0, 1, 1], [], []>} : vector<32x32xbf16>, vector<32x128xbf16>, vector<32x128xf32> -> vector<32x128xf32>
    %c0_325 = arith.constant 0 : index
    %c0_326 = arith.constant 0 : index
    %538 = vector.load %arg40[%c0_325, %c0_326] : memref<1x128xf32, #tpu.memory_space<vmem>>, vector<1x128xf32>
    %539 = vector.broadcast %538 : vector<1x128xf32> to vector<32x128xf32>
    %540 = arith.addf %537, %539 : vector<32x128xf32>
    %541 = arith.mulf %540, %540 : vector<32x128xf32>
    %542 = arith.mulf %540, %541 : vector<32x128xf32>
    %cst_327 = arith.constant 4.471500e-02 : f32
    %543 = vector.broadcast %cst_327 : f32 to vector<32x128xf32>
    %544 = arith.mulf %543, %542 : vector<32x128xf32>
    %545 = arith.addf %540, %544 : vector<32x128xf32>
    %cst_328 = arith.constant 0.797884583 : f32
    %546 = vector.broadcast %cst_328 : f32 to vector<32x128xf32>
    %547 = arith.mulf %546, %545 : vector<32x128xf32>
    %548 = math.tanh %547 : vector<32x128xf32>
    %cst_329 = arith.constant 1.000000e+00 : f32
    %549 = vector.broadcast %cst_329 : f32 to vector<32x128xf32>
    %550 = arith.addf %549, %548 : vector<32x128xf32>
    %cst_330 = arith.constant 5.000000e-01 : f32
    %551 = vector.broadcast %cst_330 : f32 to vector<32x128xf32>
    %552 = arith.mulf %551, %550 : vector<32x128xf32>
    %553 = arith.mulf %540, %552 : vector<32x128xf32>
    %554 = arith.truncf %553 : vector<32x128xf32> to vector<32x128xbf16>
    %c0_331 = arith.constant 0 : index
    %c0_332 = arith.constant 0 : index
    %555 = vector.load %arg41[%c0_331, %c0_332] : memref<128x32xbf16, #tpu.memory_space<vmem>>, vector<128x32xbf16>
    %cst_333 = arith.constant dense<0.000000e+00> : vector<32x32xf32>
    %556 = tpu.matmul %554, %555, %cst_333 {dimension_numbers = #tpu.dot_dimension_numbers<[1], [0], [0], [1], [0, 0, 1, 1], [], []>} : vector<32x128xbf16>, vector<128x32xbf16>, vector<32x32xf32> -> vector<32x32xf32>
    %c0_334 = arith.constant 0 : index
    %c0_335 = arith.constant 0 : index
    %557 = vector.load %arg42[%c0_334, %c0_335] : memref<1x32xf32, #tpu.memory_space<vmem>>, vector<1x32xf32>
    %558 = vector.broadcast %557 : vector<1x32xf32> to vector<32x32xf32>
    %559 = arith.addf %556, %558 : vector<32x32xf32>
    %560 = arith.addf %510, %559 : vector<32x32xf32>
    %561 = arith.negf %560 : vector<32x32xf32>
    %562 = math.exp %561 : vector<32x32xf32>
    %cst_336 = arith.constant 1.000000e+00 : f32
    %563 = vector.broadcast %cst_336 : f32 to vector<32x32xf32>
    %564 = arith.addf %563, %562 : vector<32x32xf32>
    %565 = arith.divf %563, %564 : vector<32x32xf32>
    %566 = math.tanh %560 : vector<32x32xf32>
    %567 = arith.addf %32, %566 : vector<32x32xf32>
    %568 = arith.mulf %565, %567 : vector<32x32xf32>
    %569 = math.tanh %568 : vector<32x32xf32>
    %570 = arith.mulf %565, %569 : vector<32x32xf32>
    %c0_337 = arith.constant 0 : index
    %c0_338 = arith.constant 0 : index
    %571 = vector.load %arg43[%c0_337, %c0_338] : memref<32x32xf32, #tpu.memory_space<vmem>>, vector<32x32xf32>
    tpu.vector_store %arg43[%c0_337, %c0_338], %570 {strides = array<i32>} : memref<32x32xf32, #tpu.memory_space<vmem>>, vector<32x32xf32>,
    %c0_339 = arith.constant 0 : index
    %c0_340 = arith.constant 0 : index
    %572 = vector.load %arg44[%c0_339, %c0_340] : memref<32x32xf32, #tpu.memory_space<vmem>>, vector<32x32xf32>
    tpu.vector_store %arg44[%c0_339, %c0_340], %568 {strides = array<i32>} : memref<32x32xf32, #tpu.memory_space<vmem>>, vector<32x32xf32>,
    return
  }
  func.func @transform_0(%arg0: i32) -> (i32, i32) {
    %c0_i32 = arith.constant 0 : i32
    %c0_i32_0 = arith.constant 0 : i32
    %c0_i32_1 = arith.constant 0 : i32
    return %c0_i32, %c0_i32_0 : i32, i32
  }
  func.func @transform_1(%arg0: i32) -> (i32, i32) {
    %c0_i32 = arith.constant 0 : i32
    %c0_i32_0 = arith.constant 0 : i32
    %c0_i32_1 = arith.constant 0 : i32
    return %c0_i32, %c0_i32_0 : i32, i32
  }
  func.func @transform_2(%arg0: i32) -> (i32, i32) {
    %c0_i32 = arith.constant 0 : i32
    %c0_i32_0 = arith.constant 0 : i32
    %c0_i32_1 = arith.constant 0 : i32
    return %c0_i32, %c0_i32_0 : i32, i32
  }
  func.func @transform_3(%arg0: i32) -> (i32, i32) {
    %c0_i32 = arith.constant 0 : i32
    %c0_i32_0 = arith.constant 0 : i32
    %c0_i32_1 = arith.constant 0 : i32
    return %c0_i32, %c0_i32_0 : i32, i32
  }
  func.func @transform_4(%arg0: i32) -> (i32, i32) {
    %c0_i32 = arith.constant 0 : i32
    %c0_i32_0 = arith.constant 0 : i32
    %c0_i32_1 = arith.constant 0 : i32
    return %c0_i32, %c0_i32_0 : i32, i32
  }
  func.func @transform_5(%arg0: i32) -> (i32, i32) {
    %c0_i32 = arith.constant 0 : i32
    %c0_i32_0 = arith.constant 0 : i32
    %c0_i32_1 = arith.constant 0 : i32
    return %c0_i32, %c0_i32_0 : i32, i32
  }
  func.func @transform_6(%arg0: i32) -> (i32, i32) {
    %c0_i32 = arith.constant 0 : i32
    %c0_i32_0 = arith.constant 0 : i32
    %c0_i32_1 = arith.constant 0 : i32
    return %c0_i32, %c0_i32_0 : i32, i32
  }
  func.func @transform_7(%arg0: i32) -> (i32, i32) {
    %c0_i32 = arith.constant 0 : i32
    %c0_i32_0 = arith.constant 0 : i32
    %c0_i32_1 = arith.constant 0 : i32
    return %c0_i32, %c0_i32_0 : i32, i32
  }
  func.func @transform_8(%arg0: i32) -> (i32, i32) {
    %c0_i32 = arith.constant 0 : i32
    %c0_i32_0 = arith.constant 0 : i32
    %c0_i32_1 = arith.constant 0 : i32
    return %c0_i32, %c0_i32_0 : i32, i32
  }
  func.func @transform_9(%arg0: i32) -> (i32, i32) {
    %c0_i32 = arith.constant 0 : i32
    %c0_i32_0 = arith.constant 0 : i32
    %c0_i32_1 = arith.constant 0 : i32
    return %c0_i32, %c0_i32_0 : i32, i32
  }
  func.func @transform_10(%arg0: i32) -> (i32, i32, i32) {
    %c0_i32 = arith.constant 0 : i32
    %c0_i32_0 = arith.constant 0 : i32
    %c0_i32_1 = arith.constant 0 : i32
    %c0_i32_2 = arith.constant 0 : i32
    return %c0_i32, %c0_i32_0, %c0_i32_1 : i32, i32, i32
  }
  func.func @transform_11(%arg0: i32) -> (i32, i32, i32) {
    %c0_i32 = arith.constant 0 : i32
    %c0_i32_0 = arith.constant 0 : i32
    %c0_i32_1 = arith.constant 0 : i32
    %c0_i32_2 = arith.constant 0 : i32
    return %c0_i32, %c0_i32_0, %c0_i32_1 : i32, i32, i32
  }
  func.func @transform_12(%arg0: i32) -> (i32, i32, i32) {
    %c0_i32 = arith.constant 0 : i32
    %c0_i32_0 = arith.constant 0 : i32
    %c0_i32_1 = arith.constant 0 : i32
    %c0_i32_2 = arith.constant 0 : i32
    return %c0_i32, %c0_i32_0, %c0_i32_1 : i32, i32, i32
  }
  func.func @transform_13(%arg0: i32) -> (i32, i32, i32) {
    %c0_i32 = arith.constant 0 : i32
    %c0_i32_0 = arith.constant 0 : i32
    %c0_i32_1 = arith.constant 0 : i32
    %c0_i32_2 = arith.constant 0 : i32
    return %c0_i32, %c0_i32_0, %c0_i32_1 : i32, i32, i32
  }
  func.func @transform_14(%arg0: i32) -> (i32, i32, i32) {
    %c0_i32 = arith.constant 0 : i32
    %c0_i32_0 = arith.constant 0 : i32
    %c0_i32_1 = arith.constant 0 : i32
    %c0_i32_2 = arith.constant 0 : i32
    return %c0_i32, %c0_i32_0, %c0_i32_1 : i32, i32, i32
  }
  func.func @transform_15(%arg0: i32) -> (i32, i32, i32) {
    %c0_i32 = arith.constant 0 : i32
    %c0_i32_0 = arith.constant 0 : i32
    %c0_i32_1 = arith.constant 0 : i32
    %c0_i32_2 = arith.constant 0 : i32
    return %c0_i32, %c0_i32_0, %c0_i32_1 : i32, i32, i32
  }
  func.func @transform_16(%arg0: i32) -> (i32, i32, i32) {
    %c0_i32 = arith.constant 0 : i32
    %c0_i32_0 = arith.constant 0 : i32
    %c0_i32_1 = arith.constant 0 : i32
    %c0_i32_2 = arith.constant 0 : i32
    return %c0_i32, %c0_i32_0, %c0_i32_1 : i32, i32, i32
  }
  func.func @transform_17(%arg0: i32) -> (i32, i32) {
    %c0_i32 = arith.constant 0 : i32
    %c0_i32_0 = arith.constant 0 : i32
    %c0_i32_1 = arith.constant 0 : i32
    return %c0_i32, %c0_i32_0 : i32, i32
  }
  func.func @transform_18(%arg0: i32) -> (i32, i32) {
    %c0_i32 = arith.constant 0 : i32
    %c0_i32_0 = arith.constant 0 : i32
    %c0_i32_1 = arith.constant 0 : i32
    return %c0_i32, %c0_i32_0 : i32, i32
  }
  func.func @transform_19(%arg0: i32) -> (i32, i32) {
    %c0_i32 = arith.constant 0 : i32
    %c0_i32_0 = arith.constant 0 : i32
    %c0_i32_1 = arith.constant 0 : i32
    return %c0_i32, %c0_i32_0 : i32, i32
  }
  func.func @transform_20(%arg0: i32) -> (i32, i32) {
    %c0_i32 = arith.constant 0 : i32
    %c0_i32_0 = arith.constant 0 : i32
    %c0_i32_1 = arith.constant 0 : i32
    return %c0_i32, %c0_i32_0 : i32, i32
  }
  func.func @transform_21(%arg0: i32) -> (i32, i32) {
    %c0_i32 = arith.constant 0 : i32
    %c0_i32_0 = arith.constant 0 : i32
    %c0_i32_1 = arith.constant 0 : i32
    return %c0_i32, %c0_i32_0 : i32, i32
  }
  func.func @transform_22(%arg0: i32) -> (i32, i32) {
    %c0_i32 = arith.constant 0 : i32
    %c0_i32_0 = arith.constant 0 : i32
    %c0_i32_1 = arith.constant 0 : i32
    return %c0_i32, %c0_i32_0 : i32, i32
  }
  func.func @transform_23(%arg0: i32) -> (i32, i32) {
    %c0_i32 = arith.constant 0 : i32
    %c0_i32_0 = arith.constant 0 : i32
    %c0_i32_1 = arith.constant 0 : i32
    return %c0_i32, %c0_i32_0 : i32, i32
  }
  func.func @transform_24(%arg0: i32) -> (i32, i32) {
    %c0_i32 = arith.constant 0 : i32
    %c0_i32_0 = arith.constant 0 : i32
    %c0_i32_1 = arith.constant 0 : i32
    return %c0_i32, %c0_i32_0 : i32, i32
  }
  func.func @transform_25(%arg0: i32) -> (i32, i32) {
    %c0_i32 = arith.constant 0 : i32
    %c0_i32_0 = arith.constant 0 : i32
    %c0_i32_1 = arith.constant 0 : i32
    return %c0_i32, %c0_i32_0 : i32, i32
  }
  func.func @transform_26(%arg0: i32) -> (i32, i32) {
    %c0_i32 = arith.constant 0 : i32
    %c0_i32_0 = arith.constant 0 : i32
    %c0_i32_1 = arith.constant 0 : i32
    return %c0_i32, %c0_i32_0 : i32, i32
  }
  func.func @transform_27(%arg0: i32) -> (i32, i32, i32) {
    %c0_i32 = arith.constant 0 : i32
    %c0_i32_0 = arith.constant 0 : i32
    %c0_i32_1 = arith.constant 0 : i32
    %c0_i32_2 = arith.constant 0 : i32
    return %c0_i32, %c0_i32_0, %c0_i32_1 : i32, i32, i32
  }
  func.func @transform_28(%arg0: i32) -> (i32, i32, i32) {
    %c0_i32 = arith.constant 0 : i32
    %c0_i32_0 = arith.constant 0 : i32
    %c0_i32_1 = arith.constant 0 : i32
    %c0_i32_2 = arith.constant 0 : i32
    return %c0_i32, %c0_i32_0, %c0_i32_1 : i32, i32, i32
  }
  func.func @transform_29(%arg0: i32) -> (i32, i32, i32) {
    %c0_i32 = arith.constant 0 : i32
    %c0_i32_0 = arith.constant 0 : i32
    %c0_i32_1 = arith.constant 0 : i32
    %c0_i32_2 = arith.constant 0 : i32
    return %c0_i32, %c0_i32_0, %c0_i32_1 : i32, i32, i32
  }
  func.func @transform_30(%arg0: i32) -> (i32, i32, i32) {
    %c0_i32 = arith.constant 0 : i32
    %c0_i32_0 = arith.constant 0 : i32
    %c0_i32_1 = arith.constant 0 : i32
    %c0_i32_2 = arith.constant 0 : i32
    return %c0_i32, %c0_i32_0, %c0_i32_1 : i32, i32, i32
  }
  func.func @transform_31(%arg0: i32) -> (i32, i32, i32) {
    %c0_i32 = arith.constant 0 : i32
    %c0_i32_0 = arith.constant 0 : i32
    %c0_i32_1 = arith.constant 0 : i32
    %c0_i32_2 = arith.constant 0 : i32
    return %c0_i32, %c0_i32_0, %c0_i32_1 : i32, i32, i32
  }
  func.func @transform_32(%arg0: i32) -> (i32, i32, i32) {
    %c0_i32 = arith.constant 0 : i32
    %c0_i32_0 = arith.constant 0 : i32
    %c0_i32_1 = arith.constant 0 : i32
    %c0_i32_2 = arith.constant 0 : i32
    return %c0_i32, %c0_i32_0, %c0_i32_1 : i32, i32, i32
  }
  func.func @transform_33(%arg0: i32) -> (i32, i32, i32) {
    %c0_i32 = arith.constant 0 : i32
    %c0_i32_0 = arith.constant 0 : i32
    %c0_i32_1 = arith.constant 0 : i32
    %c0_i32_2 = arith.constant 0 : i32
    return %c0_i32, %c0_i32_0, %c0_i32_1 : i32, i32, i32
  }
  func.func @transform_34(%arg0: i32) -> (i32, i32) {
    %c0_i32 = arith.constant 0 : i32
    %c0_i32_0 = arith.constant 0 : i32
    %c0_i32_1 = arith.constant 0 : i32
    return %c0_i32, %c0_i32_0 : i32, i32
  }
  func.func @transform_35(%arg0: i32) -> (i32, i32) {
    %c0_i32 = arith.constant 0 : i32
    %c0_i32_0 = arith.constant 0 : i32
    %c0_i32_1 = arith.constant 0 : i32
    return %c0_i32, %c0_i32_0 : i32, i32
  }
  func.func @transform_36(%arg0: i32) -> (i32, i32) {
    %c0_i32 = arith.constant 0 : i32
    %c0_i32_0 = arith.constant 0 : i32
    %c0_i32_1 = arith.constant 0 : i32
    return %c0_i32, %c0_i32_0 : i32, i32
  }
  func.func @transform_37(%arg0: i32) -> (i32, i32) {
    %c0_i32 = arith.constant 0 : i32
    %c0_i32_0 = arith.constant 0 : i32
    %c0_i32_1 = arith.constant 0 : i32
    return %c0_i32, %c0_i32_0 : i32, i32
  }
  func.func @transform_38(%arg0: i32) -> (i32, i32) {
    %c0_i32 = arith.constant 0 : i32
    %c0_i32_0 = arith.constant 0 : i32
    %c0_i32_1 = arith.constant 0 : i32
    return %c0_i32, %c0_i32_0 : i32, i32
  }
  func.func @transform_39(%arg0: i32) -> (i32, i32) {
    %c0_i32 = arith.constant 0 : i32
    %c0_i32_0 = arith.constant 0 : i32
    %c0_i32_1 = arith.constant 0 : i32
    return %c0_i32, %c0_i32_0 : i32, i32
  }
  func.func @transform_40(%arg0: i32) -> (i32, i32) {
    %c0_i32 = arith.constant 0 : i32
    %c0_i32_0 = arith.constant 0 : i32
    %c0_i32_1 = arith.constant 0 : i32
    return %c0_i32, %c0_i32_0 : i32, i32
  }
  func.func @transform_41(%arg0: i32) -> (i32, i32) {
    %c0_i32 = arith.constant 0 : i32
    %c0_i32_0 = arith.constant 0 : i32
    %c0_i32_1 = arith.constant 0 : i32
    return %c0_i32, %c0_i32_0 : i32, i32
  }
  func.func @transform_42(%arg0: i32) -> (i32, i32) {
    %c0_i32 = arith.constant 0 : i32
    %c0_i32_0 = arith.constant 0 : i32
    %c0_i32_1 = arith.constant 0 : i32
    return %c0_i32, %c0_i32_0 : i32, i32
  }
  func.func @transform_43(%arg0: i32) -> (i32, i32) {
    %c0_i32 = arith.constant 0 : i32
    %c0_i32_0 = arith.constant 0 : i32
    %c0_i32_1 = arith.constant 0 : i32
    return %c0_i32, %c0_i32_0 : i32, i32
  }
}

</mosaic_0001>

<bundles_post_ra>
// kernel: _lambda_.3
= control target key start
LH: loop header
LB: loop body
LE: loop exit
PB: predicated region body
PF: predicated region fallthrough
CT: control target
= control target key end

     0   :  { %v724_v36 = vmov 1983009808   ;;  %v20_v38 = vlaneseq  ;;  %s951_s1 = inlined_call_operand.vmem [shape: bf16[512,256], index: 1, kind: input, shape index: {}]   ;;  %s952_s0 = inlined_call_operand.vmem [shape: f32[2,512], index: 0, kind: input, shape index: {}]   ;;  %s953_s2 = inlined_call_operand.vmem [shape: f32[1,256], index: 2, kind: input, shape index: {}]   ;;  %s954_s3 = inlined_call_operand.vmem [shape: f32[2,256], index: 3, kind: output, shape index: {}]  }
   0x1   :  { %v619_v0 = vld [vmem:[%s951_s1 + $0x4] ss:$8 sps:$4 sm:$0xff]   ;;  %v623_v2 = vld [vmem:[%s951_s1] ss:$8 sps:$4 sm:$0xff]   ;;  %v625_v4 = vld [vmem:[%s951_s1 + $0x14] ss:$8 sps:$4 sm:$0xff]   ;;  %v18_v37 = vunpack.c.l.s4 %v724_v36 }
   0x2   :  { %v621_v1 = vld [vmem:[%s951_s1 + $0x104] ss:$8 sps:$4 sm:$0xff]   ;;  %437 = vmatprep.subr.bf16.mxu1 %v619_v0  ;;  %v624_v3 = vld [vmem:[%s951_s1 + $0x100] ss:$8 sps:$4 sm:$0xff]   ;;  %v627_v5 = vld [vmem:[%s951_s1 + $0x114] ss:$8 sps:$4 sm:$0xff]  }
   0x3   :  { %478 = vmatprep.subr.bf16.mxu0 %v621_v1  ;;  %438 = vmatpush1.bf16.msra.mxu1 %v623_v2  ;;  %v629_v6 = vld [vmem:[%s951_s1 + $0x10] ss:$8 sps:$4 sm:$0xff]   ;;  %v631_v8 = vld [vmem:[%s951_s1 + $0x24] ss:$8 sps:$4 sm:$0xff]   ;;  %v635_v10 = vld [vmem:[%s951_s1 + $0x20] ss:$8 sps:$4 sm:$0xff]   ;;  %v19_v42 = vunpack.c.0.s8 %v18_v37 }
   0x4   :  { %479 = vmatpush1.bf16.msra.mxu0 %v624_v3  ;;  %439 = vmatprep.subr.bf16.mxu1 %v625_v4  ;;  %v630_v7 = vld [vmem:[%s951_s1 + $0x110] ss:$8 sps:$4 sm:$0xff]   ;;  %v633_v9 = vld [vmem:[%s951_s1 + $0x124] ss:$8 sps:$4 sm:$0xff]   ;;  %v636_v11 = vld [vmem:[%s951_s1 + $0x120] ss:$8 sps:$4 sm:$0xff]  }
   0x5   :  { %480 = vmatprep.subr.bf16.mxu0 %v627_v5  ;;  %v637_v12 = vld [vmem:[%s951_s1 + $0x34] ss:$8 sps:$4 sm:$0xff]   ;;  %v641_v14 = vld [vmem:[%s951_s1 + $0x30] ss:$8 sps:$4 sm:$0xff]   ;;  %v643_v16 = vld [vmem:[%s951_s1 + $0x44] ss:$8 sps:$4 sm:$0xff]  }
   0x6   :  { %v639_v13 = vld [vmem:[%s951_s1 + $0x134] ss:$8 sps:$4 sm:$0xff]   ;;  %v642_v15 = vld [vmem:[%s951_s1 + $0x130] ss:$8 sps:$4 sm:$0xff]   ;;  %v645_v17 = vld [vmem:[%s951_s1 + $0x144] ss:$8 sps:$4 sm:$0xff]  }
   0x7   :  { %440 = vmatpush1.bf16.msra.mxu1 %v629_v6  ;;  %v647_v18 = vld [vmem:[%s951_s1 + $0x40] ss:$8 sps:$4 sm:$0xff]   ;;  %v649_v20 = vld [vmem:[%s951_s1 + $0x54] ss:$8 sps:$4 sm:$0xff]   ;;  %v653_v22 = vld [vmem:[%s951_s1 + $0x50] ss:$8 sps:$4 sm:$0xff]  }
   0x8   :  { %481 = vmatpush1.bf16.msra.mxu0 %v630_v7  ;;  %441 = vmatprep.subr.bf16.mxu1 %v631_v8  ;;  %v648_v19 = vld [vmem:[%s951_s1 + $0x140] ss:$8 sps:$4 sm:$0xff]   ;;  %v651_v21 = vld [vmem:[%s951_s1 + $0x154] ss:$8 sps:$4 sm:$0xff]   ;;  %v654_v23 = vld [vmem:[%s951_s1 + $0x150] ss:$8 sps:$4 sm:$0xff]  }
   0x9   :  { %482 = vmatprep.subr.bf16.mxu0 %v633_v9  ;;  %v655_v24 = vld [vmem:[%s951_s1 + $0x64] ss:$8 sps:$4 sm:$0xff]   ;;  %v659_v26 = vld [vmem:[%s951_s1 + $0x60] ss:$8 sps:$4 sm:$0xff]   ;;  %v661_v28 = vld [vmem:[%s951_s1 + $0x74] ss:$8 sps:$4 sm:$0xff]  }
   0xa   :  { %v657_v25 = vld [vmem:[%s951_s1 + $0x164] ss:$8 sps:$4 sm:$0xff]   ;;  %v660_v27 = vld [vmem:[%s951_s1 + $0x160] ss:$8 sps:$4 sm:$0xff]   ;;  %v663_v29 = vld [vmem:[%s951_s1 + $0x174] ss:$8 sps:$4 sm:$0xff]  }
   0xb   :  { %442 = vmatpush1.bf16.msra.mxu1 %v635_v10  ;;  %v665_v30 = vld [vmem:[%s951_s1 + $0x70] ss:$8 sps:$4 sm:$0xff]   ;;  %v667_v32 = vld [vmem:[%s951_s1 + $0x84] ss:$8 sps:$4 sm:$0xff]   ;;  %v671_v34 = vld [vmem:[%s951_s1 + $0x80] ss:$8 sps:$4 sm:$0xff]  }
   0xc   :  { %483 = vmatpush1.bf16.msra.mxu0 %v636_v11  ;;  %443 = vmatprep.subr.bf16.mxu1 %v637_v12  ;;  %v666_v31 = vld [vmem:[%s951_s1 + $0x170] ss:$8 sps:$4 sm:$0xff]   ;;  %v669_v33 = vld [vmem:[%s951_s1 + $0x184] ss:$8 sps:$4 sm:$0xff]   ;;  %v672_v35 = vld [vmem:[%s951_s1 + $0x180] ss:$8 sps:$4 sm:$0xff]  }
   0xd   :  { %484 = vmatprep.subr.bf16.mxu0 %v639_v13  ;;  %v673_v39 = vld [vmem:[%s951_s1 + $0x94] ss:$8 sps:$4 sm:$0xff]   ;;  %v677_v41 = vld [vmem:[%s951_s1 + $0x90] ss:$8 sps:$4 sm:$0xff]   ;;  %v862_v43 = vshrl.u32 %v20_v38, 7  ;;  %v14_v52 = vld [vmem:[%s952_s0] sm:$0xff] }
   0xe   :  { %v675_v40 = vld [vmem:[%s951_s1 + $0x194] ss:$8 sps:$4 sm:$0xff]   ;;  %v678_v44 = vld [vmem:[%s951_s1 + $0x190] ss:$8 sps:$4 sm:$0xff]   ;;  %v679_v45 = vld [vmem:[%s951_s1 + $0xa4] ss:$8 sps:$4 sm:$0xff]   ;;  %v16_v54 = vcombine.high %v14_v52, %v14_v52 }
   0xf   :  { %444 = vmatpush1.bf16.msra.mxu1 %v641_v14  ;;  %v681_v46 = vld [vmem:[%s951_s1 + $0x1a4] ss:$8 sps:$4 sm:$0xff]   ;;  %v683_v47 = vld [vmem:[%s951_s1 + $0xa0] ss:$8 sps:$4 sm:$0xff]   ;;  %v22_v49 = vsub.s32 %v19_v42, %v862_v43  ;;  %v685_v50 = vld [vmem:[%s951_s1 + $0xb4] ss:$8 sps:$4 sm:$0xff]  }
  0x10   :  { %485 = vmatpush1.bf16.msra.mxu0 %v642_v15  ;;  %445 = vmatprep.subr.bf16.mxu1 %v643_v16  ;;  %v684_v48 = vld [vmem:[%s951_s1 + $0x1a0] ss:$8 sps:$4 sm:$0xff]   ;;  %v687_v51 = vld [vmem:[%s951_s1 + $0x1b4] ss:$8 sps:$4 sm:$0xff]   ;;  %v689_v55 = vld [vmem:[%s951_s1 + $0xb0] ss:$8 sps:$4 sm:$0xff]  }
  0x11   :  { %486 = vmatprep.subr.bf16.mxu0 %v645_v17  ;;  %v23_v53 = vrot.slane %v14_v52, %v22_v49  ;;  %v690_v56 = vld [vmem:[%s951_s1 + $0x1b0] ss:$8 sps:$4 sm:$0xff]   ;;  %v691_v57 = vld [vmem:[%s951_s1 + $0xc4] ss:$8 sps:$4 sm:$0xff]   ;;  %v30_v60 = vrot.slane %v16_v54, %v22_v49  ;;  %v695_v63 = vld [vmem:[%s951_s1 + $0xc0] ss:$8 sps:$4 sm:$0xff]  }
  0x12   :  { %v693_v58 = vld [vmem:[%s951_s1 + $0x1c4] ss:$8 sps:$4 sm:$0xff]   ;;  %v696_v0 = vld [vmem:[%s951_s1 + $0x1c0] ss:$8 sps:$4 sm:$0xff]   ;;  %v697_v1 = vld [vmem:[%s951_s1 + $0xd4] ss:$8 sps:$4 sm:$0xff]  }
  0x13   :  { %446 = vmatpush1.bf16.msra.mxu1 %v647_v18  ;;  %v31_v59 = vcombine.high %v23_v53, %v23_v53  ;;  %v32_v62 = vcombine.high %v30_v60, %v30_v60  ;;  %v699_v2 = vld [vmem:[%s951_s1 + $0x1d4] ss:$8 sps:$4 sm:$0xff]   ;;  %v701_v4 = vld [vmem:[%s951_s1 + $0xd0] ss:$8 sps:$4 sm:$0xff]   ;;  %v703_v6 = vld [vmem:[%s951_s1 + $0xe4] ss:$8 sps:$4 sm:$0xff]   ;;  %v37_v14 = vpack.c.bf16 %v23_v53, %v23_v53  ;;  %v39_v15 = vpack.c.bf16 %v30_v60, %v30_v60 }
  0x14   :  { %487 = vmatpush1.bf16.msra.mxu0 %v648_v19  ;;  %447 = vmatprep.subr.bf16.mxu1 %v649_v20  ;;  %v702_v5 = vld [vmem:[%s951_s1 + $0x1d0] ss:$8 sps:$4 sm:$0xff]   ;;  %v705_v7 = vld [vmem:[%s951_s1 + $0x1e4] ss:$8 sps:$4 sm:$0xff]   ;;  %v707_v8 = vld [vmem:[%s951_s1 + $0xe0] ss:$8 sps:$4 sm:$0xff]  }
  0x15   :  { %488 = vmatprep.subr.bf16.mxu0 %v651_v21  ;;  %v38_v61 = vpack.c.bf16 %v31_v59, %v31_v59  ;;  %v40_v3 = vpack.c.bf16 %v32_v62, %v32_v62  ;;  %v708_v9 = vld [vmem:[%s951_s1 + $0x1e0] ss:$8 sps:$4 sm:$0xff]   ;;  %v709_v10 = vld [vmem:[%s951_s1 + $0xf4] ss:$8 sps:$4 sm:$0xff]   ;;  %v713_v12 = vld [vmem:[%s951_s1 + $0xf0] ss:$8 sps:$4 sm:$0xff]  }
  0x16   :  { %v711_v11 = vld [vmem:[%s951_s1 + $0x1f4] ss:$8 sps:$4 sm:$0xff]   ;;  %v714_v13 = vld [vmem:[%s951_s1 + $0x1f0] ss:$8 sps:$4 sm:$0xff]   ;;  %v109_v16 = vsub.s32 0, %v862_v43  ;;  %v113_v18 = vsub.s32 1, %v862_v43 }
  0x17   :  { %448 = vmatpush1.bf16.msra.mxu1 %v653_v22  ;;  %469 = vmatprep.mubr.bf16.mxu1 %v38_v61  ;;  %v105_v17 = vld [vmem:[%s953_s2] sm:$0x3] }
  0x18   :  { %489 = vmatpush1.bf16.msra.mxu0 %v654_v23  ;;  %449 = vmatprep.subr.bf16.mxu1 %v655_v24  ;;  %v110_v19 = vrot.slane %v105_v17, %v109_v16  ;;  %v114_v20 = vrot.slane %v105_v17, %v113_v18 }
  0x19   :  { %490 = vmatprep.subr.bf16.mxu0 %v657_v25  ;;  %510 = vmatprep.mubr.bf16.mxu0 %v40_v3 }
  0x1b   :  { %450 = vmatpush1.bf16.msra.mxu1 %v659_v26 }
  0x1c   :  { %491 = vmatpush1.bf16.msra.mxu0 %v660_v27  ;;  %451 = vmatprep.subr.bf16.mxu1 %v661_v28 }
  0x1d   :  { %492 = vmatprep.subr.bf16.mxu0 %v663_v29 }
  0x1f   :  { %452 = vmatpush1.bf16.msra.mxu1 %v665_v30 }
  0x20   :  { %493 = vmatpush1.bf16.msra.mxu0 %v666_v31  ;;  %453 = vmatprep.subr.bf16.mxu1 %v667_v32 }
  0x21   :  { %494 = vmatprep.subr.bf16.mxu0 %v669_v33 }
  0x23   :  { %454 = vmatpush1.bf16.msra.mxu1 %v671_v34 }
  0x24   :  { %495 = vmatpush1.bf16.msra.mxu0 %v672_v35  ;;  %455 = vmatprep.subr.bf16.mxu1 %v673_v39 }
  0x25   :  { %496 = vmatprep.subr.bf16.mxu0 %v675_v40 }
  0x27   :  { %456 = vmatpush1.bf16.msra.mxu1 %v677_v41 }
  0x28   :  { %497 = vmatpush1.bf16.msra.mxu0 %v678_v44  ;;  %457 = vmatprep.subr.bf16.mxu1 %v679_v45 }
  0x29   :  { %498 = vmatprep.subr.bf16.mxu0 %v681_v46 }
  0x2b   :  { %458 = vmatpush1.bf16.msra.mxu1 %v683_v47 }
  0x2c   :  { %499 = vmatpush1.bf16.msra.mxu0 %v684_v48  ;;  %459 = vmatprep.subr.bf16.mxu1 %v685_v50 }
  0x2d   :  { %500 = vmatprep.subr.bf16.mxu0 %v687_v51 }
  0x2f   :  { %460 = vmatpush1.bf16.msra.mxu1 %v689_v55 }
  0x30   :  { %501 = vmatpush1.bf16.msra.mxu0 %v690_v56  ;;  %461 = vmatprep.subr.bf16.mxu1 %v691_v57 }
  0x31   :  { %502 = vmatprep.subr.bf16.mxu0 %v693_v58 }
  0x33   :  { %462 = vmatpush1.bf16.msra.mxu1 %v695_v63 }
  0x34   :  { %503 = vmatpush1.bf16.msra.mxu0 %v696_v0  ;;  %463 = vmatprep.subr.bf16.mxu1 %v697_v1 }
  0x35   :  { %504 = vmatprep.subr.bf16.mxu0 %v699_v2 }
  0x37   :  { %464 = vmatpush1.bf16.msra.mxu1 %v701_v4 }
  0x38   :  { %505 = vmatpush1.bf16.msra.mxu0 %v702_v5  ;;  %465 = vmatprep.subr.bf16.mxu1 %v703_v6 }
  0x39   :  { %506 = vmatprep.subr.bf16.mxu0 %v705_v7 }
  0x3b   :  { %466 = vmatpush1.bf16.msra.mxu1 %v707_v8 }
  0x3c   :  { %507 = vmatpush1.bf16.msra.mxu0 %v708_v9  ;;  %467 = vmatprep.subr.bf16.mxu1 %v709_v10 }
  0x3d   :  { %508 = vmatprep.subr.bf16.mxu0 %v711_v11 }
  0x3f   :  { %468 = vmatpush1.bf16.msra.mxu1 %v713_v12 }
  0x40   :  { %509 = vmatpush1.bf16.msra.mxu0 %v714_v13 }
  0x42   :  { %470 = vmatmul.mubr.bf16.vlgmr.msra.gmra.mrb[0].mxu1 %v37_v14 }
  0x43   :  { %511 = vmatmul.mubr.bf16.vlgmr.msra.gmra.mrb[0].mxu0 %v39_v15 }
 0x115   :  { %v471_v21 = vpop.f32.mrb[0].mxu1 }
 0x116   :  { %v512_v22 = vpop.f32.mrb[0].mxu0  ;;  %v472_v23 = vadd.f32 %v471_v21, %v110_v19  ;;  %v473_v24 = vpop.f32.mrb[1].mxu1 }
 0x117   :  { %v514_v25 = vpop.f32.mrb[1].mxu0  ;;  %v474_v26 = vadd.f32 %v473_v24, %v114_v20  ;;  %v475_v27 = vpop.f32.mrb[2].mxu1 }
 0x118   :  { %v516_v28 = vpop.f32.mrb[2].mxu0  ;;  %v513_v29 = vadd.f32 %v512_v22, %v472_v23  ;;  %v476_v30 = vpop.f32.mrb[3].mxu1 }
 0x119   :  { %v517_v31 = vpop.f32.mrb[3].mxu0  ;;  %v515_v32 = vadd.f32 %v514_v25, %v474_v26 }
 0x11a   :  { %v611_v33 = vmul.f32 -1.442695, %v513_v29 }
 0x11b   :  { %v612_v34 = vmul.f32 -1.442695, %v515_v32 }
 0x11c   :  { %716 = vpow2.f32 %v611_v33 }
 0x11d   :  { %718 = vpow2.f32 %v612_v34 }
 0x126   :  { %v717_v35 = vpop.eup %716 }
 0x127   :  { %v719_v36 = vpop.eup %718  ;;  %v525_v37 = vadd.f32 1.0, %v717_v35 }
 0x128   :  { %v526_v38 = vadd.f32 1.0, %v719_v36 }
 0x129   :  { %720 = vrcp.f32 %v525_v37 }
 0x12a   :  { %722 = vrcp.f32 %v526_v38 }
 0x133   :  { %v721_v39 = vpop.eup %720 }
 0x134   :  { %v723_v40 = vpop.eup %722 }
 0x135   :  { %v533_v41 = vcombine.low %v721_v39, %v723_v40 }
 0x137   :  { %613 = vst.sshfl [vmem:[%s954_s3] sm:$0x33 pattern:$0x76325410] %v533_v41 }

// kernel: _lambda_.2
= control target key start
LH: loop header
LB: loop body
LE: loop exit
PB: predicated region body
PF: predicated region fallthrough
CT: control target
= control target key end

     0   :  { %s6356_s6 = smov 1   ;;  %s6357_s10 = smov 2   ;;  %s7300_s0 = inlined_call_operand.smem [shape: u32[44], index: -1, kind: input, shape index: {}] }
   0x1   :  { %s6414_s5 = sld [smem:[%s7300_s0]]   ;;  %s6358_s14 = smov 3  }
   0x2   :  { %s6419_s9 = sld [smem:[%s7300_s0 + %s6356_s6]]   ;;  %s6359_s18 = smov 4  }
   0x3   :  { %s6424_s13 = sld [smem:[%s7300_s0 + %s6357_s10]]   ;;  %s6360_s22 = smov 5  }
   0x4   :  { %s6429_s17 = sld [smem:[%s7300_s0 + %s6358_s14]]   ;;  %s6361_s26 = smov 6  }
   0x5   :  { %s6434_s21 = sld [smem:[%s7300_s0 + %s6359_s18]]   ;;  %s6362_s30 = smov 7  }
   0x6   :  { %s6439_s25 = sld [smem:[%s7300_s0 + %s6360_s22]]   ;;  %s6363_s4 = smov 8  }
   0x7   :  { %s6444_s29 = sld [smem:[%s7300_s0 + %s6361_s26]]   ;;  %s6364_s10 = smov 9  }
   0x8   :  { %s6449_s3 = sld [smem:[%s7300_s0 + %s6362_s30]]   ;;  %s6365_s15 = smov 10  }
   0x9   :  { %s6454_s8 = sld [smem:[%s7300_s0 + %s6363_s4]]   ;;  %s6366_s20 = smov 11  }
   0xa   :  { %s6459_s14 = sld [smem:[%s7300_s0 + %s6364_s10]]   ;;  %s6367_s26 = smov 12  }
   0xb   :  { %s6464_s19 = sld [smem:[%s7300_s0 + %s6365_s15]]   ;;  %s6368_s1 = smov 13  }
   0xc   :  { %s6469_s24 = sld [smem:[%s7300_s0 + %s6366_s20]]   ;;  %s6369_s7 = smov 14  }
   0xd   :  { %s6474_s30 = sld [smem:[%s7300_s0 + %s6367_s26]]   ;;  %s6370_s15 = smov 15  }
   0xe   :  { %s6479_s6 = sld [smem:[%s7300_s0 + %s6368_s1]]   ;;  %s6371_s22 = smov 16  }
   0xf   :  { %s6484_s12 = sld [smem:[%s7300_s0 + %s6369_s7]]   ;;  %s6372_s28 = smov 17  }
  0x10   :  { %s6489_s20 = sld [smem:[%s7300_s0 + %s6370_s15]]   ;;  %s6373_s7 = smov 18  }
  0x11   :  { %s6494_s27 = sld [smem:[%s7300_s0 + %s6371_s22]]   ;;  %s6374_s15 = smov 19  }
  0x12   :  { %s6499_s4 = sld [smem:[%s7300_s0 + %s6372_s28]]   ;;  %s6375_s22 = smov 20  }
  0x13   :  { %s6376_s28 = smov 21   ;;  %s6397_s10 = smov 42  }
  0x14   :  { %s6398_s16 = smov 43  }
  0x15   :  { %7316 = sst [smem:[#allocation8_spill]] %s6484_s12 }
  0x16   :  { %7317 = sst [smem:[#allocation9_spill]] %s6489_s20 }
  0x17   :  { %7318 = sst [smem:[#allocation10_spill]] %s6494_s27 }
  0x18   :  { %7319 = sst [smem:[#allocation11_spill]] %s6499_s4 }
  0x19   :  { %s6504_s12 = sld [smem:[%s7300_s0 + %s6373_s7]]   ;;  %s6377_s7 = smov 22  }
  0x1a   :  { %s6509_s20 = sld [smem:[%s7300_s0 + %s6374_s15]]   ;;  %s6378_s15 = smov 23  }
  0x1b   :  { %s6514_s27 = sld [smem:[%s7300_s0 + %s6375_s22]]   ;;  %s6379_s22 = smov 24  }
  0x1c   :  { %s6519_s4 = sld [smem:[%s7300_s0 + %s6376_s28]]   ;;  %s6380_s28 = smov 25  }
  0x1f   :  { %7320 = sst [smem:[#allocation12_spill]] %s6504_s12 }
  0x20   :  { %7321 = sst [smem:[#allocation13_spill]] %s6509_s20 }
  0x21   :  { %7322 = sst [smem:[#allocation14_spill]] %s6514_s27 }
  0x22   :  { %7323 = sst [smem:[#allocation15_spill]] %s6519_s4 }
  0x23   :  { %s6524_s12 = sld [smem:[%s7300_s0 + %s6377_s7]]   ;;  %s6381_s7 = smov 26  }
  0x24   :  { %s6529_s20 = sld [smem:[%s7300_s0 + %s6378_s15]]   ;;  %s6382_s15 = smov 27  }
  0x25   :  { %s6534_s27 = sld [smem:[%s7300_s0 + %s6379_s22]]   ;;  %s6383_s22 = smov 28  }
  0x26   :  { %s6539_s4 = sld [smem:[%s7300_s0 + %s6380_s28]]   ;;  %s6384_s28 = smov 29  }
  0x29   :  { %7324 = sst [smem:[#allocation16_spill]] %s6524_s12 }
  0x2a   :  { %7325 = sst [smem:[#allocation17_spill]] %s6529_s20 }
  0x2b   :  { %7326 = sst [smem:[#allocation18_spill]] %s6534_s27 }
  0x2c   :  { %7327 = sst [smem:[#allocation19_spill]] %s6539_s4 }
  0x2d   :  { %s6544_s12 = sld [smem:[%s7300_s0 + %s6381_s7]]   ;;  %s6385_s7 = smov 30  }
  0x2e   :  { %s6549_s20 = sld [smem:[%s7300_s0 + %s6382_s15]]   ;;  %s6386_s15 = smov 31  }
  0x2f   :  { %s6554_s27 = sld [smem:[%s7300_s0 + %s6383_s22]]   ;;  %s6387_s22 = smov 32  }
  0x30   :  { %s6559_s4 = sld [smem:[%s7300_s0 + %s6384_s28]]   ;;  %s6388_s28 = smov 33  }
  0x33   :  { %7328 = sst [smem:[#allocation20_spill]] %s6544_s12 }
  0x34   :  { %7329 = sst [smem:[#allocation21_spill]] %s6549_s20 }
  0x35   :  { %7330 = sst [smem:[#allocation22_spill]] %s6554_s27 }
  0x36   :  { %7331 = sst [smem:[#allocation23_spill]] %s6559_s4 }
  0x37   :  { %s6564_s12 = sld [smem:[%s7300_s0 + %s6385_s7]]   ;;  %s6389_s7 = smov 34  }
  0x38   :  { %s6569_s20 = sld [smem:[%s7300_s0 + %s6386_s15]]   ;;  %s6390_s15 = smov 35  }
  0x39   :  { %s6574_s27 = sld [smem:[%s7300_s0 + %s6387_s22]]   ;;  %s6391_s22 = smov 36  }
  0x3a   :  { %s6579_s4 = sld [smem:[%s7300_s0 + %s6388_s28]]   ;;  %s6392_s28 = smov 37  }
  0x3d   :  { %7332 = sst [smem:[#allocation24_spill]] %s6564_s12 }
  0x3e   :  { %7333 = sst [smem:[#allocation25_spill]] %s6569_s20 }
  0x3f   :  { %7334 = sst [smem:[#allocation26_spill]] %s6574_s27 }
  0x40   :  { %7335 = sst [smem:[#allocation27_spill]] %s6579_s4 }
  0x41   :  { %s6584_s12 = sld [smem:[%s7300_s0 + %s6389_s7]]   ;;  %s6393_s7 = smov 38  }
  0x42   :  { %s6589_s20 = sld [smem:[%s7300_s0 + %s6390_s15]]   ;;  %s6394_s15 = smov 39  }
  0x43   :  { %s6594_s27 = sld [smem:[%s7300_s0 + %s6391_s22]]   ;;  %s6395_s22 = smov 40  }
  0x44   :  { %s6599_s4 = sld [smem:[%s7300_s0 + %s6392_s28]]   ;;  %s6396_s28 = smov 41  }
  0x47   :  { %7336 = sst [smem:[#allocation28_spill]] %s6584_s12 }
  0x48   :  { %7337 = sst [smem:[#allocation29_spill]] %s6589_s20 }
  0x49   :  { %7338 = sst [smem:[#allocation30_spill]] %s6594_s27 }
  0x4a   :  { %7339 = sst [smem:[#allocation31_spill]] %s6599_s4 }
  0x4b   :  { %s6604_s12 = sld [smem:[%s7300_s0 + %s6393_s7]]  }
  0x4c   :  { %s6609_s20 = sld [smem:[%s7300_s0 + %s6394_s15]]  }
  0x4d   :  { %s6614_s27 = sld [smem:[%s7300_s0 + %s6395_s22]]  }
  0x4e   :  { %s4913_s4 = sld [smem:[%s7300_s0 + %s6396_s28]]  }
  0x51   :  { %7340 = sst [smem:[#allocation32_spill]] %s6604_s12 }
  0x52   :  { %7341 = sst [smem:[#allocation33_spill]] %s6609_s20 }
  0x53   :  { %s6622_s12 = sld [smem:[%s7300_s0 + %s6397_s10]]  }
  0x54   :  { %s6627_s20 = sld [smem:[%s7300_s0 + %s6398_s16]]  }
  0x55   :  { %93 = vsyncpa [#allocation3], 0 }
  0x56   :  { %94 = vsyncpa [#allocation4], 0  ;;  %s6399_s22 = smov [#allocation2]   ;;  %s6308_s26 = scalar_lea.hbm %s4913_s4, 16 }
  0x57   :  { %s183_s23 = sshll.u32 %s6399_s22, 4  ;;  %p6309_p0 = scmp.ne.s32.totalorder %s4913_s4, %s6308_s26  ;;  %s184_s23 = int_to_ptr.vmem [resolvable:$true] %s183_s23 }
  0x58   :  { %p6312_p1 = scmp.lt.u32.totalorder %s6308_s26, %s4913_s4 }
  0x5a   :  { %p6314_p2 = pnand %p6312_p1, %p6309_p0 }
  0x5c   :  { %6317 = shalt.err (!%p6314_p2)
}
  0x5d   :  { %s6318_s28 = scalar_lea.vmem %s184_s23, 16  ;;  %s6322_s1 = scalar_lea.vmem %s184_s23, 32 }
  0x5e   :  { %p6319_p3 = scmp.ne.s32.totalorder %s184_s23, %s6318_s28  ;;  %p6323_p4 = scmp.lt.s32.totalorder %s184_s23, %s184_s23 }
  0x5f   :  { %p6324_p5 = scmp.lt.s32.totalorder %s6322_s1, %s6318_s28 }
  0x61   :  { %p6325_p6 = por %p6324_p5, %p6323_p4 }
  0x63   :  { %p6326_p7 = pnand %p6325_p6, %p6319_p3 }
  0x65   :  { %6329 = shalt.err (!%p6326_p7)
}
  0x66   :  { %186 = dma.hbm_to_vmem [thread:$0]  %s4913_s4, 16, %s184_s23, [#allocation3]  }
  0x67   :  { %6352 = dma.done.wait [#allocation3], 16  }
  0x68   :  { %6353 = vsyncadd [#allocation3], 4294967280  ;;  %v6010_v0 = vld [vmem:[%s6419_s9] sm:$0xff]   ;;  %v6011_v1 = vld [vmem:[%s6419_s9 + $0x8] sm:$0xff]   ;;  %vm236_vm0 = vcmask 523264   ;;  %vm294_vm1 = vcmask 261120  }
  0x69   :  { %5460 = vmatprep.subr.bf16.mxu1 %v6010_v0  ;;  %v6012_v2 = vld [vmem:[%s6419_s9 + $0x10] sm:$0xff]   ;;  %v191_v3 = vld [vmem:[%s6414_s5] sm:$0xff]  ;;  %v192_v4 = vld [vmem:[%s6414_s5 + $0x8] sm:$0xff]  ;;  %v6400_v43 = vmov 0.0   ;;  %s7342_s0 = sld [smem:[#allocation8_spill]]  ;;  %vm845_vm2 = vcmask 64512  }
  0x6a   :  { %5461 = vmatpush3.bf16.msra.mxu1 %v6010_v0  ;;  %v195_v5 = vpack.c.bf16 %v192_v4, %v191_v3  ;;  %v6013_v6 = vld [vmem:[%s6419_s9 + $0x18] sm:$0xff]   ;;  %v193_v7 = vld [vmem:[%s6414_s5 + $0x10] sm:$0xff]  ;;  %v4916_v10 = vld [vmem:[%s6424_s13] ss:$0 sm:$0xff]  ;;  %s7344_s9 = sld [smem:[#allocation10_spill]]  ;;  %s6401_s13 = smov 8  }
  0x6b   :  { %5462 = vmatprep.subr.bf16.mxu1 %v6011_v1  ;;  %v194_v8 = vld [vmem:[%s6414_s5 + $0x18] sm:$0xff]  ;;  %v4923_v58 = vld [vmem:[%s6429_s17] ss:$0 sm:$0xff]  ;;  %s7343_s5 = sld [smem:[#allocation9_spill]]  ;;  %s6402_s17 = smov 16   ;;  %vm2259_vm3 = vcmask 130048  }
  0x6c   :  { %5468 = vmatprep.mubr.msk.bf16.mxu1 %vm236_vm0, %v195_v5  ;;  %v196_v9 = vpack.c.bf16 %v194_v8, %v193_v7  ;;  %v4924_v60 = vld [vmem:[%s6434_s21] ss:$0 sm:$0xff]  ;;  %s7345_s21 = sld [smem:[#allocation11_spill]]  ;;  %vm2264_vm4 = vcmask 195584   ;;  %s7354_s4 = sld [smem:[#allocation22_spill]] }
  0x6d   :  { %s7355_s2 = sld [smem:[#allocation19_spill]]  ;;  %s7356_s10 = sld [smem:[#allocation20_spill]] }
  0x6e   :  { %5463 = vmatpush3.bf16.msra.mxu1 %v6011_v1  ;;  %s7357_s7 = sld [smem:[#allocation23_spill]]  ;;  %s7358_s11 = sld [smem:[#allocation24_spill]] }
  0x6f   :  { %5464 = vmatprep.subr.bf16.mxu1 %v6012_v2  ;;  %s7359_s16 = sld [smem:[#allocation25_spill]]  ;;  %s7360_s15 = sld [smem:[#allocation26_spill]] }
  0x70   :  { %s7361_s18 = sld [smem:[#allocation27_spill]]  ;;  %s7362_s22 = sld [smem:[#allocation28_spill]] }
  0x71   :  { %s7363_s23 = sld [smem:[#allocation29_spill]]  ;;  %s7364_s26 = sld [smem:[#allocation32_spill]] }
  0x72   :  { %5465 = vmatpush3.bf16.msra.mxu1 %v6012_v2  ;;  %s7365_s28 = sld [smem:[#allocation30_spill]]  ;;  %s7366_s1 = sld [smem:[#allocation31_spill]] }
  0x73   :  { %5466 = vmatprep.subr.bf16.mxu1 %v6013_v6 }
  0x76   :  { %5467 = vmatpush3.bf16.msra.mxu1 %v6013_v6 }
  0x79   :  { %5469 = vmatmul.mubr.msk.bf16.vlgmr.msra.gmra.mrb[0].mxu1 %vm236_vm0, %v196_v9 }
 0x14c   :  { %v5470_v11 = vpop.f32.mrb[0].mxu1 }
 0x14d   :  { %v286_v12 = vadd.f32 %v5470_v11, %v4916_v10  ;;  %v277_v13 = vpop.f32.mrb[1].mxu1 }
 0x14e   :  { %v278_v14 = vadd.f32 %v4916_v10, %v277_v13  ;;  %v5471_v15 = vpop.f32.mrb[2].mxu1 }
 0x14f   :  { %v289_v16 = vadd.f32 %v5471_v15, %v4916_v10  ;;  %v280_v17 = vpop.f32.mrb[3].mxu1  ;;  %v301_v18 = vsel %vm294_vm1, %v286_v12, 0.0 }
 0x150   :  { %v281_v19 = vadd.f32 %v4916_v10, %v280_v17  ;;  %302 = vadd.xlane.f32.xlu1 %v301_v18  ;;  %v295_v20 = vsel %vm294_vm1, %v278_v14, 0.0 }
 0x151   :  { %296 = vadd.xlane.f32.xlu0 %v295_v20  ;;  %v304_v21 = vsel %vm294_vm1, %v289_v16, 0.0  ;;  %v6015_v20 = vld [vmem:[%s6454_s8 + $0x8] sm:$0xff]  }
 0x152   :  { %v298_v22 = vsel %vm294_vm1, %v281_v19, 0.0 }
 0x154   :  { %305 = vadd.xlane.f32.xlu1 %v304_v21 }
 0x155   :  { %299 = vadd.xlane.f32.xlu0 %v298_v22 }
 0x1dd   :  { %v303_v23 = vpop.xlane.xlu1 %302 }
 0x1de   :  { %v310_v24 = vmul.f32 0.03125, %v303_v23  ;;  %v297_v25 = vpop.xlane.xlu0 %296 }
 0x1df   :  { %v308_v26 = vmul.f32 0.03125, %v297_v25 }
 0x1e0   :  { %v314_v27 = vsub.f32 %v286_v12, %v310_v24 }
 0x1e1   :  { %v312_v28 = vsub.f32 %v278_v14, %v308_v26  ;;  %v306_v29 = vpop.xlane.xlu1 %305 }
 0x1e2   :  { %v311_v30 = vmul.f32 0.03125, %v306_v29  ;;  %v300_v31 = vpop.xlane.xlu0 %299  ;;  %v318_v37 = vmul.f32 %v314_v27, %v314_v27 }
 0x1e3   :  { %v309_v32 = vmul.f32 0.03125, %v300_v31  ;;  %v316_v33 = vmul.f32 %v312_v28, %v312_v28 }
 0x1e4   :  { %v315_v34 = vsub.f32 %v289_v16, %v311_v30  ;;  %v326_v39 = vsel %vm294_vm1, %v318_v37, 0.0 }
 0x1e5   :  { %v313_v35 = vsub.f32 %v281_v19, %v309_v32  ;;  %v320_v36 = vsel %vm294_vm1, %v316_v33, 0.0  ;;  %v6014_v19 = vld [vmem:[%s6454_s8] sm:$0xff]   ;;  %s7348_s8 = sld [smem:[#allocation13_spill]] }
 0x1e6   :  { %321 = vadd.xlane.f32.xlu0 %v320_v36  ;;  %v319_v41 = vmul.f32 %v315_v34, %v315_v34  ;;  %5472 = vmatprep.subr.bf16.mxu1 %v6014_v19 }
 0x1e7   :  { %v317_v38 = vmul.f32 %v313_v35, %v313_v35  ;;  %5473 = vmatpush3.bf16.msra.mxu1 %v6014_v19 }
 0x1e8   :  { %v329_v42 = vsel %vm294_vm1, %v319_v41, 0.0  ;;  %5474 = vmatprep.subr.bf16.mxu1 %v6015_v20 }
 0x1e9   :  { %v323_v40 = vsel %vm294_vm1, %v317_v38, 0.0 }
 0x1ea   :  { %327 = vadd.xlane.f32.xlu0 %v326_v39  ;;  %324 = vadd.xlane.f32.xlu1 %v323_v40 }
 0x1eb   :  { %5475 = vmatpush3.bf16.msra.mxu1 %v6015_v20 }
 0x1ee   :  { %330 = vadd.xlane.f32.xlu1 %v329_v42  ;;  %442 = vadd.xlane.f32.xlu0 %v6400_v43 }
 0x273   :  { %v322_v44 = vpop.xlane.xlu0 %321 }
 0x274   :  { %v332_v45 = vmul.f32 0.03125, %v322_v44 }
 0x276   :  { %v336_v46 = vadd.f32 1e-05, %v332_v45  ;;  %v4925_v45 = vld [vmem:[%s6439_s25] ss:$0 sm:$0xff]  ;;  %s6403_s25 = smov 24  }
 0x277   :  { %v325_v47 = vpop.xlane.xlu1 %324  ;;  %v328_v48 = vpop.xlane.xlu0 %327 }
 0x278   :  { %6090 = vrsqrt.f32 %v336_v46  ;;  %v333_v49 = vmul.f32 0.03125, %v325_v47  ;;  %v334_v50 = vmul.f32 0.03125, %v328_v48  ;;  %v4926_v47 = vld [vmem:[%s6444_s29] ss:$0 sm:$0xff]  ;;  %s7346_s29 = sld [smem:[#allocation12_spill]] }
 0x27a   :  { %v337_v51 = vadd.f32 1e-05, %v333_v49  ;;  %v338_v52 = vadd.f32 1e-05, %v334_v50 }
 0x27b   :  { %v331_v53 = vpop.xlane.xlu1 %330  ;;  %v443_v56 = vpop.xlane.xlu0 %442 }
 0x27c   :  { %6092 = vrsqrt.f32 %v337_v51  ;;  %v335_v54 = vmul.f32 0.03125, %v331_v53  ;;  %v444_v61 = vmul.f32 0.03125, %v443_v56  ;;  %v6016_v51 = vld [vmem:[%s6449_s3] sm:$0xff]  }
 0x27d   :  { %6094 = vrsqrt.f32 %v338_v52  ;;  %5480 = vmatprep.subr.bf16.mxu1 %v6016_v51  ;;  %v6017_v52 = vld [vmem:[%s6449_s3 + $0x8] sm:$0xff]   ;;  %s7347_s3 = sld [smem:[#allocation15_spill]] }
 0x27e   :  { %v339_v55 = vadd.f32 1e-05, %v335_v54  ;;  %v445_v3 = vsub.f32 0.0, %v444_v61 }
 0x280   :  { %6096 = vrsqrt.f32 %v339_v55  ;;  %v446_v12 = vmul.f32 %v445_v3, %v445_v3 }
 0x282   :  { %v6091_v57 = vpop.eup %6090  ;;  %v447_v17 = vsel %vm294_vm1, %v446_v12, 0.0 }
 0x283   :  { %v344_v59 = vmul.f32 %v6091_v57, %v312_v28 }
 0x285   :  { %v354_v62 = vmul.f32 %v4923_v58, %v344_v59 }
 0x286   :  { %v6093_v63 = vpop.eup %6092 }
 0x287   :  { %v6095_v0 = vpop.eup %6094  ;;  %v6648_v1 = vadd.f32 %v4924_v60, %v354_v62  ;;  %v345_v2 = vmul.f32 %v6093_v63, %v313_v35 }
 0x288   :  { %v346_v4 = vmul.f32 %v6095_v0, %v314_v27 }
 0x289   :  { %v370_v5 = vsel %vm294_vm1, %v6648_v1, 0.0  ;;  %v355_v6 = vmul.f32 %v4923_v58, %v345_v2 }
 0x28a   :  { %v6097_v7 = vpop.eup %6096  ;;  %371 = vadd.xlane.f32.xlu1 %v370_v5  ;;  %v356_v8 = vmul.f32 %v4923_v58, %v346_v4 }
 0x28b   :  { %v6652_v9 = vadd.f32 %v4924_v60, %v355_v6  ;;  %v347_v10 = vmul.f32 %v6097_v7, %v315_v34 }
 0x28c   :  { %v6654_v11 = vadd.f32 %v4924_v60, %v356_v8 }
 0x28d   :  { %v373_v13 = vsel %vm294_vm1, %v6652_v9, 0.0  ;;  %v357_v14 = vmul.f32 %v4923_v58, %v347_v10 }
 0x28e   :  { %374 = vadd.xlane.f32.xlu0 %v373_v13  ;;  %v376_v15 = vsel %vm294_vm1, %v6654_v11, 0.0 }
 0x28f   :  { %377 = vadd.xlane.f32.xlu1 %v376_v15  ;;  %v6660_v16 = vadd.f32 %v4924_v60, %v357_v14 }
 0x291   :  { %v379_v18 = vsel %vm294_vm1, %v6660_v16, 0.0 }
 0x292   :  { %380 = vadd.xlane.f32.xlu0 %v379_v18 }
 0x293   :  { %448 = vadd.xlane.f32.xlu1 %v447_v17 }
 0x317   :  { %v372_v21 = vpop.xlane.xlu1 %371 }
 0x318   :  { %v382_v22 = vmul.f32 0.03125, %v372_v21 }
 0x31a   :  { %v386_v23 = vsub.f32 %v6648_v1, %v382_v22 }
 0x31b   :  { %v375_v24 = vpop.xlane.xlu0 %374 }
 0x31c   :  { %v378_v25 = vpop.xlane.xlu1 %377  ;;  %v383_v26 = vmul.f32 0.03125, %v375_v24  ;;  %v390_v27 = vmul.f32 %v386_v23, %v386_v23  ;;  %v6019_v24 = vld [vmem:[%s6464_s19] sm:$0xff]  }
 0x31d   :  { %v384_v28 = vmul.f32 0.03125, %v378_v25  ;;  %5488 = vmatprep.subr.bf16.mxu0 %v6019_v24  ;;  %v6020_v25 = vld [vmem:[%s6469_s24 + $0x8] sm:$0xff]  }
 0x31e   :  { %v387_v29 = vsub.f32 %v6652_v9, %v383_v26  ;;  %v394_v30 = vsel %vm294_vm1, %v390_v27, 0.0  ;;  %5489 = vmatpush3.bf16.msra.mxu0 %v6019_v24  ;;  %v6021_v26 = vld [vmem:[%s6464_s19 + $0x8] sm:$0xff]   ;;  %v6022_v27 = vld [vmem:[%s6474_s30] sm:$0xff]  }
 0x31f   :  { %v388_v31 = vsub.f32 %v6654_v11, %v384_v28  ;;  %395 = vadd.xlane.f32.xlu0 %v394_v30  ;;  %v381_v32 = vpop.xlane.xlu0 %380  ;;  %5490 = vmatprep.subr.bf16.mxu0 %v6021_v26 }
 0x320   :  { %v449_v33 = vpop.xlane.xlu1 %448  ;;  %v385_v34 = vmul.f32 0.03125, %v381_v32  ;;  %v391_v35 = vmul.f32 %v387_v29, %v387_v29 }
 0x321   :  { %v450_v36 = vmul.f32 0.03125, %v449_v33  ;;  %v392_v37 = vmul.f32 %v388_v31, %v388_v31 }
 0x322   :  { %v389_v38 = vsub.f32 %v6660_v16, %v385_v34  ;;  %v397_v39 = vsel %vm294_vm1, %v391_v35, 0.0  ;;  %5491 = vmatpush3.bf16.msra.mxu0 %v6021_v26 }
 0x323   :  { %v451_v40 = vadd.f32 1e-05, %v450_v36  ;;  %v400_v41 = vsel %vm294_vm1, %v392_v37, 0.0  ;;  %398 = vadd.xlane.f32.xlu1 %v397_v39  ;;  %5504 = vmatprep.subr.bf16.mxu0 %v6022_v27  ;;  %v6023_v39 = vld [vmem:[%s6474_s30 + $0x8] sm:$0xff]  }
 0x324   :  { %401 = vadd.xlane.f32.xlu0 %v400_v41  ;;  %v393_v42 = vmul.f32 %v389_v38, %v389_v38 }
 0x325   :  { %6098 = vrsqrt.f32 %v451_v40  ;;  %v4936_v40 = vld [vmem:[%s6479_s6] ss:$0 sm:$0xff] }
 0x326   :  { %v403_v43 = vsel %vm294_vm1, %v393_v42, 0.0 }
 0x327   :  { %404 = vadd.xlane.f32.xlu1 %v403_v43  ;;  %v4941_v43 = vld [vmem:[%s7342_s0] ss:$0 sm:$0xff] }
 0x32f   :  { %v6099_v44 = vpop.eup %6098 }
 0x330   :  { %v453_v46 = vmul.f32 %v6099_v44, %v445_v3 }
 0x332   :  { %v454_v48 = vmul.f32 %v4925_v45, %v453_v46 }
 0x334   :  { %v455_v49 = vadd.f32 %v4926_v47, %v454_v48 }
 0x336   :  { %v462_v50 = vpack.c.bf16 %v455_v49, %v455_v49 }
 0x338   :  { %5476 = vmatprep.mubr.msk.bf16.mxu1 %vm294_vm1, %v462_v50 }
 0x339   :  { %5477 = vmatmul.mubr.msk.bf16.vlgmr.msra.gmra.mrb[4].mxu1 %vm294_vm1, %v462_v50 }
 0x33a   :  { %5481 = vmatpush3.bf16.msra.mxu1 %v6016_v51 }
 0x33b   :  { %5482 = vmatprep.subr.bf16.mxu1 %v6017_v52 }
 0x33e   :  { %5483 = vmatpush3.bf16.msra.mxu1 %v6017_v52 }
 0x3ac   :  { %v396_v53 = vpop.xlane.xlu0 %395 }
 0x3ad   :  { %v406_v54 = vmul.f32 0.03125, %v396_v53 }
 0x3af   :  { %v410_v55 = vadd.f32 1e-05, %v406_v54 }
 0x3b0   :  { %v399_v56 = vpop.xlane.xlu1 %398 }
 0x3b1   :  { %6100 = vrsqrt.f32 %v410_v55  ;;  %v407_v57 = vmul.f32 0.03125, %v399_v56  ;;  %v402_v58 = vpop.xlane.xlu0 %401 }
 0x3b2   :  { %v408_v59 = vmul.f32 0.03125, %v402_v58 }
 0x3b3   :  { %v411_v60 = vadd.f32 1e-05, %v407_v57 }
 0x3b4   :  { %v412_v61 = vadd.f32 1e-05, %v408_v59  ;;  %v405_v62 = vpop.xlane.xlu1 %404 }
 0x3b5   :  { %6102 = vrsqrt.f32 %v411_v60  ;;  %v409_v63 = vmul.f32 0.03125, %v405_v62 }
 0x3b6   :  { %6104 = vrsqrt.f32 %v412_v61 }
 0x3b7   :  { %v413_v0 = vadd.f32 1e-05, %v409_v63 }
 0x3b9   :  { %6106 = vrsqrt.f32 %v413_v0 }
 0x3bb   :  { %v6101_v2 = vpop.eup %6100 }
 0x3bc   :  { %v418_v3 = vmul.f32 %v6101_v2, %v386_v23  ;;  %v6018_v23 = vld [vmem:[%s6469_s24] sm:$0xff]  }
 0x3bd   :  { %5496 = vmatprep.subr.bf16.mxu1 %v6018_v23 }
 0x3be   :  { %v428_v7 = vmul.f32 %v4925_v45, %v418_v3 }
 0x3bf   :  { %v6103_v4 = vpop.eup %6102 }
 0x3c0   :  { %v6105_v5 = vpop.eup %6104  ;;  %v419_v6 = vmul.f32 %v6103_v4, %v387_v29  ;;  %v438_v15 = vadd.f32 %v4926_v47, %v428_v7  ;;  %v4935_v29 = vld [vmem:[%s6459_s14] ss:$0 sm:$0xff]  ;;  %s7349_s14 = sld [smem:[#allocation14_spill]] }
 0x3c1   :  { %v420_v8 = vmul.f32 %v6105_v5, %v388_v31  ;;  %v4946_v4 = vld [vmem:[%s7343_s5] ss:$0 sm:$0xff] }
 0x3c2   :  { %v429_v10 = vmul.f32 %v4925_v45, %v419_v6 }
 0x3c3   :  { %v6107_v12 = vpop.eup %6106  ;;  %v430_v13 = vmul.f32 %v4925_v45, %v420_v8 }
 0x3c4   :  { %v421_v14 = vmul.f32 %v6107_v12, %v389_v38  ;;  %v439_v17 = vadd.f32 %v4926_v47, %v429_v10 }
 0x3c5   :  { %v440_v20 = vadd.f32 %v4926_v47, %v430_v13 }
 0x3c6   :  { %v431_v18 = vmul.f32 %v4925_v45, %v421_v14  ;;  %v456_v19 = vpack.c.bf16 %v439_v17, %v438_v15 }
 0x3c8   :  { %5484 = vmatprep.mubr.msk.bf16.mxu1 %vm294_vm1, %v456_v19  ;;  %v441_v21 = vadd.f32 %v4926_v47, %v431_v18  ;;  %v6024_v18 = vld [vmem:[%s6469_s24 + $0x10] sm:$0xff]  }
 0x3ca   :  { %v457_v22 = vpack.c.bf16 %v441_v21, %v440_v20  ;;  %v6025_v20 = vld [vmem:[%s6469_s24 + $0x18] sm:$0xff]   ;;  %v841_v21 = vld [vmem:[%s7344_s9] sm:$0xff] }
 0x3cc   :  { %5485 = vmatmul.mubr.msk.bf16.vlgmr.msra.gmra.mrb[4].mxu1 %vm294_vm1, %v457_v22 }
 0x3cd   :  { %5497 = vmatpush3.bf16.msra.mxu1 %v6018_v23  ;;  %v843_v23 = vld [vmem:[%s7344_s9 + $0x10] sm:$0xff] }
 0x3ce   :  { %5498 = vmatprep.subr.bf16.mxu1 %v6020_v25 }
 0x3d1   :  { %5499 = vmatpush3.bf16.msra.mxu1 %v6020_v25  ;;  %v842_v25 = vld [vmem:[%s7344_s9 + $0x8] sm:$0xff] }
 0x49f   :  { %v5486_v28 = vpop.f32.mrb[4].mxu1 }
 0x4a0   :  { %v583_v30 = vpop.f32.mrb[5].mxu1  ;;  %v607_v32 = vadd.f32 %v5486_v28, %v4935_v29  ;;  %v844_v28 = vld [vmem:[%s7344_s9 + $0x18] sm:$0xff] }
 0x4a1   :  { %v5487_v31 = vpop.f32.mrb[6].mxu1  ;;  %v605_v35 = vadd.f32 %v4935_v29, %v583_v30 }
 0x4a2   :  { %v608_v33 = vadd.f32 %v5487_v31, %v4935_v29  ;;  %v586_v34 = vpop.f32.mrb[7].mxu1 }
 0x4a3   :  { %v606_v36 = vadd.f32 %v4935_v29, %v586_v34 }
 0x4a4   :  { %v6689_v37 = vpack.c.bf16 %v608_v33, %v607_v32 }
 0x4a5   :  { %v6691_v38 = vpack.c.bf16 %v606_v36, %v605_v35  ;;  %v4970_v36 = vld [vmem:[%s7342_s0 + $0x1] ss:$0 sm:$0xff] }
 0x4a7   :  { %5492 = vmatprep.mubr.msk.bf16.mxu0 %vm294_vm1, %v6691_v38  ;;  %5500 = vmatprep.mubr.msk.bf16.mxu1 %vm294_vm1, %v6691_v38 }
 0x4a8   :  { %5493 = vmatmul.mubr.msk.bf16.vlgmr.msra.gmra.mrb[0].mxu0 %vm294_vm1, %v6689_v37  ;;  %5501 = vmatmul.mubr.msk.bf16.vlgmr.msra.gmra.mrb[8].mxu1 %vm294_vm1, %v6689_v37 }
 0x4a9   :  { %5505 = vmatpush3.bf16.msra.mxu0 %v6022_v27  ;;  %5508 = vmatprep.mubr.msk.bf16.mxu0 %vm294_vm1, %v6691_v38 }
 0x4aa   :  { %5506 = vmatprep.subr.bf16.mxu0 %v6023_v39 }
 0x4ad   :  { %5507 = vmatpush3.bf16.msra.mxu0 %v6023_v39 }
 0x4b0   :  { %5509 = vmatmul.mubr.msk.bf16.vlgmr.msra.gmra.mrb[4].mxu0 %vm294_vm1, %v6689_v37 }
 0x57b   :  { %v5494_v41 = vpop.f32.mrb[0].mxu0  ;;  %v5502_v42 = vpop.f32.mrb[8].mxu1 }
 0x57c   :  { %v683_v44 = vadd.f32 %v5494_v41, %v4936_v40  ;;  %v674_v45 = vpop.f32.mrb[1].mxu0  ;;  %v750_v46 = vpop.f32.mrb[9].mxu1  ;;  %v759_v50 = vadd.f32 %v5502_v42, %v4941_v43 }
 0x57d   :  { %v675_v47 = vadd.f32 %v4936_v40, %v674_v45  ;;  %v5495_v48 = vpop.f32.mrb[2].mxu0  ;;  %v5503_v49 = vpop.f32.mrb[10].mxu1  ;;  %v751_v55 = vadd.f32 %v4941_v43, %v750_v46 }
 0x57e   :  { %v686_v51 = vadd.f32 %v5495_v48, %v4936_v40  ;;  %v762_v52 = vadd.f32 %v5503_v49, %v4941_v43  ;;  %v677_v53 = vpop.f32.mrb[3].mxu0  ;;  %v753_v54 = vpop.f32.mrb[11].mxu1  ;;  %v691_v58 = vmul.f32 0.35355338, %v683_v44 }
 0x57f   :  { %v678_v56 = vadd.f32 %v4936_v40, %v677_v53  ;;  %v754_v57 = vadd.f32 %v4941_v43, %v753_v54  ;;  %v689_v61 = vmul.f32 0.35355338, %v675_v47 }
 0x580   :  { %v692_v59 = vmul.f32 0.35355338, %v686_v51  ;;  %v840_v60 = vpack.c.bf16 %v762_v52, %v759_v50 }
 0x581   :  { %v690_v62 = vmul.f32 0.35355338, %v678_v56  ;;  %v839_v63 = vpack.c.bf16 %v754_v57, %v751_v55 }
 0x582   :  { %v838_v0 = vpack.c.bf16 %v692_v59, %v691_v58  ;;  %v856_v19 = vsel %vm845_vm2, %v840_v60, 0 }
 0x583   :  { %v837_v2 = vpack.c.bf16 %v690_v62, %v689_v61  ;;  %v5510_v3 = vpop.f32.mrb[4].mxu0  ;;  %5884 = vmatprep.subr.msk.bf16.mxu1 %vm845_vm2, %v839_v63  ;;  %v853_v5 = vsel %vm845_vm2, %v839_v63, 0 }
 0x584   :  { %v822_v6 = vpop.f32.mrb[5].mxu0  ;;  %5513 = vmatpush3.bf16.xpose.msra.mxu1 %v853_v5  ;;  %v831_v8 = vadd.f32 %v5510_v3, %v4946_v4 }
 0x585   :  { %v5511_v7 = vpop.f32.mrb[6].mxu0  ;;  %5885 = vmatprep.subr.msk.bf16.mxu1 %vm845_vm2, %v840_v60  ;;  %5516 = vmatprep.mubr.msk.bf16.mxu1 %vm845_vm2, %v837_v2  ;;  %v823_v13 = vadd.f32 %v4946_v4, %v822_v6 }
 0x586   :  { %v834_v10 = vadd.f32 %v5511_v7, %v4946_v4  ;;  %v825_v12 = vpop.f32.mrb[7].mxu0 }
 0x587   :  { %v826_v14 = vadd.f32 %v4946_v4, %v825_v12 }
 0x588   :  { %v954_v15 = vpack.c.bf16 %v834_v10, %v831_v8  ;;  %v6026_v10 = vld [vmem:[%s6464_s19 + $0x10] sm:$0xff]  }
 0x589   :  { %v953_v17 = vpack.c.bf16 %v826_v14, %v823_v13 }
 0x58b   :  { %5520 = vmatprep.subr.bf16.mxu0 %v953_v17 }
 0x58c   :  { %5515 = vmatpush3.bf16.xpose.msra.mxu1 %v856_v19  ;;  %5521 = vmatpush3.bf16.msra.mxu0 %v953_v17 }
 0x58d   :  { %5522 = vmatprep.subr.bf16.mxu0 %v954_v15  ;;  %5536 = vmatprep.subr.bf16.mxu1 %v6024_v18 }
 0x590   :  { %5523 = vmatpush3.bf16.msra.mxu0 %v954_v15 }
 0x591   :  { %5528 = vmatprep.subr.bf16.mxu0 %v6026_v10 }
 0x593   :  { %5517 = vmatmul.mubr.msk.bf16.vlgmr.msra.gmra.mrb[12].mxu1 %vm845_vm2, %v838_v0 }
 0x594   :  { %5537 = vmatpush3.bf16.msra.mxu1 %v6024_v18  ;;  %5540 = vmatprep.mubr.msk.bf16.mxu1 %vm294_vm1, %v6691_v38 }
 0x595   :  { %5538 = vmatprep.subr.bf16.mxu1 %v6025_v20 }
 0x598   :  { %5539 = vmatpush3.bf16.msra.mxu1 %v6025_v20 }
 0x59b   :  { %5541 = vmatmul.mubr.msk.bf16.vlgmr.msra.gmra.mrb[16].mxu1 %vm294_vm1, %v6689_v37 }
 0x666   :  { %v5518_v22 = vpop.f32.mrb[12].mxu1 }
 0x667   :  { %v892_v24 = vpop.f32.mrb[13].mxu1  ;;  %v901_v30 = vadd.f32 %v5518_v22, %v843_v23 }
 0x668   :  { %v893_v26 = vadd.f32 %v892_v24, %v841_v21  ;;  %v5519_v27 = vpop.f32.mrb[14].mxu1 }
 0x669   :  { %v895_v29 = vpop.f32.mrb[15].mxu1  ;;  %v904_v33 = vadd.f32 %v5519_v27, %v844_v28  ;;  %v913_v39 = vsel %vm294_vm1, %v901_v30, -inf  ;;  %v6027_v27 = vld [vmem:[%s6464_s19 + $0x18] sm:$0xff]   ;;  %v6028_v28 = vld [vmem:[%s6474_s30 + $0x10] sm:$0xff]  }
 0x66a   :  { %v896_v31 = vadd.f32 %v895_v29, %v842_v25  ;;  %v907_v32 = vsel %vm294_vm1, %v893_v26, -inf  ;;  %v6029_v29 = vld [vmem:[%s6474_s30 + $0x18] sm:$0xff]  }
 0x66b   :  { %908 = vmax.xlane.f32.xlu0 %v907_v32  ;;  %v916_v42 = vsel %vm294_vm1, %v904_v33, -inf }
 0x66c   :  { %v910_v34 = vsel %vm294_vm1, %v896_v31, -inf }
 0x66d   :  { %911 = vmax.xlane.f32.xlu1 %v910_v34 }
 0x66e   :  { %v5542_v35 = vpop.f32.mrb[16].mxu1 }
 0x66f   :  { %v1147_v40 = vpop.f32.mrb[17].mxu1  ;;  %914 = vmax.xlane.f32.xlu0 %v913_v39  ;;  %v1156_v43 = vadd.f32 %v5542_v35, %v4970_v36  ;;  %v4960_v35 = vld [vmem:[%s6479_s6 + $0x1] ss:$0 sm:$0xff] }
 0x670   :  { %v5543_v41 = vpop.f32.mrb[18].mxu1  ;;  %v1148_v46 = vadd.f32 %v4970_v36, %v1147_v40 }
 0x671   :  { %v1159_v44 = vadd.f32 %v5543_v41, %v4970_v36  ;;  %v1150_v45 = vpop.f32.mrb[19].mxu1  ;;  %917 = vmax.xlane.f32.xlu1 %v916_v42 }
 0x672   :  { %v1151_v47 = vadd.f32 %v4970_v36, %v1150_v45 }
 0x673   :  { %v1239_v48 = vpack.c.bf16 %v1159_v44, %v1156_v43 }
 0x674   :  { %v1238_v49 = vpack.c.bf16 %v1151_v47, %v1148_v46 }
 0x675   :  { %v1255_v51 = vsel %vm845_vm2, %v1239_v48, 0 }
 0x676   :  { %5886 = vmatprep.subr.msk.bf16.mxu1 %vm845_vm2, %v1238_v49  ;;  %v1252_v50 = vsel %vm845_vm2, %v1238_v49, 0 }
 0x677   :  { %5553 = vmatpush3.bf16.xpose.msra.mxu1 %v1252_v50 }
 0x678   :  { %5887 = vmatprep.subr.msk.bf16.mxu1 %vm845_vm2, %v1239_v48 }
 0x67f   :  { %5555 = vmatpush3.bf16.xpose.msra.mxu1 %v1255_v51 }
 0x6f8   :  { %v909_v52 = vpop.xlane.xlu0 %908 }
 0x6f9   :  { %v919_v53 = vsub.f32 %v893_v26, %v909_v52 }
 0x6fa   :  { %v912_v54 = vpop.xlane.xlu1 %911 }
 0x6fb   :  { %v923_v55 = vmul.f32 1.442695, %v919_v53  ;;  %v920_v56 = vsub.f32 %v896_v31, %v912_v54  ;;  %v4980_v53 = vld [vmem:[%s7343_s5 + $0x1] ss:$0 sm:$0xff] }
 0x6fc   :  { %v915_v57 = vpop.xlane.xlu0 %914 }
 0x6fd   :  { %6108 = vpow2.f32 %v923_v55  ;;  %v925_v58 = vmul.f32 1.442695, %v920_v56  ;;  %v921_v59 = vsub.f32 %v901_v30, %v915_v57  ;;  %v6030_v30 = vld [vmem:[%s6469_s24 + $0x20] sm:$0xff]   ;;  %v6031_v55 = vld [vmem:[%s6469_s24 + $0x28] sm:$0xff]  }
 0x6fe   :  { %v918_v60 = vpop.xlane.xlu1 %917  ;;  %5576 = vmatprep.subr.bf16.mxu1 %v6030_v30 }
 0x6ff   :  { %6110 = vpow2.f32 %v925_v58  ;;  %v927_v61 = vmul.f32 1.442695, %v921_v59  ;;  %v922_v62 = vsub.f32 %v904_v33, %v918_v60 }
 0x701   :  { %6112 = vpow2.f32 %v927_v61  ;;  %v929_v63 = vmul.f32 1.442695, %v922_v62 }
 0x703   :  { %6114 = vpow2.f32 %v929_v63 }
 0x707   :  { %v6109_v0 = vpop.eup %6108 }
 0x708   :  { %v931_v2 = vsel %vm294_vm1, %v6109_v0, 0.0 }
 0x709   :  { %v6111_v3 = vpop.eup %6110  ;;  %932 = vadd.xlane.f32.xlu0 %v931_v2 }
 0x70a   :  { %v934_v4 = vsel %vm294_vm1, %v6111_v3, 0.0 }
 0x70b   :  { %v6113_v5 = vpop.eup %6112  ;;  %935 = vadd.xlane.f32.xlu1 %v934_v4 }
 0x70c   :  { %v937_v6 = vsel %vm294_vm1, %v6113_v5, 0.0 }
 0x70d   :  { %v6115_v7 = vpop.eup %6114  ;;  %938 = vadd.xlane.f32.xlu0 %v937_v6 }
 0x70e   :  { %v940_v8 = vsel %vm294_vm1, %v6115_v7, 0.0 }
 0x70f   :  { %941 = vadd.xlane.f32.xlu1 %v940_v8  ;;  %v4988_v8 = vld [vmem:[%s7344_s9 + $0x38] sm:$0xff] }
 0x796   :  { %v933_v12 = vpop.xlane.xlu0 %932 }
 0x797   :  { %6116 = vrcp.f32 %v933_v12 }
 0x798   :  { %v936_v13 = vpop.xlane.xlu1 %935 }
 0x799   :  { %6118 = vrcp.f32 %v936_v13 }
 0x79a   :  { %v939_v14 = vpop.xlane.xlu0 %938 }
 0x79b   :  { %6120 = vrcp.f32 %v939_v14 }
 0x79c   :  { %v942_v15 = vpop.xlane.xlu1 %941 }
 0x79d   :  { %6122 = vrcp.f32 %v942_v15 }
 0x7a1   :  { %v6117_v17 = vpop.eup %6116 }
 0x7a2   :  { %v944_v19 = vmul.f32 %v6117_v17, %v6109_v0  ;;  %v4985_v0 = vld [vmem:[%s7344_s9 + $0x20] sm:$0xff] }
 0x7a3   :  { %v6119_v18 = vpop.eup %6118 }
 0x7a4   :  { %v946_v20 = vmul.f32 %v6119_v18, %v6111_v3  ;;  %v4987_v3 = vld [vmem:[%s7344_s9 + $0x30] sm:$0xff] }
 0x7a5   :  { %v6121_v21 = vpop.eup %6120 }
 0x7a6   :  { %v951_v22 = vpack.c.bf16 %v946_v20, %v944_v19  ;;  %v948_v24 = vmul.f32 %v6121_v21, %v6113_v5  ;;  %v4986_v5 = vld [vmem:[%s7344_s9 + $0x28] sm:$0xff]  ;;  %v5008_v19 = vld [vmem:[%s7342_s0 + $0x2] ss:$0 sm:$0xff] }
 0x7a7   :  { %v6123_v23 = vpop.eup %6122 }
 0x7a8   :  { %v950_v25 = vmul.f32 %v6123_v23, %v6115_v7  ;;  %5524 = vmatprep.mubr.msk.bf16.mxu0 %vm294_vm1, %v951_v22 }
 0x7aa   :  { %v952_v26 = vpack.c.bf16 %v950_v25, %v948_v24 }
 0x7ac   :  { %5525 = vmatmul.mubr.msk.bf16.vlgmr.msra.gmra.mrb[8].mxu0 %vm294_vm1, %v952_v26 }
 0x7ad   :  { %5529 = vmatpush3.bf16.msra.mxu0 %v6026_v10  ;;  %5532 = vmatprep.mubr.msk.bf16.mxu0 %vm294_vm1, %v6691_v38 }
 0x7ae   :  { %5530 = vmatprep.subr.bf16.mxu0 %v6027_v27 }
 0x7b1   :  { %5531 = vmatpush3.bf16.msra.mxu0 %v6027_v27 }
 0x7b2   :  { %5544 = vmatprep.subr.bf16.mxu0 %v6028_v28 }
 0x7b4   :  { %5533 = vmatmul.mubr.msk.bf16.vlgmr.msra.gmra.mrb[12].mxu0 %vm294_vm1, %v6689_v37 }
 0x7b5   :  { %5545 = vmatpush3.bf16.msra.mxu0 %v6028_v28  ;;  %5548 = vmatprep.mubr.msk.bf16.mxu0 %vm294_vm1, %v6691_v38 }
 0x7b6   :  { %5546 = vmatprep.subr.bf16.mxu0 %v6029_v29 }
 0x7b9   :  { %5547 = vmatpush3.bf16.msra.mxu0 %v6029_v29 }
 0x7bc   :  { %5549 = vmatmul.mubr.msk.bf16.vlgmr.msra.gmra.mrb[16].mxu0 %vm294_vm1, %v6689_v37 }
 0x87f   :  { %v6753_v31 = vpop.f32.mrb[8].mxu0 }
 0x880   :  { %v6755_v32 = vpop.f32.mrb[9].mxu0 }
 0x881   :  { %v6757_v33 = vpop.f32.mrb[10].mxu0 }
 0x882   :  { %v6759_v34 = vpop.f32.mrb[11].mxu0 }
 0x887   :  { %v5534_v36 = vpop.f32.mrb[12].mxu0 }
 0x888   :  { %v1078_v39 = vadd.f32 %v5534_v36, %v4960_v35  ;;  %v1069_v40 = vpop.f32.mrb[13].mxu0 }
 0x889   :  { %v1070_v41 = vadd.f32 %v4960_v35, %v1069_v40  ;;  %v5535_v42 = vpop.f32.mrb[14].mxu0 }
 0x88a   :  { %v1081_v43 = vadd.f32 %v5535_v42, %v4960_v35  ;;  %v1072_v44 = vpop.f32.mrb[15].mxu0  ;;  %v1086_v46 = vmul.f32 0.35355338, %v1078_v39 }
 0x88b   :  { %v1073_v45 = vadd.f32 %v4960_v35, %v1072_v44  ;;  %v1084_v48 = vmul.f32 0.35355338, %v1070_v41 }
 0x88c   :  { %v1087_v47 = vmul.f32 0.35355338, %v1081_v43 }
 0x88d   :  { %v1085_v49 = vmul.f32 0.35355338, %v1073_v45 }
 0x88e   :  { %v1237_v50 = vpack.c.bf16 %v1087_v47, %v1086_v46 }
 0x88f   :  { %v1236_v51 = vpack.c.bf16 %v1085_v49, %v1084_v48  ;;  %v5550_v52 = vpop.f32.mrb[16].mxu0 }
 0x890   :  { %v1221_v54 = vpop.f32.mrb[17].mxu0  ;;  %v1230_v57 = vadd.f32 %v5550_v52, %v4980_v53 }
 0x891   :  { %v5551_v56 = vpop.f32.mrb[18].mxu0  ;;  %5556 = vmatprep.mubr.msk.bf16.mxu1 %vm845_vm2, %v1236_v51  ;;  %v1222_v60 = vadd.f32 %v4980_v53, %v1221_v54 }
 0x892   :  { %v1233_v58 = vadd.f32 %v5551_v56, %v4980_v53  ;;  %v1224_v59 = vpop.f32.mrb[19].mxu0  ;;  %5557 = vmatmul.mubr.msk.bf16.vlgmr.msra.gmra.mrb[20].mxu1 %vm845_vm2, %v1237_v50 }
 0x893   :  { %v1225_v61 = vadd.f32 %v4980_v53, %v1224_v59  ;;  %5577 = vmatpush3.bf16.msra.mxu1 %v6030_v30  ;;  %5580 = vmatprep.mubr.msk.bf16.mxu1 %vm294_vm1, %v6691_v38  ;;  %v6032_v59 = vld [vmem:[%s6464_s19 + $0x20] sm:$0xff]  }
 0x894   :  { %v1353_v62 = vpack.c.bf16 %v1233_v58, %v1230_v57  ;;  %5578 = vmatprep.subr.bf16.mxu1 %v6031_v55 }
 0x895   :  { %v1352_v63 = vpack.c.bf16 %v1225_v61, %v1222_v60 }
 0x897   :  { %5560 = vmatprep.subr.bf16.mxu0 %v1352_v63  ;;  %5579 = vmatpush3.bf16.msra.mxu1 %v6031_v55 }
 0x898   :  { %5561 = vmatpush3.bf16.msra.mxu0 %v1352_v63 }
 0x899   :  { %5562 = vmatprep.subr.bf16.mxu0 %v1353_v62 }
 0x89a   :  { %5581 = vmatmul.mubr.msk.bf16.vlgmr.msra.gmra.mrb[24].mxu1 %vm294_vm1, %v6689_v37 }
 0x89c   :  { %5563 = vmatpush3.bf16.msra.mxu0 %v1353_v62 }
 0x89d   :  { %5568 = vmatprep.subr.bf16.mxu0 %v6032_v59 }
 0x965   :  { %v5558_v2 = vpop.f32.mrb[20].mxu1 }
 0x966   :  { %v1291_v4 = vpop.f32.mrb[21].mxu1  ;;  %v1300_v12 = vadd.f32 %v5558_v2, %v4987_v3 }
 0x967   :  { %v1292_v6 = vadd.f32 %v4985_v0, %v1291_v4  ;;  %v5559_v7 = vpop.f32.mrb[22].mxu1 }
 0x968   :  { %v1294_v10 = vpop.f32.mrb[23].mxu1  ;;  %v1303_v15 = vadd.f32 %v5559_v7, %v4988_v8  ;;  %v1312_v20 = vsel %vm294_vm1, %v1300_v12, -inf }
 0x969   :  { %v1295_v13 = vadd.f32 %v4986_v5, %v1294_v10  ;;  %v1306_v14 = vsel %vm294_vm1, %v1292_v6, -inf }
 0x96a   :  { %1307 = vmax.xlane.f32.xlu0 %v1306_v14  ;;  %v1315_v23 = vsel %vm294_vm1, %v1303_v15, -inf  ;;  %v6034_v14 = vld [vmem:[%s6474_s30 + $0x20] sm:$0xff]  }
 0x96b   :  { %v1309_v17 = vsel %vm294_vm1, %v1295_v13, -inf }
 0x96c   :  { %1310 = vmax.xlane.f32.xlu1 %v1309_v17  ;;  %v6036_v17 = vld [vmem:[%s6469_s24 + $0x30] sm:$0xff]  }
 0x96d   :  { %v5582_v18 = vpop.f32.mrb[24].mxu1 }
 0x96e   :  { %v1546_v21 = vpop.f32.mrb[25].mxu1  ;;  %1313 = vmax.xlane.f32.xlu0 %v1312_v20  ;;  %v1555_v24 = vadd.f32 %v5582_v18, %v5008_v19 }
 0x96f   :  { %v5583_v22 = vpop.f32.mrb[26].mxu1  ;;  %v1547_v27 = vadd.f32 %v5008_v19, %v1546_v21 }
 0x970   :  { %v1558_v25 = vadd.f32 %v5583_v22, %v5008_v19  ;;  %v1549_v26 = vpop.f32.mrb[27].mxu1  ;;  %1316 = vmax.xlane.f32.xlu1 %v1315_v23 }
 0x971   :  { %v1550_v28 = vadd.f32 %v5008_v19, %v1549_v26 }
 0x972   :  { %v1638_v29 = vpack.c.bf16 %v1558_v25, %v1555_v24  ;;  %v4998_v24 = vld [vmem:[%s6479_s6 + $0x2] ss:$0 sm:$0xff] }
 0x973   :  { %v1637_v30 = vpack.c.bf16 %v1550_v28, %v1547_v27 }
 0x974   :  { %v1654_v36 = vsel %vm845_vm2, %v1638_v29, 0 }
 0x975   :  { %5888 = vmatprep.subr.msk.bf16.mxu1 %vm845_vm2, %v1637_v30  ;;  %v1651_v35 = vsel %vm845_vm2, %v1637_v30, 0 }
 0x976   :  { %5593 = vmatpush3.bf16.xpose.msra.mxu1 %v1651_v35 }
 0x977   :  { %5889 = vmatprep.subr.msk.bf16.mxu1 %vm845_vm2, %v1638_v29 }
 0x97e   :  { %5595 = vmatpush3.bf16.xpose.msra.mxu1 %v1654_v36 }
 0x97f   :  { %5616 = vmatprep.subr.bf16.mxu1 %v6036_v17 }
 0x9f7   :  { %v1308_v39 = vpop.xlane.xlu0 %1307 }
 0x9f8   :  { %v1318_v40 = vsub.f32 %v1292_v6, %v1308_v39 }
 0x9f9   :  { %v1311_v41 = vpop.xlane.xlu1 %1310 }
 0x9fa   :  { %v1322_v42 = vmul.f32 1.442695, %v1318_v40  ;;  %v1319_v43 = vsub.f32 %v1295_v13, %v1311_v41  ;;  %v6033_v13 = vld [vmem:[%s6464_s19 + $0x28] sm:$0xff]  }
 0x9fb   :  { %v1314_v44 = vpop.xlane.xlu0 %1313 }
 0x9fc   :  { %6124 = vpow2.f32 %v1322_v42  ;;  %v1324_v45 = vmul.f32 1.442695, %v1319_v43  ;;  %v1320_v46 = vsub.f32 %v1300_v12, %v1314_v44 }
 0x9fd   :  { %v1317_v47 = vpop.xlane.xlu1 %1316 }
 0x9fe   :  { %6126 = vpow2.f32 %v1324_v45  ;;  %v1326_v48 = vmul.f32 1.442695, %v1320_v46  ;;  %v1321_v49 = vsub.f32 %v1303_v15, %v1317_v47  ;;  %v6035_v15 = vld [vmem:[%s6474_s30 + $0x28] sm:$0xff]   ;;  %v5018_v46 = vld [vmem:[%s7343_s5 + $0x2] ss:$0 sm:$0xff] }
 0xa00   :  { %6128 = vpow2.f32 %v1326_v48  ;;  %v1328_v50 = vmul.f32 1.442695, %v1321_v49  ;;  %v6037_v48 = vld [vmem:[%s6469_s24 + $0x38] sm:$0xff]   ;;  %s7351_s24 = sld [smem:[#allocation16_spill]] }
 0xa02   :  { %6130 = vpow2.f32 %v1328_v50 }
 0xa06   :  { %v6125_v51 = vpop.eup %6124 }
 0xa07   :  { %v1330_v52 = vsel %vm294_vm1, %v6125_v51, 0.0 }
 0xa08   :  { %v6127_v53 = vpop.eup %6126  ;;  %1331 = vadd.xlane.f32.xlu0 %v1330_v52 }
 0xa09   :  { %v1333_v54 = vsel %vm294_vm1, %v6127_v53, 0.0 }
 0xa0a   :  { %v6129_v55 = vpop.eup %6128  ;;  %1334 = vadd.xlane.f32.xlu1 %v1333_v54 }
 0xa0b   :  { %v1336_v56 = vsel %vm294_vm1, %v6129_v55, 0.0 }
 0xa0c   :  { %v6131_v57 = vpop.eup %6130  ;;  %1337 = vadd.xlane.f32.xlu0 %v1336_v56 }
 0xa0d   :  { %v1339_v58 = vsel %vm294_vm1, %v6131_v57, 0.0 }
 0xa0e   :  { %1340 = vadd.xlane.f32.xlu1 %v1339_v58 }
 0xa95   :  { %v1332_v60 = vpop.xlane.xlu0 %1331 }
 0xa96   :  { %6132 = vrcp.f32 %v1332_v60 }
 0xa97   :  { %v1335_v61 = vpop.xlane.xlu1 %1334 }
 0xa98   :  { %6134 = vrcp.f32 %v1335_v61  ;;  %v5024_v61 = vld [vmem:[%s7344_s9 + $0x48] sm:$0xff] }
 0xa99   :  { %v1338_v62 = vpop.xlane.xlu0 %1337 }
 0xa9a   :  { %6136 = vrcp.f32 %v1338_v62 }
 0xa9b   :  { %v1341_v63 = vpop.xlane.xlu1 %1340 }
 0xa9c   :  { %6138 = vrcp.f32 %v1341_v63 }
 0xaa0   :  { %v6133_v0 = vpop.eup %6132 }
 0xaa1   :  { %v1343_v3 = vmul.f32 %v6133_v0, %v6125_v51  ;;  %v5026_v0 = vld [vmem:[%s7344_s9 + $0x58] sm:$0xff] }
 0xaa2   :  { %v6135_v2 = vpop.eup %6134 }
 0xaa3   :  { %v1345_v4 = vmul.f32 %v6135_v2, %v6127_v53 }
 0xaa4   :  { %v6137_v5 = vpop.eup %6136 }
 0xaa5   :  { %v1350_v6 = vpack.c.bf16 %v1345_v4, %v1343_v3  ;;  %v1347_v8 = vmul.f32 %v6137_v5, %v6129_v55 }
 0xaa6   :  { %v6139_v7 = vpop.eup %6138 }
 0xaa7   :  { %v1349_v10 = vmul.f32 %v6139_v7, %v6131_v57  ;;  %5564 = vmatprep.mubr.msk.bf16.mxu0 %vm294_vm1, %v1350_v6  ;;  %v5023_v57 = vld [vmem:[%s7344_s9 + $0x40] sm:$0xff] }
 0xaa9   :  { %v1351_v12 = vpack.c.bf16 %v1349_v10, %v1347_v8  ;;  %v5046_v10 = vld [vmem:[%s7342_s0 + $0x3] ss:$0 sm:$0xff]  ;;  %s7367_s0 = sld [smem:[#allocation33_spill]] }
 0xaab   :  { %5565 = vmatmul.mubr.msk.bf16.vlgmr.msra.gmra.mrb[20].mxu0 %vm294_vm1, %v1351_v12 }
 0xaac   :  { %5569 = vmatpush3.bf16.msra.mxu0 %v6032_v59  ;;  %5572 = vmatprep.mubr.msk.bf16.mxu0 %vm294_vm1, %v6691_v38  ;;  %v5025_v59 = vld [vmem:[%s7344_s9 + $0x50] sm:$0xff] }
 0xaad   :  { %5570 = vmatprep.subr.bf16.mxu0 %v6033_v13 }
 0xab0   :  { %5571 = vmatpush3.bf16.msra.mxu0 %v6033_v13 }
 0xab1   :  { %5584 = vmatprep.subr.bf16.mxu0 %v6034_v14 }
 0xab3   :  { %5573 = vmatmul.mubr.msk.bf16.vlgmr.msra.gmra.mrb[24].mxu0 %vm294_vm1, %v6689_v37 }
 0xab4   :  { %5585 = vmatpush3.bf16.msra.mxu0 %v6034_v14  ;;  %5588 = vmatprep.mubr.msk.bf16.mxu0 %vm294_vm1, %v6691_v38 }
 0xab5   :  { %5586 = vmatprep.subr.bf16.mxu0 %v6035_v15 }
 0xab8   :  { %5587 = vmatpush3.bf16.msra.mxu0 %v6035_v15 }
 0xabb   :  { %5589 = vmatmul.mubr.msk.bf16.vlgmr.msra.gmra.mrb[28].mxu0 %vm294_vm1, %v6689_v37 }
 0xb7e   :  { %v6802_v18 = vpop.f32.mrb[20].mxu0 }
 0xb7f   :  { %v6804_v19 = vpop.f32.mrb[21].mxu0 }
 0xb80   :  { %v6806_v20 = vpop.f32.mrb[22].mxu0 }
 0xb81   :  { %v5955_v21 = vpack.i.bf16 %v6806_v20, %v6802_v18  ;;  %v6810_v22 = vpop.f32.mrb[23].mxu0 }
 0xb82   :  { %v5950_v23 = vpack.i.bf16 %v6810_v22, %v6804_v19 }
 0xb86   :  { %v5574_v25 = vpop.f32.mrb[24].mxu0 }
 0xb87   :  { %v1477_v26 = vadd.f32 %v5574_v25, %v4998_v24  ;;  %v1468_v27 = vpop.f32.mrb[25].mxu0 }
 0xb88   :  { %v1469_v28 = vadd.f32 %v4998_v24, %v1468_v27  ;;  %v5575_v29 = vpop.f32.mrb[26].mxu0 }
 0xb89   :  { %v1480_v30 = vadd.f32 %v5575_v29, %v4998_v24  ;;  %v1471_v35 = vpop.f32.mrb[27].mxu0  ;;  %v1485_v39 = vmul.f32 0.35355338, %v1477_v26 }
 0xb8a   :  { %v1472_v36 = vadd.f32 %v4998_v24, %v1471_v35  ;;  %v1483_v41 = vmul.f32 0.35355338, %v1469_v28 }
 0xb8b   :  { %v1486_v40 = vmul.f32 0.35355338, %v1480_v30 }
 0xb8c   :  { %v1484_v42 = vmul.f32 0.35355338, %v1472_v36 }
 0xb8d   :  { %v1636_v43 = vpack.c.bf16 %v1486_v40, %v1485_v39 }
 0xb8e   :  { %v1635_v44 = vpack.c.bf16 %v1484_v42, %v1483_v41  ;;  %v5590_v45 = vpop.f32.mrb[28].mxu0 }
 0xb8f   :  { %v1620_v47 = vpop.f32.mrb[29].mxu0  ;;  %v1629_v50 = vadd.f32 %v5590_v45, %v5018_v46 }
 0xb90   :  { %v5591_v49 = vpop.f32.mrb[30].mxu0  ;;  %5596 = vmatprep.mubr.msk.bf16.mxu1 %vm845_vm2, %v1635_v44  ;;  %v1621_v53 = vadd.f32 %v5018_v46, %v1620_v47 }
 0xb91   :  { %v1632_v51 = vadd.f32 %v5591_v49, %v5018_v46  ;;  %v1623_v52 = vpop.f32.mrb[31].mxu0  ;;  %5597 = vmatmul.mubr.msk.bf16.vlgmr.msra.gmra.mrb[28].mxu1 %vm845_vm2, %v1636_v43 }
 0xb92   :  { %v1624_v54 = vadd.f32 %v5018_v46, %v1623_v52  ;;  %5617 = vmatpush3.bf16.msra.mxu1 %v6036_v17  ;;  %5620 = vmatprep.mubr.msk.bf16.mxu1 %vm294_vm1, %v6691_v38 }
 0xb93   :  { %v1752_v55 = vpack.c.bf16 %v1632_v51, %v1629_v50  ;;  %5618 = vmatprep.subr.bf16.mxu1 %v6037_v48 }
 0xb94   :  { %v1751_v56 = vpack.c.bf16 %v1624_v54, %v1621_v53 }
 0xb96   :  { %5600 = vmatprep.subr.bf16.mxu0 %v1751_v56  ;;  %5619 = vmatpush3.bf16.msra.mxu1 %v6037_v48 }
 0xb97   :  { %5601 = vmatpush3.bf16.msra.mxu0 %v1751_v56 }
 0xb98   :  { %5602 = vmatprep.subr.bf16.mxu0 %v1752_v55 }
 0xb99   :  { %5621 = vmatmul.mubr.msk.bf16.vlgmr.msra.gmra.mrb[32].mxu1 %vm294_vm1, %v6689_v37 }
 0xb9b   :  { %5603 = vmatpush3.bf16.msra.mxu0 %v1752_v55 }
 0xc64   :  { %v5598_v58 = vpop.f32.mrb[28].mxu1 }
 0xc65   :  { %v1690_v60 = vpop.f32.mrb[29].mxu1  ;;  %v1699_v3 = vadd.f32 %v5598_v58, %v5025_v59  ;;  %v6038_v58 = vld [vmem:[%s6464_s19 + $0x30] sm:$0xff]  }
 0xc66   :  { %v1691_v62 = vadd.f32 %v5023_v57, %v1690_v60  ;;  %v5599_v63 = vpop.f32.mrb[30].mxu1  ;;  %5608 = vmatprep.subr.bf16.mxu0 %v6038_v58 }
 0xc67   :  { %v1693_v2 = vpop.f32.mrb[31].mxu1  ;;  %v1702_v6 = vadd.f32 %v5599_v63, %v5026_v0  ;;  %v1711_v12 = vsel %vm294_vm1, %v1699_v3, -inf }
 0xc68   :  { %v1694_v4 = vadd.f32 %v5024_v61, %v1693_v2  ;;  %v1705_v5 = vsel %vm294_vm1, %v1691_v62, -inf }
 0xc69   :  { %1706 = vmax.xlane.f32.xlu0 %v1705_v5  ;;  %v1714_v15 = vsel %vm294_vm1, %v1702_v6, -inf }
 0xc6a   :  { %v1708_v7 = vsel %vm294_vm1, %v1694_v4, -inf }
 0xc6b   :  { %1709 = vmax.xlane.f32.xlu1 %v1708_v7 }
 0xc6c   :  { %v5622_v8 = vpop.f32.mrb[32].mxu1 }
 0xc6d   :  { %v1945_v13 = vpop.f32.mrb[33].mxu1  ;;  %1712 = vmax.xlane.f32.xlu0 %v1711_v12  ;;  %v1954_v17 = vadd.f32 %v5622_v8, %v5046_v10  ;;  %v6039_v12 = vld [vmem:[%s6464_s19 + $0x38] sm:$0xff]   ;;  %s7350_s19 = sld [smem:[#allocation17_spill]] }
 0xc6e   :  { %v5623_v14 = vpop.f32.mrb[34].mxu1  ;;  %v1946_v26 = vadd.f32 %v5046_v10, %v1945_v13  ;;  %v6040_v13 = vld [vmem:[%s6474_s30 + $0x30] sm:$0xff]  }
 0xc6f   :  { %v1957_v24 = vadd.f32 %v5623_v14, %v5046_v10  ;;  %v1948_v25 = vpop.f32.mrb[35].mxu1  ;;  %1715 = vmax.xlane.f32.xlu1 %v1714_v15  ;;  %v6041_v14 = vld [vmem:[%s6474_s30 + $0x38] sm:$0xff]   ;;  %s7352_s30 = sld [smem:[#allocation18_spill]] }
 0xc70   :  { %v1949_v27 = vadd.f32 %v5046_v10, %v1948_v25 }
 0xc71   :  { %v2037_v28 = vpack.c.bf16 %v1957_v24, %v1954_v17 }
 0xc72   :  { %v2036_v29 = vpack.c.bf16 %v1949_v27, %v1946_v26 }
 0xc73   :  { %v2053_v35 = vsel %vm845_vm2, %v2037_v28, 0 }
 0xc74   :  { %5890 = vmatprep.subr.msk.bf16.mxu1 %vm845_vm2, %v2036_v29  ;;  %v2050_v30 = vsel %vm845_vm2, %v2036_v29, 0 }
 0xc75   :  { %5633 = vmatpush3.bf16.xpose.msra.mxu1 %v2050_v30 }
 0xc76   :  { %5891 = vmatprep.subr.msk.bf16.mxu1 %vm845_vm2, %v2037_v28 }
 0xc7d   :  { %5635 = vmatpush3.bf16.xpose.msra.mxu1 %v2053_v35 }
 0xcf6   :  { %v1707_v36 = vpop.xlane.xlu0 %1706 }
 0xcf7   :  { %v1717_v39 = vsub.f32 %v1691_v62, %v1707_v36 }
 0xcf8   :  { %v1710_v40 = vpop.xlane.xlu1 %1709 }
 0xcf9   :  { %v1721_v41 = vmul.f32 1.442695, %v1717_v39  ;;  %v1718_v42 = vsub.f32 %v1694_v4, %v1710_v40 }
 0xcfa   :  { %v1713_v43 = vpop.xlane.xlu0 %1712 }
 0xcfb   :  { %6140 = vpow2.f32 %v1721_v41  ;;  %v1723_v44 = vmul.f32 1.442695, %v1718_v42  ;;  %v1719_v45 = vsub.f32 %v1699_v3, %v1713_v43 }
 0xcfc   :  { %v1716_v46 = vpop.xlane.xlu1 %1715 }
 0xcfd   :  { %6142 = vpow2.f32 %v1723_v44  ;;  %v1725_v47 = vmul.f32 1.442695, %v1719_v45  ;;  %v1720_v48 = vsub.f32 %v1702_v6, %v1716_v46 }
 0xcff   :  { %6144 = vpow2.f32 %v1725_v47  ;;  %v1727_v49 = vmul.f32 1.442695, %v1720_v48  ;;  %v5056_v48 = vld [vmem:[%s7343_s5 + $0x3] ss:$0 sm:$0xff] }
 0xd01   :  { %6146 = vpow2.f32 %v1727_v49 }
 0xd05   :  { %v6141_v50 = vpop.eup %6140 }
 0xd06   :  { %v1729_v51 = vsel %vm294_vm1, %v6141_v50, 0.0 }
 0xd07   :  { %v6143_v52 = vpop.eup %6142  ;;  %1730 = vadd.xlane.f32.xlu0 %v1729_v51 }
 0xd08   :  { %v1732_v53 = vsel %vm294_vm1, %v6143_v52, 0.0 }
 0xd09   :  { %v6145_v54 = vpop.eup %6144  ;;  %1733 = vadd.xlane.f32.xlu1 %v1732_v53 }
 0xd0a   :  { %v1735_v55 = vsel %vm294_vm1, %v6145_v54, 0.0 }
 0xd0b   :  { %v6147_v56 = vpop.eup %6146  ;;  %1736 = vadd.xlane.f32.xlu0 %v1735_v55 }
 0xd0c   :  { %v1738_v57 = vsel %vm294_vm1, %v6147_v56, 0.0 }
 0xd0d   :  { %1739 = vadd.xlane.f32.xlu1 %v1738_v57 }
 0xd94   :  { %v1731_v59 = vpop.xlane.xlu0 %1730 }
 0xd95   :  { %6148 = vrcp.f32 %v1731_v59 }
 0xd96   :  { %v1734_v60 = vpop.xlane.xlu1 %1733 }
 0xd97   :  { %6150 = vrcp.f32 %v1734_v60  ;;  %v5063_v60 = vld [vmem:[%s7344_s9 + $0x70] sm:$0xff] }
 0xd98   :  { %v1737_v61 = vpop.xlane.xlu0 %1736 }
 0xd99   :  { %6152 = vrcp.f32 %v1737_v61 }
 0xd9a   :  { %v1740_v62 = vpop.xlane.xlu1 %1739 }
 0xd9b   :  { %6154 = vrcp.f32 %v1740_v62  ;;  %v5062_v62 = vld [vmem:[%s7344_s9 + $0x68] sm:$0xff] }
 0xd9f   :  { %v6149_v63 = vpop.eup %6148 }
 0xda0   :  { %v1742_v2 = vmul.f32 %v6149_v63, %v6141_v50 }
 0xda1   :  { %v6151_v0 = vpop.eup %6150 }
 0xda2   :  { %v1744_v3 = vmul.f32 %v6151_v0, %v6143_v52 }
 0xda3   :  { %v6153_v4 = vpop.eup %6152 }
 0xda4   :  { %v1749_v5 = vpack.c.bf16 %v1744_v3, %v1742_v2  ;;  %v1746_v7 = vmul.f32 %v6153_v4, %v6145_v54  ;;  %v5064_v2 = vld [vmem:[%s7344_s9 + $0x78] sm:$0xff] }
 0xda5   :  { %v6155_v6 = vpop.eup %6154 }
 0xda6   :  { %v1748_v8 = vmul.f32 %v6155_v6, %v6147_v56  ;;  %5604 = vmatprep.mubr.msk.bf16.mxu0 %vm294_vm1, %v1749_v5 }
 0xda8   :  { %v1750_v10 = vpack.c.bf16 %v1748_v8, %v1746_v7 }
 0xdaa   :  { %5605 = vmatmul.mubr.msk.bf16.vlgmr.msra.gmra.mrb[32].mxu0 %vm294_vm1, %v1750_v10 }
 0xdab   :  { %5609 = vmatpush3.bf16.msra.mxu0 %v6038_v58  ;;  %5612 = vmatprep.mubr.msk.bf16.mxu0 %vm294_vm1, %v6691_v38  ;;  %v5061_v58 = vld [vmem:[%s7344_s9 + $0x60] sm:$0xff] }
 0xdac   :  { %5610 = vmatprep.subr.bf16.mxu0 %v6039_v12 }
 0xdaf   :  { %5611 = vmatpush3.bf16.msra.mxu0 %v6039_v12 }
 0xdb0   :  { %5624 = vmatprep.subr.bf16.mxu0 %v6040_v13 }
 0xdb2   :  { %5613 = vmatmul.mubr.msk.bf16.vlgmr.msra.gmra.mrb[36].mxu0 %vm294_vm1, %v6689_v37 }
 0xdb3   :  { %5625 = vmatpush3.bf16.msra.mxu0 %v6040_v13  ;;  %5628 = vmatprep.mubr.msk.bf16.mxu0 %vm294_vm1, %v6691_v38  ;;  %v5036_v38 = vld [vmem:[%s6479_s6 + $0x3] ss:$0 sm:$0xff]  ;;  %s7353_s6 = sld [smem:[#allocation21_spill]] }
 0xdb4   :  { %5626 = vmatprep.subr.bf16.mxu0 %v6041_v14 }
 0xdb7   :  { %5627 = vmatpush3.bf16.msra.mxu0 %v6041_v14 }
 0xdba   :  { %5629 = vmatmul.mubr.msk.bf16.vlgmr.msra.gmra.mrb[40].mxu0 %vm294_vm1, %v6689_v37 }
 0xe7d   :  { %v6854_v15 = vpop.f32.mrb[32].mxu0 }
 0xe7e   :  { %v6856_v17 = vpop.f32.mrb[33].mxu0 }
 0xe7f   :  { %v6858_v24 = vpop.f32.mrb[34].mxu0 }
 0xe80   :  { %v5965_v25 = vpack.i.bf16 %v6858_v24, %v6854_v15  ;;  %v6862_v26 = vpop.f32.mrb[35].mxu0 }
 0xe81   :  { %v5960_v27 = vpack.i.bf16 %v6862_v26, %v6856_v17 }
 0xe85   :  { %v5614_v28 = vpop.f32.mrb[36].mxu0 }
 0xe86   :  { %v1876_v29 = vadd.f32 %v5614_v28, %v5036_v38  ;;  %v1867_v30 = vpop.f32.mrb[37].mxu0 }
 0xe87   :  { %v1868_v37 = vadd.f32 %v5036_v38, %v1867_v30  ;;  %v5615_v35 = vpop.f32.mrb[38].mxu0 }
 0xe88   :  { %v1879_v36 = vadd.f32 %v5615_v35, %v5036_v38  ;;  %v1870_v39 = vpop.f32.mrb[39].mxu0  ;;  %v1884_v41 = vmul.f32 0.35355338, %v1876_v29 }
 0xe89   :  { %v1871_v40 = vadd.f32 %v5036_v38, %v1870_v39  ;;  %v1882_v43 = vmul.f32 0.35355338, %v1868_v37 }
 0xe8a   :  { %v1885_v42 = vmul.f32 0.35355338, %v1879_v36 }
 0xe8b   :  { %v1883_v44 = vmul.f32 0.35355338, %v1871_v40 }
 0xe8c   :  { %v2035_v45 = vpack.c.bf16 %v1885_v42, %v1884_v41 }
 0xe8d   :  { %v2034_v46 = vpack.c.bf16 %v1883_v44, %v1882_v43  ;;  %v5630_v47 = vpop.f32.mrb[40].mxu0 }
 0xe8e   :  { %v2019_v49 = vpop.f32.mrb[41].mxu0  ;;  %v2028_v51 = vadd.f32 %v5630_v47, %v5056_v48 }
 0xe8f   :  { %v5631_v50 = vpop.f32.mrb[42].mxu0  ;;  %5636 = vmatprep.mubr.msk.bf16.mxu1 %vm845_vm2, %v2034_v46  ;;  %v2020_v54 = vadd.f32 %v5056_v48, %v2019_v49 }
 0xe90   :  { %v2031_v52 = vadd.f32 %v5631_v50, %v5056_v48  ;;  %v2022_v53 = vpop.f32.mrb[43].mxu0  ;;  %5637 = vmatmul.mubr.msk.bf16.vlgmr.msra.gmra.mrb[36].mxu1 %vm845_vm2, %v2035_v45 }
 0xe91   :  { %v2023_v55 = vadd.f32 %v5056_v48, %v2022_v53  ;;  %v6043_v53 = vld [vmem:[%s7345_s21 + $0x8] sm:$0xff]  }
 0xe92   :  { %v2151_v56 = vpack.c.bf16 %v2031_v52, %v2028_v51 }
 0xe93   :  { %v2150_v57 = vpack.c.bf16 %v2023_v55, %v2020_v54 }
 0xe95   :  { %5640 = vmatprep.subr.bf16.mxu0 %v2150_v57 }
 0xe96   :  { %5641 = vmatpush3.bf16.msra.mxu0 %v2150_v57 }
 0xe97   :  { %5642 = vmatprep.subr.bf16.mxu0 %v2151_v56 }
 0xe9a   :  { %5643 = vmatpush3.bf16.msra.mxu0 %v2151_v56 }
 0xf63   :  { %v5638_v59 = vpop.f32.mrb[36].mxu1 }
 0xf64   :  { %v2089_v61 = vpop.f32.mrb[37].mxu1  ;;  %v2098_v4 = vadd.f32 %v5638_v59, %v5063_v60 }
 0xf65   :  { %v2090_v63 = vadd.f32 %v5061_v58, %v2089_v61  ;;  %v5639_v0 = vpop.f32.mrb[38].mxu1 }
 0xf66   :  { %v2092_v3 = vpop.f32.mrb[39].mxu1  ;;  %v2101_v7 = vadd.f32 %v5639_v0, %v5064_v2  ;;  %v2110_v10 = vsel %vm294_vm1, %v2098_v4, -inf }
 0xf67   :  { %v2093_v5 = vadd.f32 %v5062_v62, %v2092_v3  ;;  %v2104_v6 = vsel %vm294_vm1, %v2090_v63, -inf }
 0xf68   :  { %2105 = vmax.xlane.f32.xlu0 %v2104_v6  ;;  %v2113_v12 = vsel %vm294_vm1, %v2101_v7, -inf }
 0xf69   :  { %v2107_v8 = vsel %vm294_vm1, %v2093_v5, -inf }
 0xf6a   :  { %2108 = vmax.xlane.f32.xlu1 %v2107_v8 }
 0xf6c   :  { %2111 = vmax.xlane.f32.xlu0 %v2110_v10 }
 0xf6e   :  { %2114 = vmax.xlane.f32.xlu1 %v2113_v12 }
 0xff5   :  { %v2106_v13 = vpop.xlane.xlu0 %2105 }
 0xff6   :  { %v2116_v14 = vsub.f32 %v2090_v63, %v2106_v13 }
 0xff7   :  { %v2109_v38 = vpop.xlane.xlu1 %2108 }
 0xff8   :  { %v2120_v28 = vmul.f32 1.442695, %v2116_v14  ;;  %v2117_v29 = vsub.f32 %v2093_v5, %v2109_v38 }
 0xff9   :  { %v2112_v30 = vpop.xlane.xlu0 %2111 }
 0xffa   :  { %6156 = vpow2.f32 %v2120_v28  ;;  %v2122_v37 = vmul.f32 1.442695, %v2117_v29  ;;  %v2118_v35 = vsub.f32 %v2098_v4, %v2112_v30 }
 0xffb   :  { %v2115_v36 = vpop.xlane.xlu1 %2114 }
 0xffc   :  { %6158 = vpow2.f32 %v2122_v37  ;;  %v2124_v39 = vmul.f32 1.442695, %v2118_v35  ;;  %v2119_v40 = vsub.f32 %v2101_v7, %v2115_v36 }
 0xffe   :  { %6160 = vpow2.f32 %v2124_v39  ;;  %v2126_v41 = vmul.f32 1.442695, %v2119_v40 }
0x1000   :  { %6162 = vpow2.f32 %v2126_v41 }
0x1004   :  { %v6157_v42 = vpop.eup %6156 }
0x1005   :  { %v2128_v43 = vsel %vm294_vm1, %v6157_v42, 0.0 }
0x1006   :  { %v6159_v44 = vpop.eup %6158  ;;  %2129 = vadd.xlane.f32.xlu0 %v2128_v43 }
0x1007   :  { %v2131_v45 = vsel %vm294_vm1, %v6159_v44, 0.0 }
0x1008   :  { %v6161_v46 = vpop.eup %6160  ;;  %2132 = vadd.xlane.f32.xlu1 %v2131_v45 }
0x1009   :  { %v2134_v47 = vsel %vm294_vm1, %v6161_v46, 0.0 }
0x100a   :  { %v6163_v48 = vpop.eup %6162  ;;  %2135 = vadd.xlane.f32.xlu0 %v2134_v47 }
0x100b   :  { %v2137_v49 = vsel %vm294_vm1, %v6163_v48, 0.0 }
0x100c   :  { %2138 = vadd.xlane.f32.xlu1 %v2137_v49 }
0x101d   :  { %5956 = vrot.lane.b32.xlu1 %v5955_v21, %s6401_s13 }
0x1020   :  { %5951 = vrot.lane.b32.xlu0 %v5950_v23, %s6401_s13 }
0x1021   :  { %5961 = vrot.lane.b32.xlu1 %v5960_v27, %s6402_s17 }
0x1025   :  { %5966 = vrot.lane.b32.xlu1 %v5965_v25, %s6402_s17  ;;  %v6042_v25 = vld [vmem:[%s7345_s21] sm:$0xff]  }
0x1026   :  { %5648 = vmatprep.subr.bf16.mxu0 %v6042_v25 }
0x1093   :  { %v2130_v50 = vpop.xlane.xlu0 %2129 }
0x1094   :  { %6164 = vrcp.f32 %v2130_v50 }
0x1095   :  { %v2133_v18 = vpop.xlane.xlu1 %2132 }
0x1096   :  { %6166 = vrcp.f32 %v2133_v18 }
0x1097   :  { %v2136_v20 = vpop.xlane.xlu0 %2135 }
0x1098   :  { %6168 = vrcp.f32 %v2136_v20 }
0x1099   :  { %v2139_v19 = vpop.xlane.xlu1 %2138 }
0x109a   :  { %6170 = vrcp.f32 %v2139_v19 }
0x109b   :  { %v5952_v62 = vpop.permute.xlu0 %5951 }
0x109c   :  { %v5954_v0 = vunpack.i.h.bf16 %v5952_v62  ;;  %v5953_v2 = vunpack.i.l.bf16 %v5952_v62 }
0x109d   :  { %v5957_v60 = vpop.permute.xlu1 %5956 }
0x109e   :  { %v6165_v21 = vpop.eup %6164  ;;  %v5959_v3 = vunpack.i.h.bf16 %v5957_v60  ;;  %v5958_v4 = vunpack.i.l.bf16 %v5957_v60  ;;  %v2256_v10 = vsel %vm845_vm2, %v6759_v34, %v5954_v0  ;;  %v2255_v12 = vsel %vm845_vm2, %v6755_v32, %v5953_v2  ;;  %v6044_v2 = vld [vmem:[%s7347_s3] sm:$0xff]  }
0x109f   :  { %v2141_v23 = vmul.f32 %v6165_v21, %v6157_v42  ;;  %5656 = vmatprep.subr.bf16.mxu1 %v6044_v2 }
0x10a0   :  { %v6167_v22 = vpop.eup %6166  ;;  %v2258_v14 = vsel %vm845_vm2, %v6757_v33, %v5959_v3  ;;  %v2257_v38 = vsel %vm845_vm2, %v6753_v31, %v5958_v4  ;;  %5657 = vmatpush3.bf16.msra.mxu1 %v6044_v2  ;;  %v6045_v3 = vld [vmem:[%s7347_s3 + $0x8] sm:$0xff]  }
0x10a1   :  { %v2143_v17 = vmul.f32 %v6167_v22, %v6159_v44  ;;  %v5962_v61 = vpop.permute.xlu1 %5961  ;;  %v5069_v44 = vld [vmem:[%s7346_s29] ss:$0 sm:$0xff]  ;;  %5658 = vmatprep.subr.bf16.mxu1 %v6045_v3 }
0x10a2   :  { %v6169_v26 = vpop.eup %6168  ;;  %v5964_v7 = vunpack.i.h.bf16 %v5962_v61  ;;  %v5963_v8 = vunpack.i.l.bf16 %v5962_v61 }
0x10a3   :  { %v2148_v27 = vpack.c.bf16 %v2143_v17, %v2141_v23  ;;  %v2145_v52 = vmul.f32 %v6169_v26, %v6161_v46 }
0x10a4   :  { %v6171_v51 = vpop.eup %6170  ;;  %v2260_v32 = vsel %vm2259_vm3, %v2255_v12, %v5963_v8  ;;  %v2261_v39 = vsel %vm2259_vm3, %v2256_v10, %v5964_v7  ;;  %5659 = vmatpush3.bf16.msra.mxu1 %v6045_v3 }
0x10a5   :  { %v2147_v15 = vmul.f32 %v6171_v51, %v6163_v48  ;;  %5644 = vmatprep.mubr.msk.bf16.mxu0 %vm294_vm1, %v2148_v27  ;;  %v5967_v63 = vpop.permute.xlu1 %5966 }
0x10a6   :  { %v5969_v5 = vunpack.i.h.bf16 %v5967_v63  ;;  %v5968_v6 = vunpack.i.l.bf16 %v5967_v63 }
0x10a7   :  { %v2149_v24 = vpack.c.bf16 %v2147_v15, %v2145_v52 }
0x10a8   :  { %v2262_v37 = vsel %vm2259_vm3, %v2257_v38, %v5968_v6  ;;  %v2263_v34 = vsel %vm2259_vm3, %v2258_v14, %v5969_v5 }
0x10a9   :  { %5645 = vmatmul.mubr.msk.bf16.vlgmr.msra.gmra.mrb[44].mxu0 %vm294_vm1, %v2149_v24 }
0x10aa   :  { %5649 = vmatpush3.bf16.msra.mxu0 %v6042_v25 }
0x10ab   :  { %5650 = vmatprep.subr.bf16.mxu0 %v6043_v53 }
0x10ae   :  { %5651 = vmatpush3.bf16.msra.mxu0 %v6043_v53 }
0x117c   :  { %v5646_v54 = vpop.f32.mrb[44].mxu0 }
0x117d   :  { %v2192_v55 = vpop.f32.mrb[45].mxu0 }
0x117e   :  { %v5647_v56 = vpop.f32.mrb[46].mxu0 }
0x117f   :  { %v5975_v57 = vpack.i.bf16 %v5647_v56, %v5646_v54  ;;  %v2195_v58 = vpop.f32.mrb[47].mxu0 }
0x1180   :  { %v5970_v59 = vpack.i.bf16 %v2195_v58, %v2192_v55 }
0x1181   :  { %5976 = vrot.lane.b32.xlu1 %v5975_v57, %s6403_s25 }
0x1182   :  { %5971 = vrot.lane.b32.xlu0 %v5970_v59, %s6403_s25 }
0x11f3   :  { %v5977_v13 = vpop.permute.xlu1 %5976 }
0x11f4   :  { %v5979_v28 = vunpack.i.h.bf16 %v5977_v13  ;;  %v5978_v29 = vunpack.i.l.bf16 %v5977_v13  ;;  %v5972_v30 = vpop.permute.xlu0 %5971 }
0x11f5   :  { %v5974_v35 = vunpack.i.h.bf16 %v5972_v30  ;;  %v5973_v36 = vunpack.i.l.bf16 %v5972_v30 }
0x11f6   :  { %v2268_v40 = vsel %vm2264_vm4, %v2263_v34, %v5979_v28  ;;  %v2267_v33 = vsel %vm2264_vm4, %v2262_v37, %v5978_v29  ;;  %v5074_v37 = vld [vmem:[%s7348_s8] ss:$0 sm:$0xff] }
0x11f7   :  { %v2270_v41 = vpack.c.bf16 %v2268_v40, %v2267_v33  ;;  %v2265_v31 = vsel %vm2264_vm4, %v2260_v32, %v5973_v36  ;;  %v2266_v42 = vsel %vm2264_vm4, %v2261_v39, %v5974_v35  ;;  %v5075_v40 = vld [vmem:[%s7349_s14] ss:$0 sm:$0xff] }
0x11f8   :  { %v2269_v43 = vpack.c.bf16 %v2266_v42, %v2265_v31 }
0x11fa   :  { %5652 = vmatprep.mubr.msk.bf16.mxu0 %vm294_vm1, %v2269_v43 }
0x11fb   :  { %5653 = vmatmul.mubr.msk.bf16.vlgmr.msra.gmra.mrb[48].mxu0 %vm294_vm1, %v2270_v41 }
0x12ce   :  { %v5654_v45 = vpop.f32.mrb[48].mxu0 }
0x12cf   :  { %v2334_v46 = vpop.f32.mrb[49].mxu0  ;;  %v2343_v47 = vadd.f32 %v5654_v45, %v5069_v44 }
0x12d0   :  { %v2335_v48 = vadd.f32 %v5069_v44, %v2334_v46  ;;  %v5655_v49 = vpop.f32.mrb[50].mxu0 }
0x12d1   :  { %v2337_v50 = vpop.f32.mrb[51].mxu0  ;;  %v6927_v19 = vadd.f32 %v2343_v47, %v6654_v11  ;;  %v2346_v21 = vadd.f32 %v5655_v49, %v5069_v44 }
0x12d2   :  { %v6924_v18 = vadd.f32 %v2335_v48, %v6648_v1  ;;  %v2338_v20 = vadd.f32 %v5069_v44, %v2337_v50 }
0x12d3   :  { %v6937_v26 = vadd.f32 %v2346_v21, %v6660_v16  ;;  %v2361_v1 = vsel %vm294_vm1, %v6927_v19, 0.0  ;;  %v6047_v21 = vld [vmem:[%s7350_s19 + $0x8] sm:$0xff]  }
0x12d4   :  { %v6930_v22 = vadd.f32 %v2338_v20, %v6652_v9  ;;  %v2355_v23 = vsel %vm294_vm1, %v6924_v18, 0.0  ;;  %v6046_v20 = vld [vmem:[%s7350_s19] sm:$0xff]  }
0x12d5   :  { %2356 = vadd.xlane.f32.xlu0 %v2355_v23  ;;  %v2364_v11 = vsel %vm294_vm1, %v6937_v26, 0.0  ;;  %5664 = vmatprep.subr.bf16.mxu0 %v6046_v20  ;;  %v6048_v23 = vld [vmem:[%s7350_s19 + $0x10] sm:$0xff]  }
0x12d6   :  { %v2358_v17 = vsel %vm294_vm1, %v6930_v22, 0.0  ;;  %5665 = vmatpush3.bf16.msra.mxu0 %v6046_v20 }
0x12d7   :  { %2359 = vadd.xlane.f32.xlu1 %v2358_v17  ;;  %5666 = vmatprep.subr.bf16.mxu0 %v6047_v21  ;;  %v6049_v17 = vld [vmem:[%s7350_s19 + $0x18] sm:$0xff]  }
0x12d9   :  { %2362 = vadd.xlane.f32.xlu0 %v2361_v1  ;;  %v6050_v1 = vld [vmem:[%s7350_s19 + $0x20] sm:$0xff]  }
0x12da   :  { %5667 = vmatpush3.bf16.msra.mxu0 %v6047_v21 }
0x12db   :  { %5668 = vmatprep.subr.bf16.mxu0 %v6048_v23 }
0x12dd   :  { %2365 = vadd.xlane.f32.xlu0 %v2364_v11  ;;  %v6051_v11 = vld [vmem:[%s7350_s19 + $0x28] sm:$0xff]  }
0x12de   :  { %5669 = vmatpush3.bf16.msra.mxu0 %v6048_v23 }
0x12df   :  { %5670 = vmatprep.subr.bf16.mxu0 %v6049_v17 }
0x12e2   :  { %5671 = vmatpush3.bf16.msra.mxu0 %v6049_v17 }
0x12e3   :  { %5672 = vmatprep.subr.bf16.mxu0 %v6050_v1 }
0x12e6   :  { %5673 = vmatpush3.bf16.msra.mxu0 %v6050_v1 }
0x12e7   :  { %5674 = vmatprep.subr.bf16.mxu0 %v6051_v11 }
0x12ea   :  { %5675 = vmatpush3.bf16.msra.mxu0 %v6051_v11 }
0x1362   :  { %v2357_v9 = vpop.xlane.xlu0 %2356 }
0x1363   :  { %v2367_v27 = vmul.f32 0.03125, %v2357_v9  ;;  %v6052_v9 = vld [vmem:[%s7350_s19 + $0x30] sm:$0xff]  }
0x1364   :  { %v2360_v51 = vpop.xlane.xlu1 %2359  ;;  %5676 = vmatprep.subr.bf16.mxu0 %v6052_v9 }
0x1365   :  { %v2371_v52 = vsub.f32 %v6924_v18, %v2367_v27  ;;  %v2368_v15 = vmul.f32 0.03125, %v2360_v51  ;;  %5677 = vmatpush3.bf16.msra.mxu0 %v6052_v9  ;;  %v6053_v27 = vld [vmem:[%s7350_s19 + $0x38] sm:$0xff]   ;;  %v5076_v51 = vld [vmem:[%s7351_s24] ss:$0 sm:$0xff] }
0x1366   :  { %v2363_v24 = vpop.xlane.xlu0 %2362  ;;  %5678 = vmatprep.subr.bf16.mxu0 %v6053_v27 }
0x1367   :  { %v2372_v25 = vsub.f32 %v6930_v22, %v2368_v15  ;;  %v2369_v53 = vmul.f32 0.03125, %v2363_v24  ;;  %v2375_v16 = vmul.f32 %v2371_v52, %v2371_v52 }
0x1369   :  { %v2373_v54 = vsub.f32 %v6927_v19, %v2369_v53  ;;  %v2379_v55 = vsel %vm294_vm1, %v2375_v16, 0.0  ;;  %v2376_v56 = vmul.f32 %v2372_v25, %v2372_v25  ;;  %5679 = vmatpush3.bf16.msra.mxu0 %v6053_v27 }
0x136a   :  { %2380 = vadd.xlane.f32.xlu0 %v2379_v55  ;;  %v2366_v57 = vpop.xlane.xlu0 %2365 }
0x136b   :  { %v2370_v58 = vmul.f32 0.03125, %v2366_v57  ;;  %v2382_v59 = vsel %vm294_vm1, %v2376_v56, 0.0  ;;  %v2377_v60 = vmul.f32 %v2373_v54, %v2373_v54 }
0x136c   :  { %2383 = vadd.xlane.f32.xlu1 %v2382_v59 }
0x136d   :  { %v2374_v61 = vsub.f32 %v6937_v26, %v2370_v58  ;;  %v2385_v62 = vsel %vm294_vm1, %v2377_v60, 0.0 }
0x136e   :  { %2386 = vadd.xlane.f32.xlu0 %v2385_v62 }
0x136f   :  { %v2378_v63 = vmul.f32 %v2374_v61, %v2374_v61 }
0x1371   :  { %v2388_v0 = vsel %vm294_vm1, %v2378_v63, 0.0 }
0x1372   :  { %2389 = vadd.xlane.f32.xlu1 %v2388_v0 }
0x13f7   :  { %v2381_v4 = vpop.xlane.xlu0 %2380 }
0x13f8   :  { %v2391_v5 = vmul.f32 0.03125, %v2381_v4 }
0x13f9   :  { %v2384_v6 = vpop.xlane.xlu1 %2383 }
0x13fa   :  { %v2395_v7 = vadd.f32 1e-05, %v2391_v5  ;;  %v2392_v8 = vmul.f32 0.03125, %v2384_v6 }
0x13fb   :  { %v2387_v10 = vpop.xlane.xlu0 %2386 }
0x13fc   :  { %6172 = vrsqrt.f32 %v2395_v7  ;;  %v2396_v12 = vadd.f32 1e-05, %v2392_v8  ;;  %v2393_v13 = vmul.f32 0.03125, %v2387_v10 }
0x13fe   :  { %6174 = vrsqrt.f32 %v2396_v12  ;;  %v2397_v14 = vadd.f32 1e-05, %v2393_v13 }
0x13ff   :  { %v2390_v38 = vpop.xlane.xlu1 %2389 }
0x1400   :  { %6176 = vrsqrt.f32 %v2397_v14  ;;  %v2394_v28 = vmul.f32 0.03125, %v2390_v38 }
0x1402   :  { %v2398_v29 = vadd.f32 1e-05, %v2394_v28 }
0x1404   :  { %6178 = vrsqrt.f32 %v2398_v29 }
0x1406   :  { %v6173_v30 = vpop.eup %6172 }
0x1407   :  { %v2403_v34 = vmul.f32 %v6173_v30, %v2371_v52 }
0x1408   :  { %v6175_v35 = vpop.eup %6174 }
0x1409   :  { %v2404_v36 = vmul.f32 %v6175_v35, %v2372_v25  ;;  %v2413_v32 = vmul.f32 %v5074_v37, %v2403_v34 }
0x140a   :  { %v6177_v39 = vpop.eup %6176 }
0x140b   :  { %v2405_v33 = vmul.f32 %v6177_v39, %v2373_v54  ;;  %v2414_v41 = vmul.f32 %v5074_v37, %v2404_v36  ;;  %v2423_v31 = vadd.f32 %v5075_v40, %v2413_v32 }
0x140d   :  { %v2424_v42 = vadd.f32 %v5075_v40, %v2414_v41  ;;  %v2415_v44 = vmul.f32 %v5074_v37, %v2405_v33 }
0x140e   :  { %v6179_v43 = vpop.eup %6178 }
0x140f   :  { %v2406_v45 = vmul.f32 %v6179_v43, %v2374_v61  ;;  %v2427_v46 = vpack.c.bf16 %v2424_v42, %v2423_v31  ;;  %v2425_v48 = vadd.f32 %v5075_v40, %v2415_v44 }
0x1411   :  { %v2416_v47 = vmul.f32 %v5074_v37, %v2406_v45  ;;  %5660 = vmatprep.mubr.msk.bf16.mxu1 %vm294_vm1, %v2427_v46  ;;  %v5081_v46 = vld [vmem:[%s7352_s30] ss:$0 sm:$0xff] }
0x1413   :  { %v2426_v49 = vadd.f32 %v5075_v40, %v2416_v47 }
0x1415   :  { %v2428_v50 = vpack.c.bf16 %v2426_v49, %v2425_v48 }
0x1417   :  { %5661 = vmatmul.mubr.msk.bf16.vlgmr.msra.gmra.mrb[40].mxu1 %vm294_vm1, %v2428_v50 }
0x14ea   :  { %v5662_v52 = vpop.f32.mrb[40].mxu1 }
0x14eb   :  { %v2501_v15 = vadd.f32 %v5662_v52, %v5076_v51  ;;  %v2492_v24 = vpop.f32.mrb[41].mxu1 }
0x14ec   :  { %v2493_v25 = vadd.f32 %v5076_v51, %v2492_v24  ;;  %v5663_v53 = vpop.f32.mrb[42].mxu1 }
0x14ed   :  { %v2509_v16 = vmul.f32 %v2501_v15, %v2501_v15  ;;  %v2504_v54 = vadd.f32 %v5663_v53, %v5076_v51  ;;  %v2495_v55 = vpop.f32.mrb[43].mxu1 }
0x14ee   :  { %v2507_v56 = vmul.f32 %v2493_v25, %v2493_v25  ;;  %v2496_v57 = vadd.f32 %v5076_v51, %v2495_v55 }
0x14ef   :  { %v2513_v58 = vmul.f32 %v2509_v16, %v2501_v15  ;;  %v2510_v59 = vmul.f32 %v2504_v54, %v2504_v54 }
0x14f0   :  { %v2511_v60 = vmul.f32 %v2507_v56, %v2493_v25  ;;  %v2508_v61 = vmul.f32 %v2496_v57, %v2496_v57 }
0x14f1   :  { %v2517_v62 = vmul.f32 0.044715, %v2513_v58  ;;  %v2514_v63 = vmul.f32 %v2510_v59, %v2504_v54 }
0x14f2   :  { %v2515_v0 = vmul.f32 0.044715, %v2511_v60  ;;  %v2512_v2 = vmul.f32 %v2508_v61, %v2496_v57 }
0x14f3   :  { %v2521_v3 = vadd.f32 %v2517_v62, %v2501_v15  ;;  %v2518_v4 = vmul.f32 0.044715, %v2514_v63 }
0x14f4   :  { %v2519_v5 = vadd.f32 %v2515_v0, %v2493_v25  ;;  %v2516_v6 = vmul.f32 0.044715, %v2512_v2 }
0x14f5   :  { %v2525_v7 = vmul.f32 0.7978846, %v2521_v3  ;;  %v2522_v8 = vadd.f32 %v2518_v4, %v2504_v54  ;;  %v6054_v4 = vld [vmem:[%s7353_s6] sm:$0xff]  }
0x14f6   :  { %v2523_v10 = vmul.f32 0.7978846, %v2519_v5  ;;  %v2520_v12 = vadd.f32 %v2516_v6, %v2496_v57  ;;  %5684 = vmatprep.subr.bf16.mxu1 %v6054_v4  ;;  %v6055_v5 = vld [vmem:[%s7353_s6 + $0x8] sm:$0xff]   ;;  %v6056_v6 = vld [vmem:[%s7354_s4] sm:$0xff]  }
0x14f7   :  { %6180 = vtanh.f32 %v2525_v7  ;;  %v2526_v13 = vmul.f32 0.7978846, %v2522_v8  ;;  %5685 = vmatpush3.bf16.msra.mxu1 %v6054_v4 }
0x14f8   :  { %6182 = vtanh.f32 %v2523_v10  ;;  %v2524_v14 = vmul.f32 0.7978846, %v2520_v12  ;;  %5686 = vmatprep.subr.bf16.mxu1 %v6055_v5 }
0x14f9   :  { %6184 = vtanh.f32 %v2526_v13 }
0x14fa   :  { %6186 = vtanh.f32 %v2524_v14 }
0x14fb   :  { %5687 = vmatpush3.bf16.msra.mxu1 %v6055_v5 }
0x14fc   :  { %5692 = vmatprep.subr.bf16.mxu1 %v6056_v6 }
0x1501   :  { %v6181_v38 = vpop.eup %6180 }
0x1502   :  { %v6183_v28 = vpop.eup %6182  ;;  %v2533_v29 = vadd.f32 1.0, %v6181_v38 }
0x1503   :  { %v6185_v30 = vpop.eup %6184  ;;  %v2531_v37 = vadd.f32 1.0, %v6183_v28 }
0x1504   :  { %v6187_v34 = vpop.eup %6186  ;;  %v2537_v35 = vmul.f32 0.5, %v2533_v29  ;;  %v2534_v36 = vadd.f32 1.0, %v6185_v30 }
0x1505   :  { %v2532_v32 = vadd.f32 1.0, %v6187_v34  ;;  %v2535_v39 = vmul.f32 0.5, %v2531_v37 }
0x1506   :  { %v2538_v40 = vmul.f32 0.5, %v2534_v36  ;;  %v2541_v41 = vmul.f32 %v2537_v35, %v2501_v15  ;;  %v5090_v36 = vld [vmem:[%s7355_s2] ss:$0 sm:$0xff] }
0x1507   :  { %v2536_v33 = vmul.f32 0.5, %v2532_v32  ;;  %v2539_v42 = vmul.f32 %v2535_v39, %v2493_v25 }
0x1508   :  { %v2542_v31 = vmul.f32 %v2538_v40, %v2504_v54 }
0x1509   :  { %v2540_v43 = vmul.f32 %v2536_v33, %v2496_v57 }
0x150a   :  { %v2544_v44 = vpack.c.bf16 %v2542_v31, %v2541_v41  ;;  %v5091_v31 = vld [vmem:[%s7356_s10] ss:$0 sm:$0xff] }
0x150b   :  { %v2543_v45 = vpack.c.bf16 %v2540_v43, %v2539_v42 }
0x150d   :  { %5680 = vmatprep.mubr.bf16.mxu0 %v2543_v45 }
0x150e   :  { %5681 = vmatmul.mubr.bf16.vlgmr.msra.gmra.mrb[52].mxu0 %v2544_v44 }
0x15e1   :  { %v5682_v47 = vpop.f32.mrb[52].mxu0 }
0x15e2   :  { %v2650_v48 = vpop.f32.mrb[53].mxu0  ;;  %v2659_v49 = vadd.f32 %v5682_v47, %v5081_v46 }
0x15e3   :  { %v2651_v50 = vadd.f32 %v5081_v46, %v2650_v48  ;;  %v5683_v20 = vpop.f32.mrb[54].mxu0 }
0x15e4   :  { %v2653_v21 = vpop.f32.mrb[55].mxu0  ;;  %v2662_v17 = vadd.f32 %v5683_v20, %v5081_v46  ;;  %v6971_v11 = vadd.f32 %v2659_v49, %v6927_v19 }
0x15e5   :  { %v6968_v23 = vadd.f32 %v2651_v50, %v6924_v18  ;;  %v2654_v1 = vadd.f32 %v5081_v46, %v2653_v21 }
0x15e6   :  { %v6979_v51 = vadd.f32 %v2662_v17, %v6937_v26  ;;  %v2677_v18 = vsel %vm294_vm1, %v6971_v11, 0.0 }
0x15e7   :  { %v6974_v9 = vadd.f32 %v2654_v1, %v6930_v22  ;;  %v2671_v27 = vsel %vm294_vm1, %v6968_v23, 0.0  ;;  %v6057_v1 = vld [vmem:[%s7354_s4 + $0x8] sm:$0xff]  }
0x15e8   :  { %2672 = vadd.xlane.f32.xlu0 %v2671_v27  ;;  %v2680_v19 = vsel %vm294_vm1, %v6979_v51, 0.0  ;;  %v6058_v27 = vld [vmem:[%s7357_s7] sm:$0xff]  }
0x15e9   :  { %v2674_v52 = vsel %vm294_vm1, %v6974_v9, 0.0 }
0x15ea   :  { %2675 = vadd.xlane.f32.xlu1 %v2674_v52  ;;  %v6059_v52 = vld [vmem:[%s7357_s7 + $0x8] sm:$0xff]  }
0x15ec   :  { %2678 = vadd.xlane.f32.xlu0 %v2677_v18  ;;  %v5092_v18 = vld [vmem:[%s7358_s11] ss:$0 sm:$0xff] }
0x15ee   :  { %2681 = vadd.xlane.f32.xlu1 %v2680_v19 }
0x1675   :  { %v2673_v22 = vpop.xlane.xlu0 %2672 }
0x1676   :  { %v2683_v15 = vmul.f32 0.03125, %v2673_v22 }
0x1677   :  { %v2676_v24 = vpop.xlane.xlu1 %2675 }
0x1678   :  { %v2687_v25 = vsub.f32 %v6968_v23, %v2683_v15  ;;  %v2684_v53 = vmul.f32 0.03125, %v2676_v24 }
0x1679   :  { %v2679_v26 = vpop.xlane.xlu0 %2678 }
0x167a   :  { %v2688_v16 = vsub.f32 %v6974_v9, %v2684_v53  ;;  %v2685_v54 = vmul.f32 0.03125, %v2679_v26  ;;  %v2691_v55 = vmul.f32 %v2687_v25, %v2687_v25 }
0x167b   :  { %v2682_v56 = vpop.xlane.xlu1 %2681 }
0x167c   :  { %v2689_v57 = vsub.f32 %v6971_v11, %v2685_v54  ;;  %v2686_v58 = vmul.f32 0.03125, %v2682_v56  ;;  %v2695_v59 = vsel %vm294_vm1, %v2691_v55, 0.0  ;;  %v2692_v60 = vmul.f32 %v2688_v16, %v2688_v16 }
0x167d   :  { %2696 = vadd.xlane.f32.xlu0 %v2695_v59 }
0x167e   :  { %v2690_v61 = vsub.f32 %v6979_v51, %v2686_v58  ;;  %v2698_v62 = vsel %vm294_vm1, %v2692_v60, 0.0  ;;  %v2693_v63 = vmul.f32 %v2689_v57, %v2689_v57 }
0x167f   :  { %2699 = vadd.xlane.f32.xlu1 %v2698_v62 }
0x1680   :  { %v2701_v0 = vsel %vm294_vm1, %v2693_v63, 0.0  ;;  %v2694_v2 = vmul.f32 %v2690_v61, %v2690_v61 }
0x1681   :  { %2702 = vadd.xlane.f32.xlu0 %v2701_v0 }
0x1682   :  { %v2704_v3 = vsel %vm294_vm1, %v2694_v2, 0.0 }
0x1683   :  { %2705 = vadd.xlane.f32.xlu1 %v2704_v3 }
0x170a   :  { %v2697_v7 = vpop.xlane.xlu0 %2696 }
0x170b   :  { %v2707_v8 = vmul.f32 0.03125, %v2697_v7 }
0x170c   :  { %v2700_v10 = vpop.xlane.xlu1 %2699 }
0x170d   :  { %v2711_v12 = vadd.f32 1e-05, %v2707_v8  ;;  %v2708_v13 = vmul.f32 0.03125, %v2700_v10  ;;  %v5102_v10 = vld [vmem:[%s7360_s15] ss:$0 sm:$0xff] }
0x170e   :  { %v2703_v14 = vpop.xlane.xlu0 %2702 }
0x170f   :  { %6188 = vrsqrt.f32 %v2711_v12  ;;  %v2712_v38 = vadd.f32 1e-05, %v2708_v13  ;;  %v2709_v28 = vmul.f32 0.03125, %v2703_v14 }
0x1710   :  { %v2706_v29 = vpop.xlane.xlu1 %2705 }
0x1711   :  { %6190 = vrsqrt.f32 %v2712_v38  ;;  %v2713_v30 = vadd.f32 1e-05, %v2709_v28  ;;  %v2710_v37 = vmul.f32 0.03125, %v2706_v29 }
0x1713   :  { %6192 = vrsqrt.f32 %v2713_v30  ;;  %v2714_v34 = vadd.f32 1e-05, %v2710_v37 }
0x1715   :  { %6194 = vrsqrt.f32 %v2714_v34 }
0x1719   :  { %v6189_v35 = vpop.eup %6188 }
0x171a   :  { %v2719_v32 = vmul.f32 %v6189_v35, %v2687_v25 }
0x171b   :  { %v6191_v39 = vpop.eup %6190 }
0x171c   :  { %v2729_v40 = vmul.f32 %v5090_v36, %v2719_v32  ;;  %v2720_v33 = vmul.f32 %v6191_v39, %v2688_v16  ;;  %v6061_v39 = vld [vmem:[%s7354_s4 + $0x18] sm:$0xff]  }
0x171d   :  { %v6193_v41 = vpop.eup %6192 }
0x171e   :  { %v2730_v42 = vmul.f32 %v5090_v36, %v2720_v33  ;;  %v2721_v43 = vmul.f32 %v6193_v41, %v2689_v57  ;;  %v2739_v45 = vadd.f32 %v5091_v31, %v2729_v40  ;;  %v2975_v40 = vld [vmem:[%s7361_s18] sm:$0xff]  ;;  %v2977_v41 = vld [vmem:[%s7361_s18 + $0x10] sm:$0xff] }
0x171f   :  { %v6195_v44 = vpop.eup %6194 }
0x1720   :  { %v2740_v46 = vadd.f32 %v5091_v31, %v2730_v42  ;;  %v2731_v47 = vmul.f32 %v5090_v36, %v2721_v43  ;;  %v2722_v48 = vmul.f32 %v6195_v44, %v2690_v61  ;;  %v5097_v61 = vld [vmem:[%s7359_s16] ss:$0 sm:$0xff]  ;;  %v2976_v42 = vld [vmem:[%s7361_s18 + $0x8] sm:$0xff] }
0x1722   :  { %v7000_v49 = vpack.c.bf16 %v2740_v46, %v2739_v45  ;;  %v2732_v50 = vmul.f32 %v5090_v36, %v2722_v48  ;;  %v2741_v20 = vadd.f32 %v5091_v31, %v2731_v47  ;;  %v6060_v36 = vld [vmem:[%s7354_s4 + $0x10] sm:$0xff]   ;;  %v2978_v45 = vld [vmem:[%s7361_s18 + $0x18] sm:$0xff] }
0x1724   :  { %v2742_v21 = vadd.f32 %v5091_v31, %v2732_v50  ;;  %5688 = vmatprep.mubr.msk.bf16.mxu1 %vm294_vm1, %v7000_v49 }
0x1726   :  { %v7004_v17 = vpack.c.bf16 %v2742_v21, %v2741_v20 }
0x1728   :  { %5689 = vmatmul.mubr.msk.bf16.vlgmr.msra.gmra.mrb[44].mxu1 %vm294_vm1, %v7004_v17 }
0x1729   :  { %5693 = vmatpush3.bf16.msra.mxu1 %v6056_v6  ;;  %5696 = vmatprep.mubr.msk.bf16.mxu1 %vm294_vm1, %v7000_v49 }
0x172a   :  { %5694 = vmatprep.subr.bf16.mxu1 %v6057_v1 }
0x172d   :  { %5695 = vmatpush3.bf16.msra.mxu1 %v6057_v1 }
0x172e   :  { %5700 = vmatprep.subr.bf16.mxu1 %v6058_v27 }
0x1730   :  { %5697 = vmatmul.mubr.msk.bf16.vlgmr.msra.gmra.mrb[48].mxu1 %vm294_vm1, %v7004_v17 }
0x1731   :  { %5701 = vmatpush3.bf16.msra.mxu1 %v6058_v27  ;;  %5704 = vmatprep.mubr.msk.bf16.mxu1 %vm294_vm1, %v7000_v49  ;;  %v5126_v27 = vld [vmem:[%s7359_s16 + $0x1] ss:$0 sm:$0xff] }
0x1732   :  { %5702 = vmatprep.subr.bf16.mxu1 %v6059_v52 }
0x1735   :  { %5703 = vmatpush3.bf16.msra.mxu1 %v6059_v52 }
0x1738   :  { %5705 = vmatmul.mubr.msk.bf16.vlgmr.msra.gmra.mrb[52].mxu1 %vm294_vm1, %v7004_v17 }
0x17fb   :  { %v5690_v19 = vpop.f32.mrb[44].mxu1 }
0x17fc   :  { %v2817_v22 = vadd.f32 %v5690_v19, %v5092_v18  ;;  %v2808_v15 = vpop.f32.mrb[45].mxu1 }
0x17fd   :  { %v2809_v24 = vadd.f32 %v5092_v18, %v2808_v15  ;;  %v5691_v25 = vpop.f32.mrb[46].mxu1 }
0x17fe   :  { %v2820_v53 = vadd.f32 %v5691_v25, %v5092_v18  ;;  %v2811_v26 = vpop.f32.mrb[47].mxu1  ;;  %v2825_v54 = vmul.f32 0.35355338, %v2817_v22 }
0x17ff   :  { %v2812_v16 = vadd.f32 %v5092_v18, %v2811_v26  ;;  %v2823_v56 = vmul.f32 0.35355338, %v2809_v24 }
0x1800   :  { %v2826_v55 = vmul.f32 0.35355338, %v2820_v53 }
0x1801   :  { %v2824_v57 = vmul.f32 0.35355338, %v2812_v16 }
0x1802   :  { %v2972_v58 = vpack.c.bf16 %v2826_v55, %v2825_v54 }
0x1803   :  { %v2971_v59 = vpack.c.bf16 %v2824_v57, %v2823_v56  ;;  %v5698_v60 = vpop.f32.mrb[48].mxu1 }
0x1804   :  { %v2884_v62 = vpop.f32.mrb[49].mxu1  ;;  %v2893_v0 = vadd.f32 %v5698_v60, %v5097_v61 }
0x1805   :  { %v5699_v63 = vpop.f32.mrb[50].mxu1  ;;  %5712 = vmatprep.mubr.msk.bf16.mxu1 %vm845_vm2, %v2971_v59  ;;  %v2885_v4 = vadd.f32 %v5097_v61, %v2884_v62 }
0x1806   :  { %v2896_v2 = vadd.f32 %v5699_v63, %v5097_v61  ;;  %v2887_v3 = vpop.f32.mrb[51].mxu1 }
0x1807   :  { %v2888_v5 = vadd.f32 %v5097_v61, %v2887_v3 }
0x1808   :  { %v2974_v6 = vpack.c.bf16 %v2896_v2, %v2893_v0 }
0x1809   :  { %v2973_v7 = vpack.c.bf16 %v2888_v5, %v2885_v4 }
0x180a   :  { %v2989_v32 = vsel %vm845_vm2, %v2974_v6, 0 }
0x180b   :  { %v5706_v8 = vpop.f32.mrb[52].mxu1  ;;  %5892 = vmatprep.subr.msk.bf16.mxu1 %vm845_vm2, %v2973_v7  ;;  %v2986_v12 = vsel %vm845_vm2, %v2973_v7, 0 }
0x180c   :  { %v2956_v13 = vpop.f32.mrb[53].mxu1  ;;  %5709 = vmatpush3.bf16.xpose.msra.mxu1 %v2986_v12  ;;  %v2965_v38 = vadd.f32 %v5706_v8, %v5102_v10 }
0x180d   :  { %v5707_v14 = vpop.f32.mrb[54].mxu1  ;;  %5893 = vmatprep.subr.msk.bf16.mxu1 %vm845_vm2, %v2974_v6  ;;  %v2957_v30 = vadd.f32 %v5102_v10, %v2956_v13 }
0x180e   :  { %v2968_v28 = vadd.f32 %v5707_v14, %v5102_v10  ;;  %v2959_v29 = vpop.f32.mrb[55].mxu1 }
0x180f   :  { %v2960_v37 = vadd.f32 %v5102_v10, %v2959_v29 }
0x1810   :  { %v3087_v34 = vpack.c.bf16 %v2968_v28, %v2965_v38  ;;  %v6062_v28 = vld [vmem:[%s7353_s6 + $0x10] sm:$0xff]  }
0x1811   :  { %v3086_v35 = vpack.c.bf16 %v2960_v37, %v2957_v30 }
0x1813   :  { %5716 = vmatprep.subr.bf16.mxu0 %v3086_v35 }
0x1814   :  { %5711 = vmatpush3.bf16.xpose.msra.mxu1 %v2989_v32  ;;  %5717 = vmatpush3.bf16.msra.mxu0 %v3086_v35 }
0x1815   :  { %5718 = vmatprep.subr.bf16.mxu0 %v3087_v34  ;;  %5732 = vmatprep.subr.bf16.mxu1 %v6060_v36 }
0x1818   :  { %5719 = vmatpush3.bf16.msra.mxu0 %v3087_v34 }
0x1819   :  { %5724 = vmatprep.subr.bf16.mxu0 %v6062_v28 }
0x181b   :  { %5713 = vmatmul.mubr.msk.bf16.vlgmr.msra.gmra.mrb[56].mxu1 %vm845_vm2, %v2972_v58 }
0x181c   :  { %5733 = vmatpush3.bf16.msra.mxu1 %v6060_v36  ;;  %5736 = vmatprep.mubr.msk.bf16.mxu1 %vm294_vm1, %v7000_v49 }
0x181d   :  { %5734 = vmatprep.subr.bf16.mxu1 %v6061_v39 }
0x1820   :  { %5735 = vmatpush3.bf16.msra.mxu1 %v6061_v39 }
0x1823   :  { %5737 = vmatmul.mubr.msk.bf16.vlgmr.msra.gmra.mrb[60].mxu1 %vm294_vm1, %v7004_v17 }
0x18ee   :  { %v5714_v33 = vpop.f32.mrb[56].mxu1 }
0x18ef   :  { %v3025_v31 = vpop.f32.mrb[57].mxu1  ;;  %v3034_v47 = vadd.f32 %v5714_v33, %v2977_v41 }
0x18f0   :  { %v3026_v43 = vadd.f32 %v3025_v31, %v2975_v40  ;;  %v5715_v44 = vpop.f32.mrb[58].mxu1 }
0x18f1   :  { %v3028_v46 = vpop.f32.mrb[59].mxu1  ;;  %v3037_v20 = vadd.f32 %v5715_v44, %v2978_v45  ;;  %v3046_v52 = vsel %vm294_vm1, %v3034_v47, -inf  ;;  %v6063_v44 = vld [vmem:[%s7353_s6 + $0x18] sm:$0xff]   ;;  %v6064_v45 = vld [vmem:[%s7357_s7 + $0x10] sm:$0xff]  }
0x18f2   :  { %v3029_v48 = vadd.f32 %v3028_v46, %v2976_v42  ;;  %v3040_v50 = vsel %vm294_vm1, %v3026_v43, -inf  ;;  %v6065_v46 = vld [vmem:[%s7357_s7 + $0x18] sm:$0xff]  }
0x18f3   :  { %3041 = vmax.xlane.f32.xlu0 %v3040_v50  ;;  %v3049_v22 = vsel %vm294_vm1, %v3037_v20, -inf }
0x18f4   :  { %v3043_v21 = vsel %vm294_vm1, %v3029_v48, -inf }
0x18f5   :  { %3044 = vmax.xlane.f32.xlu1 %v3043_v21 }
0x18f6   :  { %v5738_v1 = vpop.f32.mrb[60].mxu1 }
0x18f7   :  { %v3280_v18 = vpop.f32.mrb[61].mxu1  ;;  %3047 = vmax.xlane.f32.xlu0 %v3046_v52  ;;  %v3289_v15 = vadd.f32 %v5738_v1, %v5126_v27  ;;  %v5116_v1 = vld [vmem:[%s7358_s11 + $0x1] ss:$0 sm:$0xff] }
0x18f8   :  { %v5739_v19 = vpop.f32.mrb[62].mxu1  ;;  %v3281_v53 = vadd.f32 %v5126_v27, %v3280_v18 }
0x18f9   :  { %v3292_v24 = vadd.f32 %v5739_v19, %v5126_v27  ;;  %v3283_v25 = vpop.f32.mrb[63].mxu1  ;;  %3050 = vmax.xlane.f32.xlu1 %v3049_v22 }
0x18fa   :  { %v3284_v26 = vadd.f32 %v5126_v27, %v3283_v25 }
0x18fb   :  { %v3372_v16 = vpack.c.bf16 %v3292_v24, %v3289_v15 }
0x18fc   :  { %v3371_v54 = vpack.c.bf16 %v3284_v26, %v3281_v53 }
0x18fd   :  { %v3388_v56 = vsel %vm845_vm2, %v3372_v16, 0 }
0x18fe   :  { %5894 = vmatprep.subr.msk.bf16.mxu1 %vm845_vm2, %v3371_v54  ;;  %v3385_v55 = vsel %vm845_vm2, %v3371_v54, 0 }
0x18ff   :  { %5749 = vmatpush3.bf16.xpose.msra.mxu1 %v3385_v55 }
0x1900   :  { %5895 = vmatprep.subr.msk.bf16.mxu1 %vm845_vm2, %v3372_v16 }
0x1907   :  { %5751 = vmatpush3.bf16.xpose.msra.mxu1 %v3388_v56 }
0x1980   :  { %v3042_v57 = vpop.xlane.xlu0 %3041 }
0x1981   :  { %v3052_v58 = vsub.f32 %v3026_v43, %v3042_v57 }
0x1982   :  { %v3045_v59 = vpop.xlane.xlu1 %3044 }
0x1983   :  { %v3056_v60 = vmul.f32 1.442695, %v3052_v58  ;;  %v3053_v61 = vsub.f32 %v3029_v48, %v3045_v59  ;;  %v5136_v58 = vld [vmem:[%s7360_s15 + $0x1] ss:$0 sm:$0xff] }
0x1984   :  { %v3048_v62 = vpop.xlane.xlu0 %3047 }
0x1985   :  { %6196 = vpow2.f32 %v3056_v60  ;;  %v3058_v63 = vmul.f32 1.442695, %v3053_v61  ;;  %v3054_v0 = vsub.f32 %v3034_v47, %v3048_v62  ;;  %v6066_v47 = vld [vmem:[%s7354_s4 + $0x20] sm:$0xff]   ;;  %v6067_v60 = vld [vmem:[%s7354_s4 + $0x28] sm:$0xff]  }
0x1986   :  { %v3051_v2 = vpop.xlane.xlu1 %3050  ;;  %5772 = vmatprep.subr.bf16.mxu1 %v6066_v47 }
0x1987   :  { %6198 = vpow2.f32 %v3058_v63  ;;  %v3060_v3 = vmul.f32 1.442695, %v3054_v0  ;;  %v3055_v4 = vsub.f32 %v3037_v20, %v3051_v2 }
0x1989   :  { %6200 = vpow2.f32 %v3060_v3  ;;  %v3062_v5 = vmul.f32 1.442695, %v3055_v4 }
0x198b   :  { %6202 = vpow2.f32 %v3062_v5 }
0x198f   :  { %v6197_v6 = vpop.eup %6196 }
0x1990   :  { %v3064_v7 = vsel %vm294_vm1, %v6197_v6, 0.0 }
0x1991   :  { %v6199_v8 = vpop.eup %6198  ;;  %3065 = vadd.xlane.f32.xlu0 %v3064_v7 }
0x1992   :  { %v3067_v10 = vsel %vm294_vm1, %v6199_v8, 0.0 }
0x1993   :  { %v6201_v12 = vpop.eup %6200  ;;  %3068 = vadd.xlane.f32.xlu1 %v3067_v10 }
0x1994   :  { %v3070_v13 = vsel %vm294_vm1, %v6201_v12, 0.0 }
0x1995   :  { %v6203_v14 = vpop.eup %6202  ;;  %3071 = vadd.xlane.f32.xlu0 %v3070_v13 }
0x1996   :  { %v3073_v38 = vsel %vm294_vm1, %v6203_v14, 0.0 }
0x1997   :  { %3074 = vadd.xlane.f32.xlu1 %v3073_v38  ;;  %v5144_v38 = vld [vmem:[%s7361_s18 + $0x38] sm:$0xff] }
0x1a1e   :  { %v3066_v29 = vpop.xlane.xlu0 %3065 }
0x1a1f   :  { %6204 = vrcp.f32 %v3066_v29 }
0x1a20   :  { %v3069_v30 = vpop.xlane.xlu1 %3068 }
0x1a21   :  { %6206 = vrcp.f32 %v3069_v30 }
0x1a22   :  { %v3072_v37 = vpop.xlane.xlu0 %3071 }
0x1a23   :  { %6208 = vrcp.f32 %v3072_v37 }
0x1a24   :  { %v3075_v34 = vpop.xlane.xlu1 %3074 }
0x1a25   :  { %6210 = vrcp.f32 %v3075_v34 }
0x1a29   :  { %v6205_v35 = vpop.eup %6204 }
0x1a2a   :  { %v3077_v32 = vmul.f32 %v6205_v35, %v6197_v6  ;;  %v5141_v6 = vld [vmem:[%s7361_s18 + $0x20] sm:$0xff] }
0x1a2b   :  { %v6207_v36 = vpop.eup %6206 }
0x1a2c   :  { %v3079_v39 = vmul.f32 %v6207_v36, %v6199_v8  ;;  %v5143_v8 = vld [vmem:[%s7361_s18 + $0x30] sm:$0xff] }
0x1a2d   :  { %v6209_v40 = vpop.eup %6208 }
0x1a2e   :  { %v3084_v33 = vpack.c.bf16 %v3079_v39, %v3077_v32  ;;  %v3081_v31 = vmul.f32 %v6209_v40, %v6201_v12  ;;  %v5142_v12 = vld [vmem:[%s7361_s18 + $0x28] sm:$0xff]  ;;  %v5164_v32 = vld [vmem:[%s7359_s16 + $0x2] ss:$0 sm:$0xff] }
0x1a2f   :  { %v6211_v41 = vpop.eup %6210 }
0x1a30   :  { %v3083_v42 = vmul.f32 %v6211_v41, %v6203_v14  ;;  %5720 = vmatprep.mubr.msk.bf16.mxu0 %vm294_vm1, %v3084_v33 }
0x1a32   :  { %v3085_v43 = vpack.c.bf16 %v3083_v42, %v3081_v31 }
0x1a34   :  { %5721 = vmatmul.mubr.msk.bf16.vlgmr.msra.gmra.mrb[56].mxu0 %vm294_vm1, %v3085_v43 }
0x1a35   :  { %5725 = vmatpush3.bf16.msra.mxu0 %v6062_v28  ;;  %5728 = vmatprep.mubr.msk.bf16.mxu0 %vm294_vm1, %v7000_v49 }
0x1a36   :  { %5726 = vmatprep.subr.bf16.mxu0 %v6063_v44 }
0x1a39   :  { %5727 = vmatpush3.bf16.msra.mxu0 %v6063_v44 }
0x1a3a   :  { %5740 = vmatprep.subr.bf16.mxu0 %v6064_v45 }
0x1a3c   :  { %5729 = vmatmul.mubr.msk.bf16.vlgmr.msra.gmra.mrb[60].mxu0 %vm294_vm1, %v7004_v17 }
0x1a3d   :  { %5741 = vmatpush3.bf16.msra.mxu0 %v6064_v45  ;;  %5744 = vmatprep.mubr.msk.bf16.mxu0 %vm294_vm1, %v7000_v49 }
0x1a3e   :  { %5742 = vmatprep.subr.bf16.mxu0 %v6065_v46 }
0x1a41   :  { %5743 = vmatpush3.bf16.msra.mxu0 %v6065_v46 }
0x1a44   :  { %5745 = vmatmul.mubr.msk.bf16.vlgmr.msra.gmra.mrb[64].mxu0 %vm294_vm1, %v7004_v17 }
0x1b07   :  { %v7066_v48 = vpop.f32.mrb[56].mxu0 }
0x1b08   :  { %v7068_v50 = vpop.f32.mrb[57].mxu0 }
0x1b09   :  { %v7070_v20 = vpop.f32.mrb[58].mxu0 }
0x1b0a   :  { %v7072_v21 = vpop.f32.mrb[59].mxu0 }
0x1b0f   :  { %v5730_v27 = vpop.f32.mrb[60].mxu0 }
0x1b10   :  { %v3211_v52 = vadd.f32 %v5730_v27, %v5116_v1  ;;  %v3202_v18 = vpop.f32.mrb[61].mxu0 }
0x1b11   :  { %v3203_v19 = vadd.f32 %v5116_v1, %v3202_v18  ;;  %v5731_v22 = vpop.f32.mrb[62].mxu0 }
0x1b12   :  { %v3214_v15 = vadd.f32 %v5731_v22, %v5116_v1  ;;  %v3205_v24 = vpop.f32.mrb[63].mxu0  ;;  %v3219_v53 = vmul.f32 0.35355338, %v3211_v52 }
0x1b13   :  { %v3206_v25 = vadd.f32 %v5116_v1, %v3205_v24  ;;  %v3217_v16 = vmul.f32 0.35355338, %v3203_v19 }
0x1b14   :  { %v3220_v26 = vmul.f32 0.35355338, %v3214_v15 }
0x1b15   :  { %v3218_v54 = vmul.f32 0.35355338, %v3206_v25 }
0x1b16   :  { %v3370_v55 = vpack.c.bf16 %v3220_v26, %v3219_v53 }
0x1b17   :  { %v3369_v56 = vpack.c.bf16 %v3218_v54, %v3217_v16  ;;  %v5746_v57 = vpop.f32.mrb[64].mxu0 }
0x1b18   :  { %v3354_v59 = vpop.f32.mrb[65].mxu0  ;;  %v3363_v62 = vadd.f32 %v5746_v57, %v5136_v58 }
0x1b19   :  { %v5747_v61 = vpop.f32.mrb[66].mxu0  ;;  %5752 = vmatprep.mubr.msk.bf16.mxu1 %vm845_vm2, %v3369_v56  ;;  %v3355_v2 = vadd.f32 %v5136_v58, %v3354_v59 }
0x1b1a   :  { %v3366_v63 = vadd.f32 %v5747_v61, %v5136_v58  ;;  %v3357_v0 = vpop.f32.mrb[67].mxu0  ;;  %5753 = vmatmul.mubr.msk.bf16.vlgmr.msra.gmra.mrb[64].mxu1 %vm845_vm2, %v3370_v55 }
0x1b1b   :  { %v3358_v3 = vadd.f32 %v5136_v58, %v3357_v0  ;;  %5773 = vmatpush3.bf16.msra.mxu1 %v6066_v47  ;;  %5776 = vmatprep.mubr.msk.bf16.mxu1 %vm294_vm1, %v7000_v49  ;;  %v6068_v0 = vld [vmem:[%s7353_s6 + $0x20] sm:$0xff]  }
0x1b1c   :  { %v3486_v4 = vpack.c.bf16 %v3366_v63, %v3363_v62  ;;  %5774 = vmatprep.subr.bf16.mxu1 %v6067_v60 }
0x1b1d   :  { %v3485_v5 = vpack.c.bf16 %v3358_v3, %v3355_v2 }
0x1b1f   :  { %5756 = vmatprep.subr.bf16.mxu0 %v3485_v5  ;;  %5775 = vmatpush3.bf16.msra.mxu1 %v6067_v60 }
0x1b20   :  { %5757 = vmatpush3.bf16.msra.mxu0 %v3485_v5 }
0x1b21   :  { %5758 = vmatprep.subr.bf16.mxu0 %v3486_v4 }
0x1b22   :  { %5777 = vmatmul.mubr.msk.bf16.vlgmr.msra.gmra.mrb[68].mxu1 %vm294_vm1, %v7004_v17 }
0x1b24   :  { %5759 = vmatpush3.bf16.msra.mxu0 %v3486_v4 }
0x1b25   :  { %5764 = vmatprep.subr.bf16.mxu0 %v6068_v0 }
0x1bed   :  { %v5754_v7 = vpop.f32.mrb[64].mxu1 }
0x1bee   :  { %v3424_v10 = vpop.f32.mrb[65].mxu1  ;;  %v3433_v29 = vadd.f32 %v5754_v7, %v5143_v8 }
0x1bef   :  { %v3425_v13 = vadd.f32 %v5141_v6, %v3424_v10  ;;  %v5755_v14 = vpop.f32.mrb[66].mxu1 }
0x1bf0   :  { %v3427_v28 = vpop.f32.mrb[67].mxu1  ;;  %v3436_v34 = vadd.f32 %v5755_v14, %v5144_v38  ;;  %v3445_v39 = vsel %vm294_vm1, %v3433_v29, -inf }
0x1bf1   :  { %v3428_v30 = vadd.f32 %v5142_v12, %v3427_v28  ;;  %v3439_v37 = vsel %vm294_vm1, %v3425_v13, -inf }
0x1bf2   :  { %3440 = vmax.xlane.f32.xlu0 %v3439_v37  ;;  %v3448_v41 = vsel %vm294_vm1, %v3436_v34, -inf  ;;  %v6070_v37 = vld [vmem:[%s7357_s7 + $0x20] sm:$0xff]  }
0x1bf3   :  { %v3442_v35 = vsel %vm294_vm1, %v3428_v30, -inf }
0x1bf4   :  { %3443 = vmax.xlane.f32.xlu1 %v3442_v35  ;;  %v6072_v35 = vld [vmem:[%s7354_s4 + $0x30] sm:$0xff]  }
0x1bf5   :  { %v5778_v36 = vpop.f32.mrb[68].mxu1 }
0x1bf6   :  { %v3679_v40 = vpop.f32.mrb[69].mxu1  ;;  %3446 = vmax.xlane.f32.xlu0 %v3445_v39  ;;  %v3688_v31 = vadd.f32 %v5778_v36, %v5164_v32 }
0x1bf7   :  { %v5779_v33 = vpop.f32.mrb[70].mxu1  ;;  %v3680_v44 = vadd.f32 %v5164_v32, %v3679_v40 }
0x1bf8   :  { %v3691_v42 = vadd.f32 %v5779_v33, %v5164_v32  ;;  %v3682_v43 = vpop.f32.mrb[71].mxu1  ;;  %3449 = vmax.xlane.f32.xlu1 %v3448_v41 }
0x1bf9   :  { %v3683_v45 = vadd.f32 %v5164_v32, %v3682_v43 }
0x1bfa   :  { %v3771_v46 = vpack.c.bf16 %v3691_v42, %v3688_v31  ;;  %v5154_v31 = vld [vmem:[%s7358_s11 + $0x2] ss:$0 sm:$0xff] }
0x1bfb   :  { %v3770_v47 = vpack.c.bf16 %v3683_v45, %v3680_v44 }
0x1bfc   :  { %v3787_v27 = vsel %vm845_vm2, %v3771_v46, 0 }
0x1bfd   :  { %5896 = vmatprep.subr.msk.bf16.mxu1 %vm845_vm2, %v3770_v47  ;;  %v3784_v1 = vsel %vm845_vm2, %v3770_v47, 0 }
0x1bfe   :  { %5789 = vmatpush3.bf16.xpose.msra.mxu1 %v3784_v1 }
0x1bff   :  { %5897 = vmatprep.subr.msk.bf16.mxu1 %vm845_vm2, %v3771_v46 }
0x1c06   :  { %5791 = vmatpush3.bf16.xpose.msra.mxu1 %v3787_v27 }
0x1c07   :  { %5812 = vmatprep.subr.bf16.mxu1 %v6072_v35 }
0x1c7f   :  { %v3441_v52 = vpop.xlane.xlu0 %3440 }
0x1c80   :  { %v3451_v18 = vsub.f32 %v3425_v13, %v3441_v52 }
0x1c81   :  { %v3444_v19 = vpop.xlane.xlu1 %3443 }
0x1c82   :  { %v3455_v22 = vmul.f32 1.442695, %v3451_v18  ;;  %v3452_v15 = vsub.f32 %v3428_v30, %v3444_v19  ;;  %v6069_v30 = vld [vmem:[%s7353_s6 + $0x28] sm:$0xff]  }
0x1c83   :  { %v3447_v24 = vpop.xlane.xlu0 %3446 }
0x1c84   :  { %6212 = vpow2.f32 %v3455_v22  ;;  %v3457_v25 = vmul.f32 1.442695, %v3452_v15  ;;  %v3453_v53 = vsub.f32 %v3433_v29, %v3447_v24 }
0x1c85   :  { %v3450_v26 = vpop.xlane.xlu1 %3449 }
0x1c86   :  { %6214 = vpow2.f32 %v3457_v25  ;;  %v3459_v16 = vmul.f32 1.442695, %v3453_v53  ;;  %v3454_v54 = vsub.f32 %v3436_v34, %v3450_v26  ;;  %v6071_v34 = vld [vmem:[%s7357_s7 + $0x28] sm:$0xff]   ;;  %v5174_v53 = vld [vmem:[%s7360_s15 + $0x2] ss:$0 sm:$0xff] }
0x1c88   :  { %6216 = vpow2.f32 %v3459_v16  ;;  %v3461_v55 = vmul.f32 1.442695, %v3454_v54  ;;  %v6073_v16 = vld [vmem:[%s7354_s4 + $0x38] sm:$0xff]  }
0x1c8a   :  { %6218 = vpow2.f32 %v3461_v55 }
0x1c8e   :  { %v6213_v56 = vpop.eup %6212 }
0x1c8f   :  { %v3463_v57 = vsel %vm294_vm1, %v6213_v56, 0.0 }
0x1c90   :  { %v6215_v58 = vpop.eup %6214  ;;  %3464 = vadd.xlane.f32.xlu0 %v3463_v57 }
0x1c91   :  { %v3466_v59 = vsel %vm294_vm1, %v6215_v58, 0.0 }
0x1c92   :  { %v6217_v60 = vpop.eup %6216  ;;  %3467 = vadd.xlane.f32.xlu1 %v3466_v59 }
0x1c93   :  { %v3469_v61 = vsel %vm294_vm1, %v6217_v60, 0.0 }
0x1c94   :  { %v6219_v62 = vpop.eup %6218  ;;  %3470 = vadd.xlane.f32.xlu0 %v3469_v61 }
0x1c95   :  { %v3472_v63 = vsel %vm294_vm1, %v6219_v62, 0.0 }
0x1c96   :  { %3473 = vadd.xlane.f32.xlu1 %v3472_v63 }
0x1d1d   :  { %v3465_v2 = vpop.xlane.xlu0 %3464 }
0x1d1e   :  { %6220 = vrcp.f32 %v3465_v2 }
0x1d1f   :  { %v3468_v3 = vpop.xlane.xlu1 %3467 }
0x1d20   :  { %6222 = vrcp.f32 %v3468_v3  ;;  %v5180_v3 = vld [vmem:[%s7361_s18 + $0x48] sm:$0xff] }
0x1d21   :  { %v3471_v4 = vpop.xlane.xlu0 %3470 }
0x1d22   :  { %6224 = vrcp.f32 %v3471_v4 }
0x1d23   :  { %v3474_v5 = vpop.xlane.xlu1 %3473 }
0x1d24   :  { %6226 = vrcp.f32 %v3474_v5 }
0x1d28   :  { %v6221_v6 = vpop.eup %6220 }
0x1d29   :  { %v3476_v8 = vmul.f32 %v6221_v6, %v6213_v56  ;;  %v5182_v6 = vld [vmem:[%s7361_s18 + $0x58] sm:$0xff] }
0x1d2a   :  { %v6223_v7 = vpop.eup %6222 }
0x1d2b   :  { %v3478_v10 = vmul.f32 %v6223_v7, %v6215_v58 }
0x1d2c   :  { %v6225_v12 = vpop.eup %6224 }
0x1d2d   :  { %v3483_v13 = vpack.c.bf16 %v3478_v10, %v3476_v8  ;;  %v3480_v38 = vmul.f32 %v6225_v12, %v6217_v60 }
0x1d2e   :  { %v6227_v14 = vpop.eup %6226 }
0x1d2f   :  { %v3482_v28 = vmul.f32 %v6227_v14, %v6219_v62  ;;  %5760 = vmatprep.mubr.msk.bf16.mxu0 %vm294_vm1, %v3483_v13  ;;  %v5179_v62 = vld [vmem:[%s7361_s18 + $0x40] sm:$0xff] }
0x1d31   :  { %v3484_v29 = vpack.c.bf16 %v3482_v28, %v3480_v38  ;;  %v5202_v28 = vld [vmem:[%s7359_s16 + $0x3] ss:$0 sm:$0xff] }
0x1d33   :  { %5761 = vmatmul.mubr.msk.bf16.vlgmr.msra.gmra.mrb[68].mxu0 %vm294_vm1, %v3484_v29 }
0x1d34   :  { %5765 = vmatpush3.bf16.msra.mxu0 %v6068_v0  ;;  %5768 = vmatprep.mubr.msk.bf16.mxu0 %vm294_vm1, %v7000_v49  ;;  %v5181_v0 = vld [vmem:[%s7361_s18 + $0x50] sm:$0xff] }
0x1d35   :  { %5766 = vmatprep.subr.bf16.mxu0 %v6069_v30 }
0x1d38   :  { %5767 = vmatpush3.bf16.msra.mxu0 %v6069_v30 }
0x1d39   :  { %5780 = vmatprep.subr.bf16.mxu0 %v6070_v37 }
0x1d3b   :  { %5769 = vmatmul.mubr.msk.bf16.vlgmr.msra.gmra.mrb[72].mxu0 %vm294_vm1, %v7004_v17 }
0x1d3c   :  { %5781 = vmatpush3.bf16.msra.mxu0 %v6070_v37  ;;  %5784 = vmatprep.mubr.msk.bf16.mxu0 %vm294_vm1, %v7000_v49 }
0x1d3d   :  { %5782 = vmatprep.subr.bf16.mxu0 %v6071_v34 }
0x1d40   :  { %5783 = vmatpush3.bf16.msra.mxu0 %v6071_v34 }
0x1d43   :  { %5785 = vmatmul.mubr.msk.bf16.vlgmr.msra.gmra.mrb[76].mxu0 %vm294_vm1, %v7004_v17 }
0x1e06   :  { %v7115_v36 = vpop.f32.mrb[68].mxu0 }
0x1e07   :  { %v7117_v32 = vpop.f32.mrb[69].mxu0 }
0x1e08   :  { %v7119_v39 = vpop.f32.mrb[70].mxu0 }
0x1e09   :  { %v5985_v40 = vpack.i.bf16 %v7119_v39, %v7115_v36  ;;  %v7123_v33 = vpop.f32.mrb[71].mxu0 }
0x1e0a   :  { %v5980_v41 = vpack.i.bf16 %v7123_v33, %v7117_v32 }
0x1e0e   :  { %v5770_v42 = vpop.f32.mrb[72].mxu0 }
0x1e0f   :  { %v3610_v43 = vadd.f32 %v5770_v42, %v5154_v31  ;;  %v3601_v44 = vpop.f32.mrb[73].mxu0 }
0x1e10   :  { %v3602_v45 = vadd.f32 %v5154_v31, %v3601_v44  ;;  %v5771_v46 = vpop.f32.mrb[74].mxu0 }
0x1e11   :  { %v3613_v47 = vadd.f32 %v5771_v46, %v5154_v31  ;;  %v3604_v1 = vpop.f32.mrb[75].mxu0  ;;  %v3618_v52 = vmul.f32 0.35355338, %v3610_v43 }
0x1e12   :  { %v3605_v27 = vadd.f32 %v5154_v31, %v3604_v1  ;;  %v3616_v19 = vmul.f32 0.35355338, %v3602_v45 }
0x1e13   :  { %v3619_v18 = vmul.f32 0.35355338, %v3613_v47 }
0x1e14   :  { %v3617_v22 = vmul.f32 0.35355338, %v3605_v27 }
0x1e15   :  { %v3769_v15 = vpack.c.bf16 %v3619_v18, %v3618_v52 }
0x1e16   :  { %v3768_v24 = vpack.c.bf16 %v3617_v22, %v3616_v19  ;;  %v5786_v25 = vpop.f32.mrb[76].mxu0 }
0x1e17   :  { %v3753_v26 = vpop.f32.mrb[77].mxu0  ;;  %v3762_v55 = vadd.f32 %v5786_v25, %v5174_v53 }
0x1e18   :  { %v5787_v54 = vpop.f32.mrb[78].mxu0  ;;  %5792 = vmatprep.mubr.msk.bf16.mxu1 %vm845_vm2, %v3768_v24  ;;  %v3754_v58 = vadd.f32 %v5174_v53, %v3753_v26 }
0x1e19   :  { %v3765_v56 = vadd.f32 %v5787_v54, %v5174_v53  ;;  %v3756_v57 = vpop.f32.mrb[79].mxu0  ;;  %5793 = vmatmul.mubr.msk.bf16.vlgmr.msra.gmra.mrb[72].mxu1 %vm845_vm2, %v3769_v15 }
0x1e1a   :  { %v3757_v59 = vadd.f32 %v5174_v53, %v3756_v57  ;;  %5813 = vmatpush3.bf16.msra.mxu1 %v6072_v35  ;;  %5816 = vmatprep.mubr.msk.bf16.mxu1 %vm294_vm1, %v7000_v49 }
0x1e1b   :  { %v3885_v60 = vpack.c.bf16 %v3765_v56, %v3762_v55  ;;  %5814 = vmatprep.subr.bf16.mxu1 %v6073_v16 }
0x1e1c   :  { %v3884_v61 = vpack.c.bf16 %v3757_v59, %v3754_v58 }
0x1e1e   :  { %5796 = vmatprep.subr.bf16.mxu0 %v3884_v61  ;;  %5815 = vmatpush3.bf16.msra.mxu1 %v6073_v16 }
0x1e1f   :  { %5797 = vmatpush3.bf16.msra.mxu0 %v3884_v61 }
0x1e20   :  { %5798 = vmatprep.subr.bf16.mxu0 %v3885_v60 }
0x1e21   :  { %5817 = vmatmul.mubr.msk.bf16.vlgmr.msra.gmra.mrb[76].mxu1 %vm294_vm1, %v7004_v17 }
0x1e23   :  { %5799 = vmatpush3.bf16.msra.mxu0 %v3885_v60 }
0x1eec   :  { %v5794_v63 = vpop.f32.mrb[72].mxu1 }
0x1eed   :  { %v3823_v2 = vpop.f32.mrb[73].mxu1  ;;  %v3832_v8 = vadd.f32 %v5794_v63, %v5181_v0  ;;  %v6074_v63 = vld [vmem:[%s7353_s6 + $0x30] sm:$0xff]  }
0x1eee   :  { %v3824_v4 = vadd.f32 %v5179_v62, %v3823_v2  ;;  %v5795_v5 = vpop.f32.mrb[74].mxu1  ;;  %5804 = vmatprep.subr.bf16.mxu0 %v6074_v63 }
0x1eef   :  { %v3826_v7 = vpop.f32.mrb[75].mxu1  ;;  %v3835_v13 = vadd.f32 %v5795_v5, %v5182_v6  ;;  %v3844_v29 = vsel %vm294_vm1, %v3832_v8, -inf }
0x1ef0   :  { %v3827_v10 = vadd.f32 %v5180_v3, %v3826_v7  ;;  %v3838_v12 = vsel %vm294_vm1, %v3824_v4, -inf }
0x1ef1   :  { %3839 = vmax.xlane.f32.xlu0 %v3838_v12  ;;  %v3847_v34 = vsel %vm294_vm1, %v3835_v13, -inf }
0x1ef2   :  { %v3841_v14 = vsel %vm294_vm1, %v3827_v10, -inf }
0x1ef3   :  { %3842 = vmax.xlane.f32.xlu1 %v3841_v14 }
0x1ef4   :  { %v5818_v38 = vpop.f32.mrb[76].mxu1 }
0x1ef5   :  { %v4078_v30 = vpop.f32.mrb[77].mxu1  ;;  %3845 = vmax.xlane.f32.xlu0 %v3844_v29  ;;  %v4087_v35 = vadd.f32 %v5818_v38, %v5202_v28  ;;  %v6075_v29 = vld [vmem:[%s7353_s6 + $0x38] sm:$0xff]  }
0x1ef6   :  { %v5819_v37 = vpop.f32.mrb[78].mxu1  ;;  %v4079_v43 = vadd.f32 %v5202_v28, %v4078_v30  ;;  %v6076_v30 = vld [vmem:[%s7357_s7 + $0x30] sm:$0xff]  }
0x1ef7   :  { %v4090_v31 = vadd.f32 %v5819_v37, %v5202_v28  ;;  %v4081_v42 = vpop.f32.mrb[79].mxu1  ;;  %3848 = vmax.xlane.f32.xlu1 %v3847_v34  ;;  %v6077_v37 = vld [vmem:[%s7357_s7 + $0x38] sm:$0xff]  }
0x1ef8   :  { %v4082_v44 = vadd.f32 %v5202_v28, %v4081_v42 }
0x1ef9   :  { %v4170_v45 = vpack.c.bf16 %v4090_v31, %v4087_v35 }
0x1efa   :  { %v4169_v46 = vpack.c.bf16 %v4082_v44, %v4079_v43 }
0x1efb   :  { %v4186_v1 = vsel %vm845_vm2, %v4170_v45, 0 }
0x1efc   :  { %5898 = vmatprep.subr.msk.bf16.mxu1 %vm845_vm2, %v4169_v46  ;;  %v4183_v47 = vsel %vm845_vm2, %v4169_v46, 0 }
0x1efd   :  { %5829 = vmatpush3.bf16.xpose.msra.mxu1 %v4183_v47 }
0x1efe   :  { %5899 = vmatprep.subr.msk.bf16.mxu1 %vm845_vm2, %v4170_v45 }
0x1f05   :  { %5831 = vmatpush3.bf16.xpose.msra.mxu1 %v4186_v1 }
0x1f7e   :  { %v3840_v27 = vpop.xlane.xlu0 %3839 }
0x1f7f   :  { %v3850_v52 = vsub.f32 %v3824_v4, %v3840_v27 }
0x1f80   :  { %v3843_v18 = vpop.xlane.xlu1 %3842 }
0x1f81   :  { %v3854_v19 = vmul.f32 1.442695, %v3850_v52  ;;  %v3851_v22 = vsub.f32 %v3827_v10, %v3843_v18 }
0x1f82   :  { %v3846_v15 = vpop.xlane.xlu0 %3845 }
0x1f83   :  { %6228 = vpow2.f32 %v3854_v19  ;;  %v3856_v24 = vmul.f32 1.442695, %v3851_v22  ;;  %v3852_v25 = vsub.f32 %v3832_v8, %v3846_v15 }
0x1f84   :  { %v3849_v53 = vpop.xlane.xlu1 %3848 }
0x1f85   :  { %6230 = vpow2.f32 %v3856_v24  ;;  %v3858_v26 = vmul.f32 1.442695, %v3852_v25  ;;  %v3853_v16 = vsub.f32 %v3835_v13, %v3849_v53 }
0x1f87   :  { %6232 = vpow2.f32 %v3858_v26  ;;  %v3860_v54 = vmul.f32 1.442695, %v3853_v16  ;;  %v5212_v16 = vld [vmem:[%s7360_s15 + $0x3] ss:$0 sm:$0xff] }
0x1f89   :  { %6234 = vpow2.f32 %v3860_v54 }
0x1f8d   :  { %v6229_v55 = vpop.eup %6228 }
0x1f8e   :  { %v3862_v56 = vsel %vm294_vm1, %v6229_v55, 0.0 }
0x1f8f   :  { %v6231_v57 = vpop.eup %6230  ;;  %3863 = vadd.xlane.f32.xlu0 %v3862_v56 }
0x1f90   :  { %v3865_v58 = vsel %vm294_vm1, %v6231_v57, 0.0 }
0x1f91   :  { %v6233_v59 = vpop.eup %6232  ;;  %3866 = vadd.xlane.f32.xlu1 %v3865_v58 }
0x1f92   :  { %v3868_v60 = vsel %vm294_vm1, %v6233_v59, 0.0 }
0x1f93   :  { %v6235_v61 = vpop.eup %6234  ;;  %3869 = vadd.xlane.f32.xlu0 %v3868_v60 }
0x1f94   :  { %v3871_v62 = vsel %vm294_vm1, %v6235_v61, 0.0 }
0x1f95   :  { %3872 = vadd.xlane.f32.xlu1 %v3871_v62 }
0x201c   :  { %v3864_v0 = vpop.xlane.xlu0 %3863 }
0x201d   :  { %6236 = vrcp.f32 %v3864_v0 }
0x201e   :  { %v3867_v2 = vpop.xlane.xlu1 %3866 }
0x201f   :  { %6238 = vrcp.f32 %v3867_v2  ;;  %v5219_v2 = vld [vmem:[%s7361_s18 + $0x70] sm:$0xff] }
0x2020   :  { %v3870_v3 = vpop.xlane.xlu0 %3869 }
0x2021   :  { %6240 = vrcp.f32 %v3870_v3 }
0x2022   :  { %v3873_v4 = vpop.xlane.xlu1 %3872 }
0x2023   :  { %6242 = vrcp.f32 %v3873_v4  ;;  %v5218_v4 = vld [vmem:[%s7361_s18 + $0x68] sm:$0xff] }
0x2027   :  { %v6237_v5 = vpop.eup %6236 }
0x2028   :  { %v3875_v7 = vmul.f32 %v6237_v5, %v6229_v55 }
0x2029   :  { %v6239_v6 = vpop.eup %6238 }
0x202a   :  { %v3877_v8 = vmul.f32 %v6239_v6, %v6231_v57 }
0x202b   :  { %v6241_v10 = vpop.eup %6240 }
0x202c   :  { %v3882_v12 = vpack.c.bf16 %v3877_v8, %v3875_v7  ;;  %v3879_v14 = vmul.f32 %v6241_v10, %v6233_v59  ;;  %v5220_v7 = vld [vmem:[%s7361_s18 + $0x78] sm:$0xff] }
0x202d   :  { %v6243_v13 = vpop.eup %6242 }
0x202e   :  { %v3881_v38 = vmul.f32 %v6243_v13, %v6235_v61  ;;  %5800 = vmatprep.mubr.msk.bf16.mxu0 %vm294_vm1, %v3882_v12 }
0x2030   :  { %v3883_v28 = vpack.c.bf16 %v3881_v38, %v3879_v14 }
0x2032   :  { %5801 = vmatmul.mubr.msk.bf16.vlgmr.msra.gmra.mrb[80].mxu0 %vm294_vm1, %v3883_v28 }
0x2033   :  { %5805 = vmatpush3.bf16.msra.mxu0 %v6074_v63  ;;  %5808 = vmatprep.mubr.msk.bf16.mxu0 %vm294_vm1, %v7000_v49  ;;  %v5217_v63 = vld [vmem:[%s7361_s18 + $0x60] sm:$0xff] }
0x2034   :  { %5806 = vmatprep.subr.bf16.mxu0 %v6075_v29 }
0x2037   :  { %5807 = vmatpush3.bf16.msra.mxu0 %v6075_v29 }
0x2038   :  { %5820 = vmatprep.subr.bf16.mxu0 %v6076_v30 }
0x203a   :  { %5809 = vmatmul.mubr.msk.bf16.vlgmr.msra.gmra.mrb[84].mxu0 %vm294_vm1, %v7004_v17 }
0x203b   :  { %5821 = vmatpush3.bf16.msra.mxu0 %v6076_v30  ;;  %5824 = vmatprep.mubr.msk.bf16.mxu0 %vm294_vm1, %v7000_v49  ;;  %v5192_v49 = vld [vmem:[%s7358_s11 + $0x3] ss:$0 sm:$0xff] }
0x203c   :  { %5822 = vmatprep.subr.bf16.mxu0 %v6077_v37 }
0x203f   :  { %5823 = vmatpush3.bf16.msra.mxu0 %v6077_v37 }
0x2042   :  { %5825 = vmatmul.mubr.msk.bf16.vlgmr.msra.gmra.mrb[88].mxu0 %vm294_vm1, %v7004_v17 }
0x2105   :  { %v7167_v34 = vpop.f32.mrb[80].mxu0 }
0x2106   :  { %v7169_v35 = vpop.f32.mrb[81].mxu0 }
0x2107   :  { %v7171_v31 = vpop.f32.mrb[82].mxu0 }
0x2108   :  { %v5995_v42 = vpack.i.bf16 %v7171_v31, %v7167_v34  ;;  %v7175_v43 = vpop.f32.mrb[83].mxu0 }
0x2109   :  { %v5990_v44 = vpack.i.bf16 %v7175_v43, %v7169_v35 }
0x210d   :  { %v5810_v45 = vpop.f32.mrb[84].mxu0 }
0x210e   :  { %v4009_v46 = vadd.f32 %v5810_v45, %v5192_v49  ;;  %v4000_v47 = vpop.f32.mrb[85].mxu0 }
0x210f   :  { %v4001_v17 = vadd.f32 %v5192_v49, %v4000_v47  ;;  %v5811_v1 = vpop.f32.mrb[86].mxu0 }
0x2110   :  { %v4012_v27 = vadd.f32 %v5811_v1, %v5192_v49  ;;  %v4003_v52 = vpop.f32.mrb[87].mxu0  ;;  %v4017_v19 = vmul.f32 0.35355338, %v4009_v46 }
0x2111   :  { %v4004_v18 = vadd.f32 %v5192_v49, %v4003_v52  ;;  %v4015_v15 = vmul.f32 0.35355338, %v4001_v17 }
0x2112   :  { %v4018_v22 = vmul.f32 0.35355338, %v4012_v27 }
0x2113   :  { %v4016_v24 = vmul.f32 0.35355338, %v4004_v18 }
0x2114   :  { %v4168_v25 = vpack.c.bf16 %v4018_v22, %v4017_v19 }
0x2115   :  { %v4167_v53 = vpack.c.bf16 %v4016_v24, %v4015_v15  ;;  %v5826_v26 = vpop.f32.mrb[88].mxu0 }
0x2116   :  { %v4152_v54 = vpop.f32.mrb[89].mxu0  ;;  %v4161_v56 = vadd.f32 %v5826_v26, %v5212_v16 }
0x2117   :  { %v5827_v55 = vpop.f32.mrb[90].mxu0  ;;  %5832 = vmatprep.mubr.msk.bf16.mxu1 %vm845_vm2, %v4167_v53  ;;  %v4153_v59 = vadd.f32 %v5212_v16, %v4152_v54 }
0x2118   :  { %v4164_v57 = vadd.f32 %v5827_v55, %v5212_v16  ;;  %v4155_v58 = vpop.f32.mrb[91].mxu0  ;;  %5833 = vmatmul.mubr.msk.bf16.vlgmr.msra.gmra.mrb[80].mxu1 %vm845_vm2, %v4168_v25 }
0x2119   :  { %v4156_v60 = vadd.f32 %v5212_v16, %v4155_v58  ;;  %v6079_v58 = vld [vmem:[%s7362_s22 + $0x8] sm:$0xff]  }
0x211a   :  { %v4284_v61 = vpack.c.bf16 %v4164_v57, %v4161_v56 }
0x211b   :  { %v4283_v62 = vpack.c.bf16 %v4156_v60, %v4153_v59 }
0x211d   :  { %5836 = vmatprep.subr.bf16.mxu0 %v4283_v62 }
0x211e   :  { %5837 = vmatpush3.bf16.msra.mxu0 %v4283_v62 }
0x211f   :  { %5838 = vmatprep.subr.bf16.mxu0 %v4284_v61 }
0x2122   :  { %5839 = vmatpush3.bf16.msra.mxu0 %v4284_v61 }
0x21eb   :  { %v5834_v0 = vpop.f32.mrb[80].mxu1 }
0x21ec   :  { %v4222_v3 = vpop.f32.mrb[81].mxu1  ;;  %v4231_v10 = vadd.f32 %v5834_v0, %v5219_v2 }
0x21ed   :  { %v4223_v5 = vadd.f32 %v5217_v63, %v4222_v3  ;;  %v5835_v6 = vpop.f32.mrb[82].mxu1 }
0x21ee   :  { %v4225_v8 = vpop.f32.mrb[83].mxu1  ;;  %v4234_v14 = vadd.f32 %v5835_v6, %v5220_v7  ;;  %v4243_v28 = vsel %vm294_vm1, %v4231_v10, -inf }
0x21ef   :  { %v4226_v12 = vadd.f32 %v5218_v4, %v4225_v8  ;;  %v4237_v13 = vsel %vm294_vm1, %v4223_v5, -inf }
0x21f0   :  { %4238 = vmax.xlane.f32.xlu0 %v4237_v13  ;;  %v4246_v29 = vsel %vm294_vm1, %v4234_v14, -inf }
0x21f1   :  { %v4240_v38 = vsel %vm294_vm1, %v4226_v12, -inf }
0x21f2   :  { %4241 = vmax.xlane.f32.xlu1 %v4240_v38 }
0x21f4   :  { %4244 = vmax.xlane.f32.xlu0 %v4243_v28 }
0x21f6   :  { %4247 = vmax.xlane.f32.xlu1 %v4246_v29 }
0x227d   :  { %v4239_v30 = vpop.xlane.xlu0 %4238 }
0x227e   :  { %v4249_v37 = vsub.f32 %v4223_v5, %v4239_v30 }
0x227f   :  { %v4242_v49 = vpop.xlane.xlu1 %4241 }
0x2280   :  { %v4253_v45 = vmul.f32 1.442695, %v4249_v37  ;;  %v4250_v46 = vsub.f32 %v4226_v12, %v4242_v49 }
0x2281   :  { %v4245_v47 = vpop.xlane.xlu0 %4244 }
0x2282   :  { %6244 = vpow2.f32 %v4253_v45  ;;  %v4255_v17 = vmul.f32 1.442695, %v4250_v46  ;;  %v4251_v1 = vsub.f32 %v4231_v10, %v4245_v47 }
0x2283   :  { %v4248_v27 = vpop.xlane.xlu1 %4247 }
0x2284   :  { %6246 = vpow2.f32 %v4255_v17  ;;  %v4257_v52 = vmul.f32 1.442695, %v4251_v1  ;;  %v4252_v18 = vsub.f32 %v4234_v14, %v4248_v27 }
0x2286   :  { %6248 = vpow2.f32 %v4257_v52  ;;  %v4259_v19 = vmul.f32 1.442695, %v4252_v18 }
0x2288   :  { %6250 = vpow2.f32 %v4259_v19 }
0x228c   :  { %v6245_v22 = vpop.eup %6244 }
0x228d   :  { %v4261_v15 = vsel %vm294_vm1, %v6245_v22, 0.0 }
0x228e   :  { %v6247_v24 = vpop.eup %6246  ;;  %4262 = vadd.xlane.f32.xlu0 %v4261_v15 }
0x228f   :  { %v4264_v25 = vsel %vm294_vm1, %v6247_v24, 0.0 }
0x2290   :  { %v6249_v53 = vpop.eup %6248  ;;  %4265 = vadd.xlane.f32.xlu1 %v4264_v25 }
0x2291   :  { %v4267_v26 = vsel %vm294_vm1, %v6249_v53, 0.0 }
0x2292   :  { %v6251_v16 = vpop.eup %6250  ;;  %4268 = vadd.xlane.f32.xlu0 %v4267_v26 }
0x2293   :  { %v4270_v54 = vsel %vm294_vm1, %v6251_v16, 0.0 }
0x2294   :  { %4271 = vadd.xlane.f32.xlu1 %v4270_v54 }
0x22a5   :  { %5986 = vrot.lane.b32.xlu1 %v5985_v40, %s6401_s13 }
0x22a8   :  { %5981 = vrot.lane.b32.xlu0 %v5980_v41, %s6401_s13 }
0x22a9   :  { %5991 = vrot.lane.b32.xlu1 %v5990_v44, %s6402_s17 }
0x22ad   :  { %5996 = vrot.lane.b32.xlu1 %v5995_v42, %s6402_s17  ;;  %v6078_v42 = vld [vmem:[%s7362_s22] sm:$0xff]  }
0x22ae   :  { %5844 = vmatprep.subr.bf16.mxu0 %v6078_v42 }
0x231b   :  { %v4263_v55 = vpop.xlane.xlu0 %4262 }
0x231c   :  { %6252 = vrcp.f32 %v4263_v55 }
0x231d   :  { %v4266_v56 = vpop.xlane.xlu1 %4265 }
0x231e   :  { %6254 = vrcp.f32 %v4266_v56 }
0x231f   :  { %v4269_v36 = vpop.xlane.xlu0 %4268 }
0x2320   :  { %6256 = vrcp.f32 %v4269_v36 }
0x2321   :  { %v4272_v39 = vpop.xlane.xlu1 %4271 }
0x2322   :  { %6258 = vrcp.f32 %v4272_v39 }
0x2323   :  { %v5982_v4 = vpop.permute.xlu0 %5981 }
0x2324   :  { %v5984_v6 = vunpack.i.h.bf16 %v5982_v4  ;;  %v5983_v7 = vunpack.i.l.bf16 %v5982_v4 }
0x2325   :  { %v5987_v2 = vpop.permute.xlu1 %5986 }
0x2326   :  { %v6253_v32 = vpop.eup %6252  ;;  %v5989_v8 = vunpack.i.h.bf16 %v5987_v2  ;;  %v5988_v10 = vunpack.i.l.bf16 %v5987_v2  ;;  %v4389_v28 = vsel %vm845_vm2, %v7072_v21, %v5984_v6  ;;  %v4388_v29 = vsel %vm845_vm2, %v7068_v50, %v5983_v7  ;;  %v6080_v7 = vld [vmem:[%s7364_s26] sm:$0xff]  }
0x2327   :  { %v4274_v33 = vmul.f32 %v6253_v32, %v6245_v22  ;;  %5852 = vmatprep.subr.bf16.mxu1 %v6080_v7 }
0x2328   :  { %v6255_v40 = vpop.eup %6254  ;;  %v4391_v37 = vsel %vm845_vm2, %v7070_v20, %v5989_v8  ;;  %v4390_v49 = vsel %vm845_vm2, %v7066_v48, %v5988_v10  ;;  %5853 = vmatpush3.bf16.msra.mxu1 %v6080_v7  ;;  %v6081_v8 = vld [vmem:[%s7364_s26 + $0x8] sm:$0xff]  }
0x2329   :  { %v4276_v41 = vmul.f32 %v6255_v40, %v6247_v24  ;;  %v5992_v3 = vpop.permute.xlu1 %5991  ;;  %v5225_v24 = vld [vmem:[%s7363_s23] ss:$0 sm:$0xff]  ;;  %5854 = vmatprep.subr.bf16.mxu1 %v6081_v8 }
0x232a   :  { %v6257_v35 = vpop.eup %6256  ;;  %v5994_v14 = vunpack.i.h.bf16 %v5992_v3  ;;  %v5993_v38 = vunpack.i.l.bf16 %v5992_v3 }
0x232b   :  { %v4281_v43 = vpack.c.bf16 %v4276_v41, %v4274_v33  ;;  %v4278_v57 = vmul.f32 %v6257_v35, %v6249_v53 }
0x232c   :  { %v6259_v44 = vpop.eup %6258  ;;  %v4392_v52 = vsel %vm2259_vm3, %v4388_v29, %v5993_v38  ;;  %v4393_v50 = vsel %vm2259_vm3, %v4389_v28, %v5994_v14  ;;  %5855 = vmatpush3.bf16.msra.mxu1 %v6081_v8 }
0x232d   :  { %v4280_v34 = vmul.f32 %v6259_v44, %v6251_v16  ;;  %5840 = vmatprep.mubr.msk.bf16.mxu0 %vm294_vm1, %v4281_v43  ;;  %v5997_v5 = vpop.permute.xlu1 %5996 }
0x232e   :  { %v5999_v12 = vunpack.i.h.bf16 %v5997_v5  ;;  %v5998_v13 = vunpack.i.l.bf16 %v5997_v5 }
0x232f   :  { %v4282_v31 = vpack.c.bf16 %v4280_v34, %v4278_v57 }
0x2330   :  { %v4394_v17 = vsel %vm2259_vm3, %v4390_v49, %v5998_v13  ;;  %v4395_v1 = vsel %vm2259_vm3, %v4391_v37, %v5999_v12 }
0x2331   :  { %5841 = vmatmul.mubr.msk.bf16.vlgmr.msra.gmra.mrb[92].mxu0 %vm294_vm1, %v4282_v31 }
0x2332   :  { %5845 = vmatpush3.bf16.msra.mxu0 %v6078_v42 }
0x2333   :  { %5846 = vmatprep.subr.bf16.mxu0 %v6079_v58 }
0x2336   :  { %5847 = vmatpush3.bf16.msra.mxu0 %v6079_v58 }
0x2404   :  { %v5842_v59 = vpop.f32.mrb[92].mxu0 }
0x2405   :  { %v4325_v60 = vpop.f32.mrb[93].mxu0 }
0x2406   :  { %v5843_v61 = vpop.f32.mrb[94].mxu0 }
0x2407   :  { %v6005_v62 = vpack.i.bf16 %v5843_v61, %v5842_v59  ;;  %v4328_v63 = vpop.f32.mrb[95].mxu0 }
0x2408   :  { %v6000_v0 = vpack.i.bf16 %v4328_v63, %v4325_v60 }
0x2409   :  { %6006 = vrot.lane.b32.xlu1 %v6005_v62, %s6403_s25 }
0x240a   :  { %6001 = vrot.lane.b32.xlu0 %v6000_v0, %s6403_s25 }
0x247b   :  { %v6007_v30 = vpop.permute.xlu1 %6006 }
0x247c   :  { %v6009_v45 = vunpack.i.h.bf16 %v6007_v30  ;;  %v6008_v46 = vunpack.i.l.bf16 %v6007_v30  ;;  %v6002_v47 = vpop.permute.xlu0 %6001 }
0x247d   :  { %v6004_v27 = vunpack.i.h.bf16 %v6002_v47  ;;  %v6003_v21 = vunpack.i.l.bf16 %v6002_v47 }
0x247e   :  { %v4399_v18 = vsel %vm2264_vm4, %v4395_v1, %v6009_v45  ;;  %v4398_v20 = vsel %vm2264_vm4, %v4394_v17, %v6008_v46  ;;  %v5230_v17 = vld [vmem:[%s7365_s28] ss:$0 sm:$0xff] }
0x247f   :  { %v4401_v19 = vpack.c.bf16 %v4399_v18, %v4398_v20  ;;  %v4396_v48 = vsel %vm2264_vm4, %v4392_v52, %v6003_v21  ;;  %v4397_v22 = vsel %vm2264_vm4, %v4393_v50, %v6004_v27  ;;  %v5231_v18 = vld [vmem:[%s7366_s1] ss:$0 sm:$0xff] }
0x2480   :  { %v4400_v15 = vpack.c.bf16 %v4397_v22, %v4396_v48 }
0x2482   :  { %5848 = vmatprep.mubr.msk.bf16.mxu0 %vm294_vm1, %v4400_v15 }
0x2483   :  { %5849 = vmatmul.mubr.msk.bf16.vlgmr.msra.gmra.mrb[96].mxu0 %vm294_vm1, %v4401_v19 }
0x2556   :  { %v5850_v25 = vpop.f32.mrb[96].mxu0 }
0x2557   :  { %v4465_v53 = vpop.f32.mrb[97].mxu0  ;;  %v4474_v26 = vadd.f32 %v5850_v25, %v5225_v24 }
0x2558   :  { %v4466_v16 = vadd.f32 %v5225_v24, %v4465_v53  ;;  %v5851_v54 = vpop.f32.mrb[98].mxu0 }
0x2559   :  { %v4468_v55 = vpop.f32.mrb[99].mxu0  ;;  %v7240_v39 = vadd.f32 %v4474_v26, %v6971_v11  ;;  %v4477_v32 = vadd.f32 %v5851_v54, %v5225_v24 }
0x255a   :  { %v7237_v56 = vadd.f32 %v4466_v16, %v6968_v23  ;;  %v4469_v36 = vadd.f32 %v5225_v24, %v4468_v55 }
0x255b   :  { %v7250_v35 = vadd.f32 %v4477_v32, %v6979_v51  ;;  %v4492_v23 = vsel %vm294_vm1, %v7240_v39, 0.0  ;;  %v6083_v32 = vld [vmem:[%s6614_s27 + $0x8] sm:$0xff]  }
0x255c   :  { %v7243_v40 = vadd.f32 %v4469_v36, %v6974_v9  ;;  %v4486_v33 = vsel %vm294_vm1, %v7237_v56, 0.0  ;;  %v6082_v36 = vld [vmem:[%s6614_s27] sm:$0xff]  }
0x255d   :  { %4487 = vadd.xlane.f32.xlu0 %v4486_v33  ;;  %v4495_v11 = vsel %vm294_vm1, %v7250_v35, 0.0  ;;  %5860 = vmatprep.subr.bf16.mxu0 %v6082_v36  ;;  %v6084_v33 = vld [vmem:[%s6614_s27 + $0x10] sm:$0xff]  }
0x255e   :  { %v4489_v41 = vsel %vm294_vm1, %v7243_v40, 0.0  ;;  %5861 = vmatpush3.bf16.msra.mxu0 %v6082_v36 }
0x255f   :  { %4490 = vadd.xlane.f32.xlu1 %v4489_v41  ;;  %5862 = vmatprep.subr.bf16.mxu0 %v6083_v32  ;;  %v6085_v41 = vld [vmem:[%s6614_s27 + $0x18] sm:$0xff]  }
0x2561   :  { %4493 = vadd.xlane.f32.xlu0 %v4492_v23  ;;  %v6086_v23 = vld [vmem:[%s6614_s27 + $0x20] sm:$0xff]  }
0x2562   :  { %5863 = vmatpush3.bf16.msra.mxu0 %v6083_v32 }
0x2563   :  { %5864 = vmatprep.subr.bf16.mxu0 %v6084_v33 }
0x2565   :  { %4496 = vadd.xlane.f32.xlu0 %v4495_v11  ;;  %v6087_v11 = vld [vmem:[%s6614_s27 + $0x28] sm:$0xff]  }
0x2566   :  { %5865 = vmatpush3.bf16.msra.mxu0 %v6084_v33 }
0x2567   :  { %5866 = vmatprep.subr.bf16.mxu0 %v6085_v41 }
0x256a   :  { %5867 = vmatpush3.bf16.msra.mxu0 %v6085_v41 }
0x256b   :  { %5868 = vmatprep.subr.bf16.mxu0 %v6086_v23 }
0x256e   :  { %5869 = vmatpush3.bf16.msra.mxu0 %v6086_v23 }
0x256f   :  { %5870 = vmatprep.subr.bf16.mxu0 %v6087_v11 }
0x2572   :  { %5871 = vmatpush3.bf16.msra.mxu0 %v6087_v11 }
0x25ea   :  { %v4488_v9 = vpop.xlane.xlu0 %4487 }
0x25eb   :  { %v4498_v43 = vmul.f32 0.03125, %v4488_v9  ;;  %v6088_v9 = vld [vmem:[%s6614_s27 + $0x30] sm:$0xff]  }
0x25ec   :  { %v4491_v44 = vpop.xlane.xlu1 %4490  ;;  %5872 = vmatprep.subr.bf16.mxu0 %v6088_v9 }
0x25ed   :  { %v4502_v57 = vsub.f32 %v7237_v56, %v4498_v43  ;;  %v4499_v34 = vmul.f32 0.03125, %v4491_v44  ;;  %5873 = vmatpush3.bf16.msra.mxu0 %v6088_v9  ;;  %v6089_v43 = vld [vmem:[%s6614_s27 + $0x38] sm:$0xff]   ;;  %v5232_v44 = vld [vmem:[%s7367_s0] ss:$0 sm:$0xff]  ;;  %s6404_s27 = smov [#allocation5]  }
0x25ee   :  { %v4494_v31 = vpop.xlane.xlu0 %4493  ;;  %5874 = vmatprep.subr.bf16.mxu0 %v6089_v43  ;;  %s4859_s5 = sshll.u32 %s6404_s27, 4  ;;  %s4860_s5 = int_to_ptr.vmem [resolvable:$true] %s4859_s5 }
0x25ef   :  { %v4503_v42 = vsub.f32 %v7243_v40, %v4499_v34  ;;  %v4500_v58 = vmul.f32 0.03125, %v4494_v31  ;;  %v4506_v51 = vmul.f32 %v4502_v57, %v4502_v57  ;;  %s6330_s9 = scalar_lea.vmem %s4860_s5, 512  ;;  %p6335_p9 = scmp.lt.s32.totalorder %s4860_s5, %s4860_s5 }
0x25f0   :  { %p6331_p8 = scmp.ne.s32.totalorder %s4860_s5, %s6330_s9  ;;  %p6336_p10 = scmp.lt.s32.totalorder %s6330_s9, %s6330_s9 }
0x25f1   :  { %v4504_v59 = vsub.f32 %v7240_v39, %v4500_v58  ;;  %v4510_v60 = vsel %vm294_vm1, %v4506_v51, 0.0  ;;  %v4507_v61 = vmul.f32 %v4503_v42, %v4503_v42  ;;  %5875 = vmatpush3.bf16.msra.mxu0 %v6089_v43 }
0x25f2   :  { %4511 = vadd.xlane.f32.xlu0 %v4510_v60  ;;  %v4497_v62 = vpop.xlane.xlu0 %4496  ;;  %p6337_p11 = por %p6336_p10, %p6335_p9 }
0x25f3   :  { %v4501_v63 = vmul.f32 0.03125, %v4497_v62  ;;  %v4513_v0 = vsel %vm294_vm1, %v4507_v61, 0.0  ;;  %v4508_v2 = vmul.f32 %v4504_v59, %v4504_v59 }
0x25f4   :  { %4514 = vadd.xlane.f32.xlu1 %v4513_v0  ;;  %p6338_p12 = pnand %p6337_p11, %p6331_p8 }
0x25f5   :  { %v4505_v3 = vsub.f32 %v7250_v35, %v4501_v63  ;;  %v4516_v4 = vsel %vm294_vm1, %v4508_v2, 0.0 }
0x25f6   :  { %4517 = vadd.xlane.f32.xlu0 %v4516_v4 }
0x25f7   :  { %v4509_v5 = vmul.f32 %v4505_v3, %v4505_v3 }
0x25f9   :  { %v4519_v6 = vsel %vm294_vm1, %v4509_v5, 0.0 }
0x25fa   :  { %4520 = vadd.xlane.f32.xlu1 %v4519_v6 }
0x267f   :  { %v4512_v10 = vpop.xlane.xlu0 %4511 }
0x2680   :  { %v4522_v12 = vmul.f32 0.03125, %v4512_v10 }
0x2681   :  { %v4515_v13 = vpop.xlane.xlu1 %4514 }
0x2682   :  { %v4526_v14 = vadd.f32 1e-05, %v4522_v12  ;;  %v4523_v38 = vmul.f32 0.03125, %v4515_v13 }
0x2683   :  { %v4518_v28 = vpop.xlane.xlu0 %4517 }
0x2684   :  { %6260 = vrsqrt.f32 %v4526_v14  ;;  %v4527_v29 = vadd.f32 1e-05, %v4523_v38  ;;  %v4524_v30 = vmul.f32 0.03125, %v4518_v28 }
0x2686   :  { %6262 = vrsqrt.f32 %v4527_v29  ;;  %v4528_v37 = vadd.f32 1e-05, %v4524_v30 }
0x2687   :  { %v4521_v49 = vpop.xlane.xlu1 %4520 }
0x2688   :  { %6264 = vrsqrt.f32 %v4528_v37  ;;  %v4525_v45 = vmul.f32 0.03125, %v4521_v49 }
0x268a   :  { %v4529_v46 = vadd.f32 1e-05, %v4525_v45 }
0x268c   :  { %6266 = vrsqrt.f32 %v4529_v46 }
0x268e   :  { %v6261_v47 = vpop.eup %6260 }
0x268f   :  { %v4534_v1 = vmul.f32 %v6261_v47, %v4502_v57 }
0x2690   :  { %v6263_v27 = vpop.eup %6262 }
0x2691   :  { %v4535_v21 = vmul.f32 %v6263_v27, %v4503_v42  ;;  %v4544_v52 = vmul.f32 %v5230_v17, %v4534_v1 }
0x2692   :  { %v6265_v50 = vpop.eup %6264 }
0x2693   :  { %v4536_v20 = vmul.f32 %v6265_v50, %v4504_v59  ;;  %v4545_v19 = vmul.f32 %v5230_v17, %v4535_v21  ;;  %v4554_v48 = vadd.f32 %v5231_v18, %v4544_v52 }
0x2695   :  { %v4555_v22 = vadd.f32 %v5231_v18, %v4545_v19  ;;  %v4546_v24 = vmul.f32 %v5230_v17, %v4536_v20 }
0x2696   :  { %v6267_v15 = vpop.eup %6266 }
0x2697   :  { %v4537_v25 = vmul.f32 %v6267_v15, %v4505_v3  ;;  %v4558_v53 = vpack.c.bf16 %v4555_v22, %v4554_v48  ;;  %v4556_v16 = vadd.f32 %v5231_v18, %v4546_v24 }
0x2699   :  { %v4547_v26 = vmul.f32 %v5230_v17, %v4537_v25  ;;  %5856 = vmatprep.mubr.msk.bf16.mxu1 %vm294_vm1, %v4558_v53  ;;  %v5237_v53 = vld [vmem:[#allocation2] ss:$0 sm:$0xff] }
0x269b   :  { %v4557_v54 = vadd.f32 %v5231_v18, %v4547_v26 }
0x269d   :  { %v4559_v55 = vpack.c.bf16 %v4557_v54, %v4556_v16 }
0x269f   :  { %5857 = vmatmul.mubr.msk.bf16.vlgmr.msra.gmra.mrb[84].mxu1 %vm294_vm1, %v4559_v55 }
0x2772   :  { %v5858_v57 = vpop.f32.mrb[84].mxu1 }
0x2773   :  { %v4632_v34 = vadd.f32 %v5858_v57, %v5232_v44  ;;  %v4623_v31 = vpop.f32.mrb[85].mxu1 }
0x2774   :  { %v4624_v42 = vadd.f32 %v5232_v44, %v4623_v31  ;;  %v5859_v58 = vpop.f32.mrb[86].mxu1 }
0x2775   :  { %v4640_v51 = vmul.f32 %v4632_v34, %v4632_v34  ;;  %v4635_v59 = vadd.f32 %v5859_v58, %v5232_v44  ;;  %v4626_v60 = vpop.f32.mrb[87].mxu1 }
0x2776   :  { %v4638_v61 = vmul.f32 %v4624_v42, %v4624_v42  ;;  %v4627_v62 = vadd.f32 %v5232_v44, %v4626_v60 }
0x2777   :  { %v4644_v63 = vmul.f32 %v4640_v51, %v4632_v34  ;;  %v4641_v0 = vmul.f32 %v4635_v59, %v4635_v59 }
0x2778   :  { %v4642_v2 = vmul.f32 %v4638_v61, %v4624_v42  ;;  %v4639_v3 = vmul.f32 %v4627_v62, %v4627_v62 }
0x2779   :  { %v4648_v4 = vmul.f32 0.044715, %v4644_v63  ;;  %v4645_v5 = vmul.f32 %v4641_v0, %v4635_v59 }
0x277a   :  { %v4646_v6 = vmul.f32 0.044715, %v4642_v2  ;;  %v4643_v7 = vmul.f32 %v4639_v3, %v4627_v62 }
0x277b   :  { %v4652_v8 = vadd.f32 %v4648_v4, %v4632_v34  ;;  %v4649_v10 = vmul.f32 0.044715, %v4645_v5 }
0x277c   :  { %v4650_v12 = vadd.f32 %v4646_v6, %v4624_v42  ;;  %v4647_v13 = vmul.f32 0.044715, %v4643_v7 }
0x277d   :  { %v4656_v14 = vmul.f32 0.7978846, %v4652_v8  ;;  %v4653_v38 = vadd.f32 %v4649_v10, %v4635_v59 }
0x277e   :  { %v4654_v28 = vmul.f32 0.7978846, %v4650_v12  ;;  %v4651_v29 = vadd.f32 %v4647_v13, %v4627_v62 }
0x277f   :  { %6268 = vtanh.f32 %v4656_v14  ;;  %v4657_v30 = vmul.f32 0.7978846, %v4653_v38 }
0x2780   :  { %6270 = vtanh.f32 %v4654_v28  ;;  %v4655_v37 = vmul.f32 0.7978846, %v4651_v29 }
0x2781   :  { %6272 = vtanh.f32 %v4657_v30 }
0x2782   :  { %6274 = vtanh.f32 %v4655_v37 }
0x2789   :  { %v6269_v49 = vpop.eup %6268 }
0x278a   :  { %v6271_v45 = vpop.eup %6270  ;;  %v4664_v46 = vadd.f32 1.0, %v6269_v49 }
0x278b   :  { %v6273_v47 = vpop.eup %6272  ;;  %v4662_v17 = vadd.f32 1.0, %v6271_v45 }
0x278c   :  { %v6275_v1 = vpop.eup %6274  ;;  %v4668_v27 = vmul.f32 0.5, %v4664_v46  ;;  %v4665_v21 = vadd.f32 1.0, %v6273_v47 }
0x278d   :  { %v4663_v52 = vadd.f32 1.0, %v6275_v1  ;;  %v4666_v50 = vmul.f32 0.5, %v4662_v17 }
0x278e   :  { %v4669_v18 = vmul.f32 0.5, %v4665_v21  ;;  %v4672_v19 = vmul.f32 %v4668_v27, %v4632_v34 }
0x278f   :  { %v4667_v20 = vmul.f32 0.5, %v4663_v52  ;;  %v4670_v22 = vmul.f32 %v4666_v50, %v4624_v42 }
0x2790   :  { %v4673_v48 = vmul.f32 %v4669_v18, %v4635_v59 }
0x2791   :  { %v4671_v15 = vmul.f32 %v4667_v20, %v4627_v62 }
0x2792   :  { %v4675_v24 = vpack.c.bf16 %v4673_v48, %v4672_v19 }
0x2793   :  { %v4674_v25 = vpack.c.bf16 %v4671_v15, %v4670_v22 }
0x2795   :  { %5876 = vmatprep.mubr.bf16.mxu0 %v4674_v25 }
0x2796   :  { %5877 = vmatmul.mubr.bf16.vlgmr.msra.gmra.mrb[100].mxu0 %v4675_v24 }
0x2869   :  { %v5878_v26 = vpop.f32.mrb[100].mxu0 }
0x286a   :  { %v4790_v16 = vadd.f32 %v5878_v26, %v5237_v53  ;;  %v4781_v54 = vpop.f32.mrb[101].mxu0 }
0x286b   :  { %v4782_v55 = vadd.f32 %v5237_v53, %v4781_v54  ;;  %v5879_v36 = vpop.f32.mrb[102].mxu0 }
0x286c   :  { %v4798_v32 = vadd.f32 %v4790_v16, %v7240_v39  ;;  %v4793_v33 = vadd.f32 %v5879_v36, %v5237_v53  ;;  %v4784_v41 = vpop.f32.mrb[103].mxu0 }
0x286d   :  { %v4796_v23 = vadd.f32 %v4782_v55, %v7237_v56  ;;  %v4785_v11 = vadd.f32 %v5237_v53, %v4784_v41 }
0x286e   :  { %v5248_v9 = vmul.f32 -1.442695, %v4798_v32  ;;  %v4799_v43 = vadd.f32 %v4793_v33, %v7250_v35 }
0x286f   :  { %v5246_v44 = vmul.f32 -1.442695, %v4796_v23  ;;  %v4797_v57 = vadd.f32 %v4785_v11, %v7243_v40 }
0x2870   :  { %6276 = vpow2.f32 %v5248_v9  ;;  %v5249_v34 = vmul.f32 -1.442695, %v4799_v43 }
0x2871   :  { %6278 = vpow2.f32 %v5246_v44  ;;  %v5247_v31 = vmul.f32 -1.442695, %v4797_v57 }
0x2872   :  { %6280 = vpow2.f32 %v5249_v34 }
0x2873   :  { %6282 = vpow2.f32 %v5247_v31 }
0x2874   :  { %6284 = vtanh.f32 %v4798_v32 }
0x2875   :  { %6286 = vtanh.f32 %v4796_v23 }
0x2876   :  { %6288 = vtanh.f32 %v4799_v43 }
0x287a   :  { %v6277_v42 = vpop.eup %6276 }
0x287b   :  { %v6279_v39 = vpop.eup %6278  ;;  %v4814_v58 = vadd.f32 1.0, %v6277_v42 }
0x287c   :  { %v6281_v51 = vpop.eup %6280  ;;  %v4812_v56 = vadd.f32 1.0, %v6279_v39 }
0x287d   :  { %6290 = vrcp.f32 %v4814_v58  ;;  %v4815_v59 = vadd.f32 1.0, %v6281_v51  ;;  %v6283_v35 = vpop.eup %6282 }
0x287e   :  { %6292 = vrcp.f32 %v4812_v56  ;;  %v4813_v40 = vadd.f32 1.0, %v6283_v35  ;;  %v6285_v60 = vpop.eup %6284 }
0x287f   :  { %6294 = vrcp.f32 %v4815_v59  ;;  %v6287_v61 = vpop.eup %6286 }
0x2880   :  { %6296 = vtanh.f32 %v4797_v57  ;;  %v6289_v62 = vpop.eup %6288 }
0x2881   :  { %6298 = vrcp.f32 %v4813_v40 }
0x2887   :  { %v6291_v63 = vpop.eup %6290 }
0x2888   :  { %v6293_v0 = vpop.eup %6292  ;;  %v4834_v2 = vmul.f32 %v6291_v63, %v6285_v60 }
0x2889   :  { %v6295_v3 = vpop.eup %6294  ;;  %v4832_v4 = vmul.f32 %v6293_v0, %v6287_v61 }
0x288a   :  { %v6297_v5 = vpop.eup %6296  ;;  %6300 = vtanh.f32 %v4834_v2  ;;  %4850 = vst.msk [vmem:[#allocation5 + $0x10] sm:$0xff] %vm294_vm1, %v4834_v2  ;;  %v4835_v6 = vmul.f32 %v6295_v3, %v6289_v62 }
0x288b   :  { %v6299_v7 = vpop.eup %6298  ;;  %6302 = vtanh.f32 %v4832_v4  ;;  %4848 = vst.msk [vmem:[#allocation5] sm:$0xff] %vm294_vm1, %v4832_v4 }
0x288c   :  { %6304 = vtanh.f32 %v4835_v6  ;;  %4851 = vst.msk [vmem:[#allocation5 + $0x18] sm:$0xff] %vm294_vm1, %v4835_v6  ;;  %v4833_v8 = vmul.f32 %v6299_v7, %v6297_v5 }
0x288e   :  { %6306 = vtanh.f32 %v4833_v8  ;;  %4849 = vst.msk [vmem:[#allocation5 + $0x8] sm:$0xff] %vm294_vm1, %v4833_v8 }
0x288f   :  { %6341 = shalt.err (!%p6338_p12)
}
0x2890   :  { %s6342_s17 = scalar_lea.hbm %s6627_s20, 512 }
0x2891   :  { %p6343_p13 = scmp.ne.s32.totalorder %s6627_s20, %s6342_s17  ;;  %p6346_p0 = scmp.lt.u32.totalorder %s6342_s17, %s6627_s20 }
0x2893   :  { %p6348_p1 = pnand %p6346_p0, %p6343_p13 }
0x2895   :  { %6351 = shalt.err (!%p6348_p1)
}
0x2896   :  { %s6405_s21 = smov 128   ;;  %v6301_v10 = vpop.eup %6300 }
0x2897   :  { %4865 = dma.vmem_to_hbm [thread:$0]  %s4860_s5, 512, %s6627_s20, [#allocation4], %s6405_s21, %s6405_s21, %s6401_s13   ;;  %v6303_v12 = vpop.eup %6302  ;;  %v4842_v13 = vmul.f32 %v6301_v10, %v6291_v63 }
0x2898   :  { %v6305_v14 = vpop.eup %6304  ;;  %v4840_v38 = vmul.f32 %v6303_v12, %v6293_v0 }
0x2899   :  { %4846 = vst.msk [vmem:[%s6622_s12 + $0x10] sm:$0xff] %vm294_vm1, %v4842_v13  ;;  %v4843_v28 = vmul.f32 %v6305_v14, %v6295_v3  ;;  %v6307_v29 = vpop.eup %6306 }
0x289a   :  { %4844 = vst.msk [vmem:[%s6622_s12] sm:$0xff] %vm294_vm1, %v4840_v38  ;;  %v4841_v30 = vmul.f32 %v6307_v29, %v6299_v7 }
0x289b   :  { %4847 = vst.msk [vmem:[%s6622_s12 + $0x18] sm:$0xff] %vm294_vm1, %v4843_v28 }
0x289c   :  { %4845 = vst.msk [vmem:[%s6622_s12 + $0x8] sm:$0xff] %vm294_vm1, %v4841_v30 }
0x289d   :  { %6354 = dma.done.wait [#allocation4], 512  }
0x289e   :  { %6355 = vsyncadd [#allocation4], 4294966784 }
0x289f   :  { %4871 = vsyncpa [#allocation3], 1 }
0x28a0   :  { %4872 = vsyncpa [#allocation4], 1 }

</bundles_post_ra>
